<compile_context>
chip_gen: v7x
topology: tpu7x:2x2x1
jax: 0.10.0
libtpu: 0.0.40
codegen_flags: <defaults>
</compile_context>

<pallas_src>
import functools

import jax
import jax.numpy as jnp
import numpy as np
from jax import lax
from jax.experimental import pallas as pl
from jax.experimental.pallas import tpu as pltpu

K = 7     # conv kernel size
PAD = 3   # conv padding


def spatial_attention_kernel(x_ref, w_ref, b_ref, o_ref, *, H, W, chunk):
    """One batch element.

    x_ref/o_ref: (C, H*W) VMEM, lane-dense (HW on the lane axis).
    w_ref:       (2*K*K,) SMEM -- [avg-channel taps | max-channel taps] (OIHW).
    b_ref:       (1,) SMEM.
    """
    C, HW = x_ref.shape
    n_full = C // chunk
    rem = C - n_full * chunk

    # ------------------------------------------------------------------
    # Channel sum / max: sublane-resident (chunk, HW) accumulators inside a
    # fori_loop; a single cross-sublane (XLU) reduce after the loop.
    # ------------------------------------------------------------------
    part_sum = []
    part_max = []
    if n_full:
        def stats_body(i, carry):
            s_acc, m_acc = carry
            c0 = pl.multiple_of(i * chunk, chunk)
            xc = x_ref[pl.ds(c0, chunk), :].astype(jnp.float32)
            return s_acc + xc, jnp.maximum(m_acc, xc)

        s_acc, m_acc = lax.fori_loop(
            0, n_full, stats_body,
            (jnp.zeros((chunk, HW), jnp.float32),
             jnp.full((chunk, HW), -jnp.inf, jnp.float32)))
        part_sum.append(jnp.sum(s_acc, axis=0, keepdims=True))
        part_max.append(jnp.max(m_acc, axis=0, keepdims=True))
    if rem:
        xt = x_ref[pl.ds(n_full * chunk, rem), :].astype(jnp.float32)
        part_sum.append(jnp.sum(xt, axis=0, keepdims=True))
        part_max.append(jnp.max(xt, axis=0, keepdims=True))

    sum_1 = part_sum[0] if len(part_sum) == 1 else part_sum[0] + part_sum[1]
    max_1 = part_max[0] if len(part_max) == 1 else jnp.maximum(part_max[0], part_max[1])
    avg_1 = sum_1 * (1.0 / C)

    # Stack the two conv input channels on the sublane axis: one roll / mask /
    # MAC per tap covers both channels.
    stacked = jnp.concatenate([avg_1, max_1], axis=0)            # (2, HW) f32

    # ------------------------------------------------------------------
    # 7x7 zero-padded cross-correlation over the 2-channel (avg, max) map,
    # fully in-register on the flat (2, HW) layout:
    #   conv[p] = sum_{kh,kw} w[kh,kw] * map[p + (kh-PAD)*W + (kw-PAD)]
    # with out-of-image source positions masked to zero.  Each tap is one XLU
    # rotate (pltpu.roll) + a border mask rebuilt per tap from two iota maps.
    # ------------------------------------------------------------------
    flat = lax.broadcasted_iota(jnp.int32, (2, HW), 1)            # flat position
    col = lax.broadcasted_iota(jnp.int32, (2, W), 1)              # column index
    while col.shape[1] < HW:                                      # period-W tile
        col = jnp.concatenate([col, col], axis=1)
    col = col[:, :HW]

    # (2,1) selector used to build the per-tap (avg-weight, max-weight) column.
    is_avg_row = lax.broadcasted_iota(jnp.int32, (2, 1), 0) == 0

    acc = jnp.zeros((2, HW), jnp.float32)
    for kh in range(K):
        dh = kh - PAD
        for kw in range(K):
            dw = kw - PAD
            s = dh * W + dw
            rolled = pltpu.roll(stacked, shift=(-s) % HW, axis=1) if s else stacked

            # Border-validity mask for this tap (output position is valid iff
            # the source row/col stays inside the H x W image).
            if dh > 0:
                rmask = flat < (H - dh) * W
            elif dh < 0:
                rmask = flat >= (-dh) * W
            else:
                rmask = None
            if dw > 0:
                cmask = col < (W - dw)
            elif dw < 0:
                cmask = col >= (-dw)
            else:
                cmask = None
            if rmask is None:
                mask = cmask
            elif cmask is None:
                mask = rmask
            else:
                mask = jnp.logical_and(rmask, cmask)

            wa = w_ref[kh * K + kw]              # avg-channel weight (SMEM scalar)
            wm = w_ref[K * K + kh * K + kw]      # max-channel weight (SMEM scalar)
            wcol = jnp.where(is_avg_row, wa, wm)                  # (2, 1)
            contrib = rolled * wcol
            if mask is not None:
                contrib = jnp.where(mask, contrib, 0.0)
            acc = acc + contrib

    conv = jnp.sum(acc, axis=0, keepdims=True) + b_ref[0]         # (1, HW)
    attn = jax.nn.sigmoid(conv)

    # ------------------------------------------------------------------
    # out = x * attn, streamed over channels with full-lane stores.  The attn
    # sublane broadcast is hoisted out of the loop and kept in the I/O dtype.
    # ------------------------------------------------------------------
    bc = chunk if n_full else rem
    attn_b = jnp.broadcast_to(attn.astype(o_ref.dtype), (bc, HW))

    if n_full:
        def mul_body(i, carry):
            c0 = pl.multiple_of(i * chunk, chunk)
            o_ref[pl.ds(c0, chunk), :] = (
                x_ref[pl.ds(c0, chunk), :] * attn_b).astype(o_ref.dtype)
            return carry

        lax.fori_loop(0, n_full, mul_body, 0)
    if rem:
        c0 = n_full * chunk
        attn_t = attn_b if rem == bc else attn_b[:rem, :]
        o_ref[pl.ds(c0, rem), :] = (
            x_ref[pl.ds(c0, rem), :] * attn_t).astype(o_ref.dtype)


def spatial_attention(x, conv_w, conv_b):
    """x: (N, C, H, W); conv_w: (1, 2, 7, 7); conv_b: (1,)."""
    N, C, H, W = x.shape
    HW = H * W
    x_flat = x.reshape(N, C, HW)                       # contiguous -> free reshape
    w_flat = conv_w.reshape(-1).astype(jnp.float32)    # (2*K*K,), OIHW flatten
    b = conv_b.astype(jnp.float32)                     # (1,)

    # Wider channel chunks for 16-bit inputs so chunk loads fill (16,128) vregs.
    chunk = 16 if x.dtype.itemsize == 2 else 8

    kernel = functools.partial(spatial_attention_kernel, H=H, W=W, chunk=chunk)

    # VMEM budget: one (C, HW) block each for input and output, double-buffered
    # when the chip has room (v5e/v6e 128 MiB), single-buffered otherwise (v7x
    # 64 MiB).
    block_bytes = C * HW * x.dtype.itemsize
    try:
        vmem_cap = int(pltpu.get_tpu_info().vmem_capacity_bytes)
    except Exception:                                  # conservative (v7x-sized)
        vmem_cap = 64 * 1024 * 1024
    budget = int(0.75 * vmem_cap)
    headroom = 8 * 1024 * 1024                         # conv temps, spills, etc.
    double_buffer = 4 * block_bytes + headroom <= budget
    vmem_limit = (4 if double_buffer else 2) * block_bytes + headroom
    vmem_limit = max(min(vmem_limit, budget), 16 * 1024 * 1024)
    # TODO(synk): if even single-buffered (C,HW) blocks exceed VMEM (very large
    # C*HW), add a C-tile grid axis with channel stats carried in VMEM scratch.

    def xspec():
        shape = (pl.Squeezed(), C, HW)
        imap = lambda n: (n, 0, 0)
        if double_buffer:
            return pl.BlockSpec(shape, imap)
        return pl.BlockSpec(shape, imap, pipeline_mode=pl.Buffered(1))

    out_flat = pl.pallas_call(
        kernel,
        out_shape=jax.ShapeDtypeStruct((N, C, HW), x.dtype),
        grid=(N,),
        in_specs=[
            xspec(),
            pl.BlockSpec(memory_space=pltpu.MemorySpace.SMEM),
            pl.BlockSpec(memory_space=pltpu.MemorySpace.SMEM),
        ],
        out_specs=xspec(),
        compiler_params=pltpu.CompilerParams(
            dimension_semantics=("parallel",),
            vmem_limit_bytes=int(vmem_limit),
        ),
    )(x_flat, w_flat, b)
    return out_flat.reshape(N, C, H, W)


def spatial_attention_ref(x, conv_w, conv_b):
    """Pure-JAX reference (mirrors the PyTorch forward)."""
    avg = jnp.mean(x, axis=1, keepdims=True)
    mx = jnp.max(x, axis=1, keepdims=True)
    x_cat = jnp.concatenate([avg, mx], axis=1)
    conv = jax.lax.conv_general_dilated(
        x_cat, conv_w, window_strides=(1, 1),
        padding=((PAD, PAD), (PAD, PAD)),
        dimension_numbers=("NCHW", "OIHW", "NCHW"))
    attn = jax.nn.sigmoid(conv + conv_b.reshape(1, 1, 1, 1))
    return x * attn


if __name__ == "__main__":
    key = jax.random.PRNGKey(0)
    kx, kw, kb = jax.random.split(key, 3)

    N, C, H, W = 2, 4, 16, 16
    x = jax.random.normal(kx, (N, C, H, W), dtype=jnp.float32)

    # Deterministic synthetic parameters (shapes from nn.Conv2d(2, 1, 7, padding=3)).
    conv_w = jax.random.normal(kw, (1, 2, K, K), dtype=jnp.float32) * 0.1
    conv_b = jax.random.normal(kb, (1,), dtype=jnp.float32) * 0.1

    out = jax.block_until_ready(spatial_attention(x, conv_w, conv_b))
    ref = jax.block_until_ready(spatial_attention_ref(x, conv_w, conv_b))

    np.testing.assert_allclose(np.asarray(out), np.asarray(ref), rtol=1e-4, atol=2e-5)
    print("KERNEL_OK")
</pallas_src>

<mosaic_0001>
module attributes {stable_mosaic.version = 11 : i64} {
  func.func @spatial_attention_kernel(%arg0: i32, %arg1: memref<1x4x256xf32, #tpu.memory_space<vmem>>, %arg2: memref<98xf32, #tpu.memory_space<smem>>, %arg3: memref<1xf32, #tpu.memory_space<smem>>, %arg4: memref<1x4x256xf32, #tpu.memory_space<vmem>>) attributes {dimension_semantics = [#tpu.dimension_semantics<parallel>], iteration_bounds = array<i64: 2>, scalar_prefetch = 0 : i64, scratch_operands = 0 : i64, tpu.core_type = #tpu.core_type<tc>, window_params = [{transform_indices = @transform_0, window_bounds = array<i64: 1, 4, 256>}, {transform_indices = @transform_1, window_bounds = array<i64: 98>}, {transform_indices = @transform_2, window_bounds = array<i64: 1>}, {transform_indices = @transform_3, window_bounds = array<i64: 1, 4, 256>}]} {
    %c0 = arith.constant 0 : index
    %c0_0 = arith.constant 0 : index
    %c0_1 = arith.constant 0 : index
    %0 = vector.load %arg1[%c0, %c0_0, %c0_1] : memref<1x4x256xf32, #tpu.memory_space<vmem>>, vector<1x4x256xf32>
    %1 = vector.shape_cast %0 : vector<1x4x256xf32> to vector<4x256xf32>
    %cst = arith.constant dense<0.000000e+00> : vector<256xf32>
    %2 = vector.multi_reduction <add>, %1, %cst [0] : vector<4x256xf32> to vector<256xf32>
    %3 = vector.shape_cast %2 : vector<256xf32> to vector<1x256xf32>
    %cst_2 = arith.constant dense<0xFF800000> : vector<256xf32>
    %4 = vector.multi_reduction <maximumf>, %1, %cst_2 [0] : vector<4x256xf32> to vector<256xf32>
    %5 = vector.shape_cast %4 : vector<256xf32> to vector<1x256xf32>
    %cst_3 = arith.constant 2.500000e-01 : f32
    %6 = vector.broadcast %cst_3 : f32 to vector<1x256xf32>
    %7 = arith.mulf %3, %6 : vector<1x256xf32>
    %8 = tpu.concatenate %7, %5 in 0 : vector<1x256xf32>, vector<1x256xf32> -> vector<2x256xf32>
    %9 = tpu.iota {dimensions = array<i32: 1>} : vector<2x256xi32>
    %10 = tpu.iota {dimensions = array<i32: 1>} : vector<2x16xi32>
    %11 = tpu.concatenate %10, %10 in 1 : vector<2x16xi32>, vector<2x16xi32> -> vector<2x32xi32>
    %12 = tpu.concatenate %11, %11 in 1 : vector<2x32xi32>, vector<2x32xi32> -> vector<2x64xi32>
    %13 = tpu.concatenate %12, %12 in 1 : vector<2x64xi32>, vector<2x64xi32> -> vector<2x128xi32>
    %14 = tpu.concatenate %13, %13 in 1 : vector<2x128xi32>, vector<2x128xi32> -> vector<2x256xi32>
    %15 = tpu.iota {dimensions = array<i32: 0>} : vector<2x1xi32>
    %c0_i32 = arith.constant 0 : i32
    %16 = vector.broadcast %c0_i32 : i32 to vector<2x1xi32>
    %17 = arith.cmpi eq, %15, %16 : vector<2x1xi32>
    %cst_4 = arith.constant 0.000000e+00 : f32
    %18 = vector.broadcast %cst_4 : f32 to vector<2x256xf32>
    %c51_i32 = arith.constant 51 : i32
    %19 = tpu.dynamic_rotate %8 by %c51_i32 dim 1 : vector<2x256xf32>, i32 -> vector<2x256xf32>
    %c48_i32 = arith.constant 48 : i32
    %20 = vector.broadcast %c48_i32 : i32 to vector<2x256xi32>
    %21 = arith.cmpi sge, %9, %20 : vector<2x256xi32>
    %c3_i32 = arith.constant 3 : i32
    %22 = vector.broadcast %c3_i32 : i32 to vector<2x256xi32>
    %23 = arith.cmpi sge, %14, %22 : vector<2x256xi32>
    %24 = arith.andi %21, %23 : vector<2x256xi1>
    %c0_5 = arith.constant 0 : index
    %25 = memref.load %arg2[%c0_5] : memref<98xf32, #tpu.memory_space<smem>>
    %c49 = arith.constant 49 : index
    %26 = memref.load %arg2[%c49] : memref<98xf32, #tpu.memory_space<smem>>
    %27 = vector.broadcast %25 : f32 to vector<2x1xf32>
    %28 = vector.broadcast %26 : f32 to vector<2x1xf32>
    %29 = arith.select %17, %27, %28 : vector<2x1xi1>, vector<2x1xf32>
    %30 = vector.broadcast %29 : vector<2x1xf32> to vector<2x256xf32>
    %31 = arith.mulf %19, %30 : vector<2x256xf32>
    %cst_6 = arith.constant 0.000000e+00 : f32
    %32 = vector.broadcast %cst_6 : f32 to vector<2x256xf32>
    %33 = arith.select %24, %31, %32 : vector<2x256xi1>, vector<2x256xf32>
    %34 = arith.addf %18, %33 : vector<2x256xf32>
    %c50_i32 = arith.constant 50 : i32
    %35 = tpu.dynamic_rotate %8 by %c50_i32 dim 1 : vector<2x256xf32>, i32 -> vector<2x256xf32>
    %c48_i32_7 = arith.constant 48 : i32
    %36 = vector.broadcast %c48_i32_7 : i32 to vector<2x256xi32>
    %37 = arith.cmpi sge, %9, %36 : vector<2x256xi32>
    %c2_i32 = arith.constant 2 : i32
    %38 = vector.broadcast %c2_i32 : i32 to vector<2x256xi32>
    %39 = arith.cmpi sge, %14, %38 : vector<2x256xi32>
    %40 = arith.andi %37, %39 : vector<2x256xi1>
    %c1 = arith.constant 1 : index
    %41 = memref.load %arg2[%c1] : memref<98xf32, #tpu.memory_space<smem>>
    %c50 = arith.constant 50 : index
    %42 = memref.load %arg2[%c50] : memref<98xf32, #tpu.memory_space<smem>>
    %43 = vector.broadcast %41 : f32 to vector<2x1xf32>
    %44 = vector.broadcast %42 : f32 to vector<2x1xf32>
    %45 = arith.select %17, %43, %44 : vector<2x1xi1>, vector<2x1xf32>
    %46 = vector.broadcast %45 : vector<2x1xf32> to vector<2x256xf32>
    %47 = arith.mulf %35, %46 : vector<2x256xf32>
    %cst_8 = arith.constant 0.000000e+00 : f32
    %48 = vector.broadcast %cst_8 : f32 to vector<2x256xf32>
    %49 = arith.select %40, %47, %48 : vector<2x256xi1>, vector<2x256xf32>
    %50 = arith.addf %34, %49 : vector<2x256xf32>
    %c49_i32 = arith.constant 49 : i32
    %51 = tpu.dynamic_rotate %8 by %c49_i32 dim 1 : vector<2x256xf32>, i32 -> vector<2x256xf32>
    %c48_i32_9 = arith.constant 48 : i32
    %52 = vector.broadcast %c48_i32_9 : i32 to vector<2x256xi32>
    %53 = arith.cmpi sge, %9, %52 : vector<2x256xi32>
    %c1_i32 = arith.constant 1 : i32
    %54 = vector.broadcast %c1_i32 : i32 to vector<2x256xi32>
    %55 = arith.cmpi sge, %14, %54 : vector<2x256xi32>
    %56 = arith.andi %53, %55 : vector<2x256xi1>
    %c2 = arith.constant 2 : index
    %57 = memref.load %arg2[%c2] : memref<98xf32, #tpu.memory_space<smem>>
    %c51 = arith.constant 51 : index
    %58 = memref.load %arg2[%c51] : memref<98xf32, #tpu.memory_space<smem>>
    %59 = vector.broadcast %57 : f32 to vector<2x1xf32>
    %60 = vector.broadcast %58 : f32 to vector<2x1xf32>
    %61 = arith.select %17, %59, %60 : vector<2x1xi1>, vector<2x1xf32>
    %62 = vector.broadcast %61 : vector<2x1xf32> to vector<2x256xf32>
    %63 = arith.mulf %51, %62 : vector<2x256xf32>
    %cst_10 = arith.constant 0.000000e+00 : f32
    %64 = vector.broadcast %cst_10 : f32 to vector<2x256xf32>
    %65 = arith.select %56, %63, %64 : vector<2x256xi1>, vector<2x256xf32>
    %66 = arith.addf %50, %65 : vector<2x256xf32>
    %c48_i32_11 = arith.constant 48 : i32
    %67 = tpu.dynamic_rotate %8 by %c48_i32_11 dim 1 : vector<2x256xf32>, i32 -> vector<2x256xf32>
    %c48_i32_12 = arith.constant 48 : i32
    %68 = vector.broadcast %c48_i32_12 : i32 to vector<2x256xi32>
    %69 = arith.cmpi sge, %9, %68 : vector<2x256xi32>
    %c3 = arith.constant 3 : index
    %70 = memref.load %arg2[%c3] : memref<98xf32, #tpu.memory_space<smem>>
    %c52 = arith.constant 52 : index
    %71 = memref.load %arg2[%c52] : memref<98xf32, #tpu.memory_space<smem>>
    %72 = vector.broadcast %70 : f32 to vector<2x1xf32>
    %73 = vector.broadcast %71 : f32 to vector<2x1xf32>
    %74 = arith.select %17, %72, %73 : vector<2x1xi1>, vector<2x1xf32>
    %75 = vector.broadcast %74 : vector<2x1xf32> to vector<2x256xf32>
    %76 = arith.mulf %67, %75 : vector<2x256xf32>
    %cst_13 = arith.constant 0.000000e+00 : f32
    %77 = vector.broadcast %cst_13 : f32 to vector<2x256xf32>
    %78 = arith.select %69, %76, %77 : vector<2x256xi1>, vector<2x256xf32>
    %79 = arith.addf %66, %78 : vector<2x256xf32>
    %c47_i32 = arith.constant 47 : i32
    %80 = tpu.dynamic_rotate %8 by %c47_i32 dim 1 : vector<2x256xf32>, i32 -> vector<2x256xf32>
    %c48_i32_14 = arith.constant 48 : i32
    %81 = vector.broadcast %c48_i32_14 : i32 to vector<2x256xi32>
    %82 = arith.cmpi sge, %9, %81 : vector<2x256xi32>
    %c15_i32 = arith.constant 15 : i32
    %83 = vector.broadcast %c15_i32 : i32 to vector<2x256xi32>
    %84 = arith.cmpi slt, %14, %83 : vector<2x256xi32>
    %85 = arith.andi %82, %84 : vector<2x256xi1>
    %c4 = arith.constant 4 : index
    %86 = memref.load %arg2[%c4] : memref<98xf32, #tpu.memory_space<smem>>
    %c53 = arith.constant 53 : index
    %87 = memref.load %arg2[%c53] : memref<98xf32, #tpu.memory_space<smem>>
    %88 = vector.broadcast %86 : f32 to vector<2x1xf32>
    %89 = vector.broadcast %87 : f32 to vector<2x1xf32>
    %90 = arith.select %17, %88, %89 : vector<2x1xi1>, vector<2x1xf32>
    %91 = vector.broadcast %90 : vector<2x1xf32> to vector<2x256xf32>
    %92 = arith.mulf %80, %91 : vector<2x256xf32>
    %cst_15 = arith.constant 0.000000e+00 : f32
    %93 = vector.broadcast %cst_15 : f32 to vector<2x256xf32>
    %94 = arith.select %85, %92, %93 : vector<2x256xi1>, vector<2x256xf32>
    %95 = arith.addf %79, %94 : vector<2x256xf32>
    %c46_i32 = arith.constant 46 : i32
    %96 = tpu.dynamic_rotate %8 by %c46_i32 dim 1 : vector<2x256xf32>, i32 -> vector<2x256xf32>
    %c48_i32_16 = arith.constant 48 : i32
    %97 = vector.broadcast %c48_i32_16 : i32 to vector<2x256xi32>
    %98 = arith.cmpi sge, %9, %97 : vector<2x256xi32>
    %c14_i32 = arith.constant 14 : i32
    %99 = vector.broadcast %c14_i32 : i32 to vector<2x256xi32>
    %100 = arith.cmpi slt, %14, %99 : vector<2x256xi32>
    %101 = arith.andi %98, %100 : vector<2x256xi1>
    %c5 = arith.constant 5 : index
    %102 = memref.load %arg2[%c5] : memref<98xf32, #tpu.memory_space<smem>>
    %c54 = arith.constant 54 : index
    %103 = memref.load %arg2[%c54] : memref<98xf32, #tpu.memory_space<smem>>
    %104 = vector.broadcast %102 : f32 to vector<2x1xf32>
    %105 = vector.broadcast %103 : f32 to vector<2x1xf32>
    %106 = arith.select %17, %104, %105 : vector<2x1xi1>, vector<2x1xf32>
    %107 = vector.broadcast %106 : vector<2x1xf32> to vector<2x256xf32>
    %108 = arith.mulf %96, %107 : vector<2x256xf32>
    %cst_17 = arith.constant 0.000000e+00 : f32
    %109 = vector.broadcast %cst_17 : f32 to vector<2x256xf32>
    %110 = arith.select %101, %108, %109 : vector<2x256xi1>, vector<2x256xf32>
    %111 = arith.addf %95, %110 : vector<2x256xf32>
    %c45_i32 = arith.constant 45 : i32
    %112 = tpu.dynamic_rotate %8 by %c45_i32 dim 1 : vector<2x256xf32>, i32 -> vector<2x256xf32>
    %c48_i32_18 = arith.constant 48 : i32
    %113 = vector.broadcast %c48_i32_18 : i32 to vector<2x256xi32>
    %114 = arith.cmpi sge, %9, %113 : vector<2x256xi32>
    %c13_i32 = arith.constant 13 : i32
    %115 = vector.broadcast %c13_i32 : i32 to vector<2x256xi32>
    %116 = arith.cmpi slt, %14, %115 : vector<2x256xi32>
    %117 = arith.andi %114, %116 : vector<2x256xi1>
    %c6 = arith.constant 6 : index
    %118 = memref.load %arg2[%c6] : memref<98xf32, #tpu.memory_space<smem>>
    %c55 = arith.constant 55 : index
    %119 = memref.load %arg2[%c55] : memref<98xf32, #tpu.memory_space<smem>>
    %120 = vector.broadcast %118 : f32 to vector<2x1xf32>
    %121 = vector.broadcast %119 : f32 to vector<2x1xf32>
    %122 = arith.select %17, %120, %121 : vector<2x1xi1>, vector<2x1xf32>
    %123 = vector.broadcast %122 : vector<2x1xf32> to vector<2x256xf32>
    %124 = arith.mulf %112, %123 : vector<2x256xf32>
    %cst_19 = arith.constant 0.000000e+00 : f32
    %125 = vector.broadcast %cst_19 : f32 to vector<2x256xf32>
    %126 = arith.select %117, %124, %125 : vector<2x256xi1>, vector<2x256xf32>
    %127 = arith.addf %111, %126 : vector<2x256xf32>
    %c35_i32 = arith.constant 35 : i32
    %128 = tpu.dynamic_rotate %8 by %c35_i32 dim 1 : vector<2x256xf32>, i32 -> vector<2x256xf32>
    %c32_i32 = arith.constant 32 : i32
    %129 = vector.broadcast %c32_i32 : i32 to vector<2x256xi32>
    %130 = arith.cmpi sge, %9, %129 : vector<2x256xi32>
    %c3_i32_20 = arith.constant 3 : i32
    %131 = vector.broadcast %c3_i32_20 : i32 to vector<2x256xi32>
    %132 = arith.cmpi sge, %14, %131 : vector<2x256xi32>
    %133 = arith.andi %130, %132 : vector<2x256xi1>
    %c7 = arith.constant 7 : index
    %134 = memref.load %arg2[%c7] : memref<98xf32, #tpu.memory_space<smem>>
    %c56 = arith.constant 56 : index
    %135 = memref.load %arg2[%c56] : memref<98xf32, #tpu.memory_space<smem>>
    %136 = vector.broadcast %134 : f32 to vector<2x1xf32>
    %137 = vector.broadcast %135 : f32 to vector<2x1xf32>
    %138 = arith.select %17, %136, %137 : vector<2x1xi1>, vector<2x1xf32>
    %139 = vector.broadcast %138 : vector<2x1xf32> to vector<2x256xf32>
    %140 = arith.mulf %128, %139 : vector<2x256xf32>
    %cst_21 = arith.constant 0.000000e+00 : f32
    %141 = vector.broadcast %cst_21 : f32 to vector<2x256xf32>
    %142 = arith.select %133, %140, %141 : vector<2x256xi1>, vector<2x256xf32>
    %143 = arith.addf %127, %142 : vector<2x256xf32>
    %c34_i32 = arith.constant 34 : i32
    %144 = tpu.dynamic_rotate %8 by %c34_i32 dim 1 : vector<2x256xf32>, i32 -> vector<2x256xf32>
    %c32_i32_22 = arith.constant 32 : i32
    %145 = vector.broadcast %c32_i32_22 : i32 to vector<2x256xi32>
    %146 = arith.cmpi sge, %9, %145 : vector<2x256xi32>
    %c2_i32_23 = arith.constant 2 : i32
    %147 = vector.broadcast %c2_i32_23 : i32 to vector<2x256xi32>
    %148 = arith.cmpi sge, %14, %147 : vector<2x256xi32>
    %149 = arith.andi %146, %148 : vector<2x256xi1>
    %c8 = arith.constant 8 : index
    %150 = memref.load %arg2[%c8] : memref<98xf32, #tpu.memory_space<smem>>
    %c57 = arith.constant 57 : index
    %151 = memref.load %arg2[%c57] : memref<98xf32, #tpu.memory_space<smem>>
    %152 = vector.broadcast %150 : f32 to vector<2x1xf32>
    %153 = vector.broadcast %151 : f32 to vector<2x1xf32>
    %154 = arith.select %17, %152, %153 : vector<2x1xi1>, vector<2x1xf32>
    %155 = vector.broadcast %154 : vector<2x1xf32> to vector<2x256xf32>
    %156 = arith.mulf %144, %155 : vector<2x256xf32>
    %cst_24 = arith.constant 0.000000e+00 : f32
    %157 = vector.broadcast %cst_24 : f32 to vector<2x256xf32>
    %158 = arith.select %149, %156, %157 : vector<2x256xi1>, vector<2x256xf32>
    %159 = arith.addf %143, %158 : vector<2x256xf32>
    %c33_i32 = arith.constant 33 : i32
    %160 = tpu.dynamic_rotate %8 by %c33_i32 dim 1 : vector<2x256xf32>, i32 -> vector<2x256xf32>
    %c32_i32_25 = arith.constant 32 : i32
    %161 = vector.broadcast %c32_i32_25 : i32 to vector<2x256xi32>
    %162 = arith.cmpi sge, %9, %161 : vector<2x256xi32>
    %c1_i32_26 = arith.constant 1 : i32
    %163 = vector.broadcast %c1_i32_26 : i32 to vector<2x256xi32>
    %164 = arith.cmpi sge, %14, %163 : vector<2x256xi32>
    %165 = arith.andi %162, %164 : vector<2x256xi1>
    %c9 = arith.constant 9 : index
    %166 = memref.load %arg2[%c9] : memref<98xf32, #tpu.memory_space<smem>>
    %c58 = arith.constant 58 : index
    %167 = memref.load %arg2[%c58] : memref<98xf32, #tpu.memory_space<smem>>
    %168 = vector.broadcast %166 : f32 to vector<2x1xf32>
    %169 = vector.broadcast %167 : f32 to vector<2x1xf32>
    %170 = arith.select %17, %168, %169 : vector<2x1xi1>, vector<2x1xf32>
    %171 = vector.broadcast %170 : vector<2x1xf32> to vector<2x256xf32>
    %172 = arith.mulf %160, %171 : vector<2x256xf32>
    %cst_27 = arith.constant 0.000000e+00 : f32
    %173 = vector.broadcast %cst_27 : f32 to vector<2x256xf32>
    %174 = arith.select %165, %172, %173 : vector<2x256xi1>, vector<2x256xf32>
    %175 = arith.addf %159, %174 : vector<2x256xf32>
    %c32_i32_28 = arith.constant 32 : i32
    %176 = tpu.dynamic_rotate %8 by %c32_i32_28 dim 1 : vector<2x256xf32>, i32 -> vector<2x256xf32>
    %c32_i32_29 = arith.constant 32 : i32
    %177 = vector.broadcast %c32_i32_29 : i32 to vector<2x256xi32>
    %178 = arith.cmpi sge, %9, %177 : vector<2x256xi32>
    %c10 = arith.constant 10 : index
    %179 = memref.load %arg2[%c10] : memref<98xf32, #tpu.memory_space<smem>>
    %c59 = arith.constant 59 : index
    %180 = memref.load %arg2[%c59] : memref<98xf32, #tpu.memory_space<smem>>
    %181 = vector.broadcast %179 : f32 to vector<2x1xf32>
    %182 = vector.broadcast %180 : f32 to vector<2x1xf32>
    %183 = arith.select %17, %181, %182 : vector<2x1xi1>, vector<2x1xf32>
    %184 = vector.broadcast %183 : vector<2x1xf32> to vector<2x256xf32>
    %185 = arith.mulf %176, %184 : vector<2x256xf32>
    %cst_30 = arith.constant 0.000000e+00 : f32
    %186 = vector.broadcast %cst_30 : f32 to vector<2x256xf32>
    %187 = arith.select %178, %185, %186 : vector<2x256xi1>, vector<2x256xf32>
    %188 = arith.addf %175, %187 : vector<2x256xf32>
    %c31_i32 = arith.constant 31 : i32
    %189 = tpu.dynamic_rotate %8 by %c31_i32 dim 1 : vector<2x256xf32>, i32 -> vector<2x256xf32>
    %c32_i32_31 = arith.constant 32 : i32
    %190 = vector.broadcast %c32_i32_31 : i32 to vector<2x256xi32>
    %191 = arith.cmpi sge, %9, %190 : vector<2x256xi32>
    %c15_i32_32 = arith.constant 15 : i32
    %192 = vector.broadcast %c15_i32_32 : i32 to vector<2x256xi32>
    %193 = arith.cmpi slt, %14, %192 : vector<2x256xi32>
    %194 = arith.andi %191, %193 : vector<2x256xi1>
    %c11 = arith.constant 11 : index
    %195 = memref.load %arg2[%c11] : memref<98xf32, #tpu.memory_space<smem>>
    %c60 = arith.constant 60 : index
    %196 = memref.load %arg2[%c60] : memref<98xf32, #tpu.memory_space<smem>>
    %197 = vector.broadcast %195 : f32 to vector<2x1xf32>
    %198 = vector.broadcast %196 : f32 to vector<2x1xf32>
    %199 = arith.select %17, %197, %198 : vector<2x1xi1>, vector<2x1xf32>
    %200 = vector.broadcast %199 : vector<2x1xf32> to vector<2x256xf32>
    %201 = arith.mulf %189, %200 : vector<2x256xf32>
    %cst_33 = arith.constant 0.000000e+00 : f32
    %202 = vector.broadcast %cst_33 : f32 to vector<2x256xf32>
    %203 = arith.select %194, %201, %202 : vector<2x256xi1>, vector<2x256xf32>
    %204 = arith.addf %188, %203 : vector<2x256xf32>
    %c30_i32 = arith.constant 30 : i32
    %205 = tpu.dynamic_rotate %8 by %c30_i32 dim 1 : vector<2x256xf32>, i32 -> vector<2x256xf32>
    %c32_i32_34 = arith.constant 32 : i32
    %206 = vector.broadcast %c32_i32_34 : i32 to vector<2x256xi32>
    %207 = arith.cmpi sge, %9, %206 : vector<2x256xi32>
    %c14_i32_35 = arith.constant 14 : i32
    %208 = vector.broadcast %c14_i32_35 : i32 to vector<2x256xi32>
    %209 = arith.cmpi slt, %14, %208 : vector<2x256xi32>
    %210 = arith.andi %207, %209 : vector<2x256xi1>
    %c12 = arith.constant 12 : index
    %211 = memref.load %arg2[%c12] : memref<98xf32, #tpu.memory_space<smem>>
    %c61 = arith.constant 61 : index
    %212 = memref.load %arg2[%c61] : memref<98xf32, #tpu.memory_space<smem>>
    %213 = vector.broadcast %211 : f32 to vector<2x1xf32>
    %214 = vector.broadcast %212 : f32 to vector<2x1xf32>
    %215 = arith.select %17, %213, %214 : vector<2x1xi1>, vector<2x1xf32>
    %216 = vector.broadcast %215 : vector<2x1xf32> to vector<2x256xf32>
    %217 = arith.mulf %205, %216 : vector<2x256xf32>
    %cst_36 = arith.constant 0.000000e+00 : f32
    %218 = vector.broadcast %cst_36 : f32 to vector<2x256xf32>
    %219 = arith.select %210, %217, %218 : vector<2x256xi1>, vector<2x256xf32>
    %220 = arith.addf %204, %219 : vector<2x256xf32>
    %c29_i32 = arith.constant 29 : i32
    %221 = tpu.dynamic_rotate %8 by %c29_i32 dim 1 : vector<2x256xf32>, i32 -> vector<2x256xf32>
    %c32_i32_37 = arith.constant 32 : i32
    %222 = vector.broadcast %c32_i32_37 : i32 to vector<2x256xi32>
    %223 = arith.cmpi sge, %9, %222 : vector<2x256xi32>
    %c13_i32_38 = arith.constant 13 : i32
    %224 = vector.broadcast %c13_i32_38 : i32 to vector<2x256xi32>
    %225 = arith.cmpi slt, %14, %224 : vector<2x256xi32>
    %226 = arith.andi %223, %225 : vector<2x256xi1>
    %c13 = arith.constant 13 : index
    %227 = memref.load %arg2[%c13] : memref<98xf32, #tpu.memory_space<smem>>
    %c62 = arith.constant 62 : index
    %228 = memref.load %arg2[%c62] : memref<98xf32, #tpu.memory_space<smem>>
    %229 = vector.broadcast %227 : f32 to vector<2x1xf32>
    %230 = vector.broadcast %228 : f32 to vector<2x1xf32>
    %231 = arith.select %17, %229, %230 : vector<2x1xi1>, vector<2x1xf32>
    %232 = vector.broadcast %231 : vector<2x1xf32> to vector<2x256xf32>
    %233 = arith.mulf %221, %232 : vector<2x256xf32>
    %cst_39 = arith.constant 0.000000e+00 : f32
    %234 = vector.broadcast %cst_39 : f32 to vector<2x256xf32>
    %235 = arith.select %226, %233, %234 : vector<2x256xi1>, vector<2x256xf32>
    %236 = arith.addf %220, %235 : vector<2x256xf32>
    %c19_i32 = arith.constant 19 : i32
    %237 = tpu.dynamic_rotate %8 by %c19_i32 dim 1 : vector<2x256xf32>, i32 -> vector<2x256xf32>
    %c16_i32 = arith.constant 16 : i32
    %238 = vector.broadcast %c16_i32 : i32 to vector<2x256xi32>
    %239 = arith.cmpi sge, %9, %238 : vector<2x256xi32>
    %c3_i32_40 = arith.constant 3 : i32
    %240 = vector.broadcast %c3_i32_40 : i32 to vector<2x256xi32>
    %241 = arith.cmpi sge, %14, %240 : vector<2x256xi32>
    %242 = arith.andi %239, %241 : vector<2x256xi1>
    %c14 = arith.constant 14 : index
    %243 = memref.load %arg2[%c14] : memref<98xf32, #tpu.memory_space<smem>>
    %c63 = arith.constant 63 : index
    %244 = memref.load %arg2[%c63] : memref<98xf32, #tpu.memory_space<smem>>
    %245 = vector.broadcast %243 : f32 to vector<2x1xf32>
    %246 = vector.broadcast %244 : f32 to vector<2x1xf32>
    %247 = arith.select %17, %245, %246 : vector<2x1xi1>, vector<2x1xf32>
    %248 = vector.broadcast %247 : vector<2x1xf32> to vector<2x256xf32>
    %249 = arith.mulf %237, %248 : vector<2x256xf32>
    %cst_41 = arith.constant 0.000000e+00 : f32
    %250 = vector.broadcast %cst_41 : f32 to vector<2x256xf32>
    %251 = arith.select %242, %249, %250 : vector<2x256xi1>, vector<2x256xf32>
    %252 = arith.addf %236, %251 : vector<2x256xf32>
    %c18_i32 = arith.constant 18 : i32
    %253 = tpu.dynamic_rotate %8 by %c18_i32 dim 1 : vector<2x256xf32>, i32 -> vector<2x256xf32>
    %c16_i32_42 = arith.constant 16 : i32
    %254 = vector.broadcast %c16_i32_42 : i32 to vector<2x256xi32>
    %255 = arith.cmpi sge, %9, %254 : vector<2x256xi32>
    %c2_i32_43 = arith.constant 2 : i32
    %256 = vector.broadcast %c2_i32_43 : i32 to vector<2x256xi32>
    %257 = arith.cmpi sge, %14, %256 : vector<2x256xi32>
    %258 = arith.andi %255, %257 : vector<2x256xi1>
    %c15 = arith.constant 15 : index
    %259 = memref.load %arg2[%c15] : memref<98xf32, #tpu.memory_space<smem>>
    %c64 = arith.constant 64 : index
    %260 = memref.load %arg2[%c64] : memref<98xf32, #tpu.memory_space<smem>>
    %261 = vector.broadcast %259 : f32 to vector<2x1xf32>
    %262 = vector.broadcast %260 : f32 to vector<2x1xf32>
    %263 = arith.select %17, %261, %262 : vector<2x1xi1>, vector<2x1xf32>
    %264 = vector.broadcast %263 : vector<2x1xf32> to vector<2x256xf32>
    %265 = arith.mulf %253, %264 : vector<2x256xf32>
    %cst_44 = arith.constant 0.000000e+00 : f32
    %266 = vector.broadcast %cst_44 : f32 to vector<2x256xf32>
    %267 = arith.select %258, %265, %266 : vector<2x256xi1>, vector<2x256xf32>
    %268 = arith.addf %252, %267 : vector<2x256xf32>
    %c17_i32 = arith.constant 17 : i32
    %269 = tpu.dynamic_rotate %8 by %c17_i32 dim 1 : vector<2x256xf32>, i32 -> vector<2x256xf32>
    %c16_i32_45 = arith.constant 16 : i32
    %270 = vector.broadcast %c16_i32_45 : i32 to vector<2x256xi32>
    %271 = arith.cmpi sge, %9, %270 : vector<2x256xi32>
    %c1_i32_46 = arith.constant 1 : i32
    %272 = vector.broadcast %c1_i32_46 : i32 to vector<2x256xi32>
    %273 = arith.cmpi sge, %14, %272 : vector<2x256xi32>
    %274 = arith.andi %271, %273 : vector<2x256xi1>
    %c16 = arith.constant 16 : index
    %275 = memref.load %arg2[%c16] : memref<98xf32, #tpu.memory_space<smem>>
    %c65 = arith.constant 65 : index
    %276 = memref.load %arg2[%c65] : memref<98xf32, #tpu.memory_space<smem>>
    %277 = vector.broadcast %275 : f32 to vector<2x1xf32>
    %278 = vector.broadcast %276 : f32 to vector<2x1xf32>
    %279 = arith.select %17, %277, %278 : vector<2x1xi1>, vector<2x1xf32>
    %280 = vector.broadcast %279 : vector<2x1xf32> to vector<2x256xf32>
    %281 = arith.mulf %269, %280 : vector<2x256xf32>
    %cst_47 = arith.constant 0.000000e+00 : f32
    %282 = vector.broadcast %cst_47 : f32 to vector<2x256xf32>
    %283 = arith.select %274, %281, %282 : vector<2x256xi1>, vector<2x256xf32>
    %284 = arith.addf %268, %283 : vector<2x256xf32>
    %c16_i32_48 = arith.constant 16 : i32
    %285 = tpu.dynamic_rotate %8 by %c16_i32_48 dim 1 : vector<2x256xf32>, i32 -> vector<2x256xf32>
    %c16_i32_49 = arith.constant 16 : i32
    %286 = vector.broadcast %c16_i32_49 : i32 to vector<2x256xi32>
    %287 = arith.cmpi sge, %9, %286 : vector<2x256xi32>
    %c17 = arith.constant 17 : index
    %288 = memref.load %arg2[%c17] : memref<98xf32, #tpu.memory_space<smem>>
    %c66 = arith.constant 66 : index
    %289 = memref.load %arg2[%c66] : memref<98xf32, #tpu.memory_space<smem>>
    %290 = vector.broadcast %288 : f32 to vector<2x1xf32>
    %291 = vector.broadcast %289 : f32 to vector<2x1xf32>
    %292 = arith.select %17, %290, %291 : vector<2x1xi1>, vector<2x1xf32>
    %293 = vector.broadcast %292 : vector<2x1xf32> to vector<2x256xf32>
    %294 = arith.mulf %285, %293 : vector<2x256xf32>
    %cst_50 = arith.constant 0.000000e+00 : f32
    %295 = vector.broadcast %cst_50 : f32 to vector<2x256xf32>
    %296 = arith.select %287, %294, %295 : vector<2x256xi1>, vector<2x256xf32>
    %297 = arith.addf %284, %296 : vector<2x256xf32>
    %c15_i32_51 = arith.constant 15 : i32
    %298 = tpu.dynamic_rotate %8 by %c15_i32_51 dim 1 : vector<2x256xf32>, i32 -> vector<2x256xf32>
    %c16_i32_52 = arith.constant 16 : i32
    %299 = vector.broadcast %c16_i32_52 : i32 to vector<2x256xi32>
    %300 = arith.cmpi sge, %9, %299 : vector<2x256xi32>
    %c15_i32_53 = arith.constant 15 : i32
    %301 = vector.broadcast %c15_i32_53 : i32 to vector<2x256xi32>
    %302 = arith.cmpi slt, %14, %301 : vector<2x256xi32>
    %303 = arith.andi %300, %302 : vector<2x256xi1>
    %c18 = arith.constant 18 : index
    %304 = memref.load %arg2[%c18] : memref<98xf32, #tpu.memory_space<smem>>
    %c67 = arith.constant 67 : index
    %305 = memref.load %arg2[%c67] : memref<98xf32, #tpu.memory_space<smem>>
    %306 = vector.broadcast %304 : f32 to vector<2x1xf32>
    %307 = vector.broadcast %305 : f32 to vector<2x1xf32>
    %308 = arith.select %17, %306, %307 : vector<2x1xi1>, vector<2x1xf32>
    %309 = vector.broadcast %308 : vector<2x1xf32> to vector<2x256xf32>
    %310 = arith.mulf %298, %309 : vector<2x256xf32>
    %cst_54 = arith.constant 0.000000e+00 : f32
    %311 = vector.broadcast %cst_54 : f32 to vector<2x256xf32>
    %312 = arith.select %303, %310, %311 : vector<2x256xi1>, vector<2x256xf32>
    %313 = arith.addf %297, %312 : vector<2x256xf32>
    %c14_i32_55 = arith.constant 14 : i32
    %314 = tpu.dynamic_rotate %8 by %c14_i32_55 dim 1 : vector<2x256xf32>, i32 -> vector<2x256xf32>
    %c16_i32_56 = arith.constant 16 : i32
    %315 = vector.broadcast %c16_i32_56 : i32 to vector<2x256xi32>
    %316 = arith.cmpi sge, %9, %315 : vector<2x256xi32>
    %c14_i32_57 = arith.constant 14 : i32
    %317 = vector.broadcast %c14_i32_57 : i32 to vector<2x256xi32>
    %318 = arith.cmpi slt, %14, %317 : vector<2x256xi32>
    %319 = arith.andi %316, %318 : vector<2x256xi1>
    %c19 = arith.constant 19 : index
    %320 = memref.load %arg2[%c19] : memref<98xf32, #tpu.memory_space<smem>>
    %c68 = arith.constant 68 : index
    %321 = memref.load %arg2[%c68] : memref<98xf32, #tpu.memory_space<smem>>
    %322 = vector.broadcast %320 : f32 to vector<2x1xf32>
    %323 = vector.broadcast %321 : f32 to vector<2x1xf32>
    %324 = arith.select %17, %322, %323 : vector<2x1xi1>, vector<2x1xf32>
    %325 = vector.broadcast %324 : vector<2x1xf32> to vector<2x256xf32>
    %326 = arith.mulf %314, %325 : vector<2x256xf32>
    %cst_58 = arith.constant 0.000000e+00 : f32
    %327 = vector.broadcast %cst_58 : f32 to vector<2x256xf32>
    %328 = arith.select %319, %326, %327 : vector<2x256xi1>, vector<2x256xf32>
    %329 = arith.addf %313, %328 : vector<2x256xf32>
    %c13_i32_59 = arith.constant 13 : i32
    %330 = tpu.dynamic_rotate %8 by %c13_i32_59 dim 1 : vector<2x256xf32>, i32 -> vector<2x256xf32>
    %c16_i32_60 = arith.constant 16 : i32
    %331 = vector.broadcast %c16_i32_60 : i32 to vector<2x256xi32>
    %332 = arith.cmpi sge, %9, %331 : vector<2x256xi32>
    %c13_i32_61 = arith.constant 13 : i32
    %333 = vector.broadcast %c13_i32_61 : i32 to vector<2x256xi32>
    %334 = arith.cmpi slt, %14, %333 : vector<2x256xi32>
    %335 = arith.andi %332, %334 : vector<2x256xi1>
    %c20 = arith.constant 20 : index
    %336 = memref.load %arg2[%c20] : memref<98xf32, #tpu.memory_space<smem>>
    %c69 = arith.constant 69 : index
    %337 = memref.load %arg2[%c69] : memref<98xf32, #tpu.memory_space<smem>>
    %338 = vector.broadcast %336 : f32 to vector<2x1xf32>
    %339 = vector.broadcast %337 : f32 to vector<2x1xf32>
    %340 = arith.select %17, %338, %339 : vector<2x1xi1>, vector<2x1xf32>
    %341 = vector.broadcast %340 : vector<2x1xf32> to vector<2x256xf32>
    %342 = arith.mulf %330, %341 : vector<2x256xf32>
    %cst_62 = arith.constant 0.000000e+00 : f32
    %343 = vector.broadcast %cst_62 : f32 to vector<2x256xf32>
    %344 = arith.select %335, %342, %343 : vector<2x256xi1>, vector<2x256xf32>
    %345 = arith.addf %329, %344 : vector<2x256xf32>
    %c3_i32_63 = arith.constant 3 : i32
    %346 = tpu.dynamic_rotate %8 by %c3_i32_63 dim 1 : vector<2x256xf32>, i32 -> vector<2x256xf32>
    %c3_i32_64 = arith.constant 3 : i32
    %347 = vector.broadcast %c3_i32_64 : i32 to vector<2x256xi32>
    %348 = arith.cmpi sge, %14, %347 : vector<2x256xi32>
    %c21 = arith.constant 21 : index
    %349 = memref.load %arg2[%c21] : memref<98xf32, #tpu.memory_space<smem>>
    %c70 = arith.constant 70 : index
    %350 = memref.load %arg2[%c70] : memref<98xf32, #tpu.memory_space<smem>>
    %351 = vector.broadcast %349 : f32 to vector<2x1xf32>
    %352 = vector.broadcast %350 : f32 to vector<2x1xf32>
    %353 = arith.select %17, %351, %352 : vector<2x1xi1>, vector<2x1xf32>
    %354 = vector.broadcast %353 : vector<2x1xf32> to vector<2x256xf32>
    %355 = arith.mulf %346, %354 : vector<2x256xf32>
    %cst_65 = arith.constant 0.000000e+00 : f32
    %356 = vector.broadcast %cst_65 : f32 to vector<2x256xf32>
    %357 = arith.select %348, %355, %356 : vector<2x256xi1>, vector<2x256xf32>
    %358 = arith.addf %345, %357 : vector<2x256xf32>
    %c2_i32_66 = arith.constant 2 : i32
    %359 = tpu.dynamic_rotate %8 by %c2_i32_66 dim 1 : vector<2x256xf32>, i32 -> vector<2x256xf32>
    %c2_i32_67 = arith.constant 2 : i32
    %360 = vector.broadcast %c2_i32_67 : i32 to vector<2x256xi32>
    %361 = arith.cmpi sge, %14, %360 : vector<2x256xi32>
    %c22 = arith.constant 22 : index
    %362 = memref.load %arg2[%c22] : memref<98xf32, #tpu.memory_space<smem>>
    %c71 = arith.constant 71 : index
    %363 = memref.load %arg2[%c71] : memref<98xf32, #tpu.memory_space<smem>>
    %364 = vector.broadcast %362 : f32 to vector<2x1xf32>
    %365 = vector.broadcast %363 : f32 to vector<2x1xf32>
    %366 = arith.select %17, %364, %365 : vector<2x1xi1>, vector<2x1xf32>
    %367 = vector.broadcast %366 : vector<2x1xf32> to vector<2x256xf32>
    %368 = arith.mulf %359, %367 : vector<2x256xf32>
    %cst_68 = arith.constant 0.000000e+00 : f32
    %369 = vector.broadcast %cst_68 : f32 to vector<2x256xf32>
    %370 = arith.select %361, %368, %369 : vector<2x256xi1>, vector<2x256xf32>
    %371 = arith.addf %358, %370 : vector<2x256xf32>
    %c1_i32_69 = arith.constant 1 : i32
    %372 = tpu.dynamic_rotate %8 by %c1_i32_69 dim 1 : vector<2x256xf32>, i32 -> vector<2x256xf32>
    %c1_i32_70 = arith.constant 1 : i32
    %373 = vector.broadcast %c1_i32_70 : i32 to vector<2x256xi32>
    %374 = arith.cmpi sge, %14, %373 : vector<2x256xi32>
    %c23 = arith.constant 23 : index
    %375 = memref.load %arg2[%c23] : memref<98xf32, #tpu.memory_space<smem>>
    %c72 = arith.constant 72 : index
    %376 = memref.load %arg2[%c72] : memref<98xf32, #tpu.memory_space<smem>>
    %377 = vector.broadcast %375 : f32 to vector<2x1xf32>
    %378 = vector.broadcast %376 : f32 to vector<2x1xf32>
    %379 = arith.select %17, %377, %378 : vector<2x1xi1>, vector<2x1xf32>
    %380 = vector.broadcast %379 : vector<2x1xf32> to vector<2x256xf32>
    %381 = arith.mulf %372, %380 : vector<2x256xf32>
    %cst_71 = arith.constant 0.000000e+00 : f32
    %382 = vector.broadcast %cst_71 : f32 to vector<2x256xf32>
    %383 = arith.select %374, %381, %382 : vector<2x256xi1>, vector<2x256xf32>
    %384 = arith.addf %371, %383 : vector<2x256xf32>
    %c24 = arith.constant 24 : index
    %385 = memref.load %arg2[%c24] : memref<98xf32, #tpu.memory_space<smem>>
    %c73 = arith.constant 73 : index
    %386 = memref.load %arg2[%c73] : memref<98xf32, #tpu.memory_space<smem>>
    %387 = vector.broadcast %385 : f32 to vector<2x1xf32>
    %388 = vector.broadcast %386 : f32 to vector<2x1xf32>
    %389 = arith.select %17, %387, %388 : vector<2x1xi1>, vector<2x1xf32>
    %390 = vector.broadcast %389 : vector<2x1xf32> to vector<2x256xf32>
    %391 = arith.mulf %8, %390 : vector<2x256xf32>
    %392 = arith.addf %384, %391 : vector<2x256xf32>
    %c255_i32 = arith.constant 255 : i32
    %393 = tpu.dynamic_rotate %8 by %c255_i32 dim 1 : vector<2x256xf32>, i32 -> vector<2x256xf32>
    %c15_i32_72 = arith.constant 15 : i32
    %394 = vector.broadcast %c15_i32_72 : i32 to vector<2x256xi32>
    %395 = arith.cmpi slt, %14, %394 : vector<2x256xi32>
    %c25 = arith.constant 25 : index
    %396 = memref.load %arg2[%c25] : memref<98xf32, #tpu.memory_space<smem>>
    %c74 = arith.constant 74 : index
    %397 = memref.load %arg2[%c74] : memref<98xf32, #tpu.memory_space<smem>>
    %398 = vector.broadcast %396 : f32 to vector<2x1xf32>
    %399 = vector.broadcast %397 : f32 to vector<2x1xf32>
    %400 = arith.select %17, %398, %399 : vector<2x1xi1>, vector<2x1xf32>
    %401 = vector.broadcast %400 : vector<2x1xf32> to vector<2x256xf32>
    %402 = arith.mulf %393, %401 : vector<2x256xf32>
    %cst_73 = arith.constant 0.000000e+00 : f32
    %403 = vector.broadcast %cst_73 : f32 to vector<2x256xf32>
    %404 = arith.select %395, %402, %403 : vector<2x256xi1>, vector<2x256xf32>
    %405 = arith.addf %392, %404 : vector<2x256xf32>
    %c254_i32 = arith.constant 254 : i32
    %406 = tpu.dynamic_rotate %8 by %c254_i32 dim 1 : vector<2x256xf32>, i32 -> vector<2x256xf32>
    %c14_i32_74 = arith.constant 14 : i32
    %407 = vector.broadcast %c14_i32_74 : i32 to vector<2x256xi32>
    %408 = arith.cmpi slt, %14, %407 : vector<2x256xi32>
    %c26 = arith.constant 26 : index
    %409 = memref.load %arg2[%c26] : memref<98xf32, #tpu.memory_space<smem>>
    %c75 = arith.constant 75 : index
    %410 = memref.load %arg2[%c75] : memref<98xf32, #tpu.memory_space<smem>>
    %411 = vector.broadcast %409 : f32 to vector<2x1xf32>
    %412 = vector.broadcast %410 : f32 to vector<2x1xf32>
    %413 = arith.select %17, %411, %412 : vector<2x1xi1>, vector<2x1xf32>
    %414 = vector.broadcast %413 : vector<2x1xf32> to vector<2x256xf32>
    %415 = arith.mulf %406, %414 : vector<2x256xf32>
    %cst_75 = arith.constant 0.000000e+00 : f32
    %416 = vector.broadcast %cst_75 : f32 to vector<2x256xf32>
    %417 = arith.select %408, %415, %416 : vector<2x256xi1>, vector<2x256xf32>
    %418 = arith.addf %405, %417 : vector<2x256xf32>
    %c253_i32 = arith.constant 253 : i32
    %419 = tpu.dynamic_rotate %8 by %c253_i32 dim 1 : vector<2x256xf32>, i32 -> vector<2x256xf32>
    %c13_i32_76 = arith.constant 13 : i32
    %420 = vector.broadcast %c13_i32_76 : i32 to vector<2x256xi32>
    %421 = arith.cmpi slt, %14, %420 : vector<2x256xi32>
    %c27 = arith.constant 27 : index
    %422 = memref.load %arg2[%c27] : memref<98xf32, #tpu.memory_space<smem>>
    %c76 = arith.constant 76 : index
    %423 = memref.load %arg2[%c76] : memref<98xf32, #tpu.memory_space<smem>>
    %424 = vector.broadcast %422 : f32 to vector<2x1xf32>
    %425 = vector.broadcast %423 : f32 to vector<2x1xf32>
    %426 = arith.select %17, %424, %425 : vector<2x1xi1>, vector<2x1xf32>
    %427 = vector.broadcast %426 : vector<2x1xf32> to vector<2x256xf32>
    %428 = arith.mulf %419, %427 : vector<2x256xf32>
    %cst_77 = arith.constant 0.000000e+00 : f32
    %429 = vector.broadcast %cst_77 : f32 to vector<2x256xf32>
    %430 = arith.select %421, %428, %429 : vector<2x256xi1>, vector<2x256xf32>
    %431 = arith.addf %418, %430 : vector<2x256xf32>
    %c243_i32 = arith.constant 243 : i32
    %432 = tpu.dynamic_rotate %8 by %c243_i32 dim 1 : vector<2x256xf32>, i32 -> vector<2x256xf32>
    %c240_i32 = arith.constant 240 : i32
    %433 = vector.broadcast %c240_i32 : i32 to vector<2x256xi32>
    %434 = arith.cmpi slt, %9, %433 : vector<2x256xi32>
    %c3_i32_78 = arith.constant 3 : i32
    %435 = vector.broadcast %c3_i32_78 : i32 to vector<2x256xi32>
    %436 = arith.cmpi sge, %14, %435 : vector<2x256xi32>
    %437 = arith.andi %434, %436 : vector<2x256xi1>
    %c28 = arith.constant 28 : index
    %438 = memref.load %arg2[%c28] : memref<98xf32, #tpu.memory_space<smem>>
    %c77 = arith.constant 77 : index
    %439 = memref.load %arg2[%c77] : memref<98xf32, #tpu.memory_space<smem>>
    %440 = vector.broadcast %438 : f32 to vector<2x1xf32>
    %441 = vector.broadcast %439 : f32 to vector<2x1xf32>
    %442 = arith.select %17, %440, %441 : vector<2x1xi1>, vector<2x1xf32>
    %443 = vector.broadcast %442 : vector<2x1xf32> to vector<2x256xf32>
    %444 = arith.mulf %432, %443 : vector<2x256xf32>
    %cst_79 = arith.constant 0.000000e+00 : f32
    %445 = vector.broadcast %cst_79 : f32 to vector<2x256xf32>
    %446 = arith.select %437, %444, %445 : vector<2x256xi1>, vector<2x256xf32>
    %447 = arith.addf %431, %446 : vector<2x256xf32>
    %c242_i32 = arith.constant 242 : i32
    %448 = tpu.dynamic_rotate %8 by %c242_i32 dim 1 : vector<2x256xf32>, i32 -> vector<2x256xf32>
    %c240_i32_80 = arith.constant 240 : i32
    %449 = vector.broadcast %c240_i32_80 : i32 to vector<2x256xi32>
    %450 = arith.cmpi slt, %9, %449 : vector<2x256xi32>
    %c2_i32_81 = arith.constant 2 : i32
    %451 = vector.broadcast %c2_i32_81 : i32 to vector<2x256xi32>
    %452 = arith.cmpi sge, %14, %451 : vector<2x256xi32>
    %453 = arith.andi %450, %452 : vector<2x256xi1>
    %c29 = arith.constant 29 : index
    %454 = memref.load %arg2[%c29] : memref<98xf32, #tpu.memory_space<smem>>
    %c78 = arith.constant 78 : index
    %455 = memref.load %arg2[%c78] : memref<98xf32, #tpu.memory_space<smem>>
    %456 = vector.broadcast %454 : f32 to vector<2x1xf32>
    %457 = vector.broadcast %455 : f32 to vector<2x1xf32>
    %458 = arith.select %17, %456, %457 : vector<2x1xi1>, vector<2x1xf32>
    %459 = vector.broadcast %458 : vector<2x1xf32> to vector<2x256xf32>
    %460 = arith.mulf %448, %459 : vector<2x256xf32>
    %cst_82 = arith.constant 0.000000e+00 : f32
    %461 = vector.broadcast %cst_82 : f32 to vector<2x256xf32>
    %462 = arith.select %453, %460, %461 : vector<2x256xi1>, vector<2x256xf32>
    %463 = arith.addf %447, %462 : vector<2x256xf32>
    %c241_i32 = arith.constant 241 : i32
    %464 = tpu.dynamic_rotate %8 by %c241_i32 dim 1 : vector<2x256xf32>, i32 -> vector<2x256xf32>
    %c240_i32_83 = arith.constant 240 : i32
    %465 = vector.broadcast %c240_i32_83 : i32 to vector<2x256xi32>
    %466 = arith.cmpi slt, %9, %465 : vector<2x256xi32>
    %c1_i32_84 = arith.constant 1 : i32
    %467 = vector.broadcast %c1_i32_84 : i32 to vector<2x256xi32>
    %468 = arith.cmpi sge, %14, %467 : vector<2x256xi32>
    %469 = arith.andi %466, %468 : vector<2x256xi1>
    %c30 = arith.constant 30 : index
    %470 = memref.load %arg2[%c30] : memref<98xf32, #tpu.memory_space<smem>>
    %c79 = arith.constant 79 : index
    %471 = memref.load %arg2[%c79] : memref<98xf32, #tpu.memory_space<smem>>
    %472 = vector.broadcast %470 : f32 to vector<2x1xf32>
    %473 = vector.broadcast %471 : f32 to vector<2x1xf32>
    %474 = arith.select %17, %472, %473 : vector<2x1xi1>, vector<2x1xf32>
    %475 = vector.broadcast %474 : vector<2x1xf32> to vector<2x256xf32>
    %476 = arith.mulf %464, %475 : vector<2x256xf32>
    %cst_85 = arith.constant 0.000000e+00 : f32
    %477 = vector.broadcast %cst_85 : f32 to vector<2x256xf32>
    %478 = arith.select %469, %476, %477 : vector<2x256xi1>, vector<2x256xf32>
    %479 = arith.addf %463, %478 : vector<2x256xf32>
    %c240_i32_86 = arith.constant 240 : i32
    %480 = tpu.dynamic_rotate %8 by %c240_i32_86 dim 1 : vector<2x256xf32>, i32 -> vector<2x256xf32>
    %c240_i32_87 = arith.constant 240 : i32
    %481 = vector.broadcast %c240_i32_87 : i32 to vector<2x256xi32>
    %482 = arith.cmpi slt, %9, %481 : vector<2x256xi32>
    %c31 = arith.constant 31 : index
    %483 = memref.load %arg2[%c31] : memref<98xf32, #tpu.memory_space<smem>>
    %c80 = arith.constant 80 : index
    %484 = memref.load %arg2[%c80] : memref<98xf32, #tpu.memory_space<smem>>
    %485 = vector.broadcast %483 : f32 to vector<2x1xf32>
    %486 = vector.broadcast %484 : f32 to vector<2x1xf32>
    %487 = arith.select %17, %485, %486 : vector<2x1xi1>, vector<2x1xf32>
    %488 = vector.broadcast %487 : vector<2x1xf32> to vector<2x256xf32>
    %489 = arith.mulf %480, %488 : vector<2x256xf32>
    %cst_88 = arith.constant 0.000000e+00 : f32
    %490 = vector.broadcast %cst_88 : f32 to vector<2x256xf32>
    %491 = arith.select %482, %489, %490 : vector<2x256xi1>, vector<2x256xf32>
    %492 = arith.addf %479, %491 : vector<2x256xf32>
    %c239_i32 = arith.constant 239 : i32
    %493 = tpu.dynamic_rotate %8 by %c239_i32 dim 1 : vector<2x256xf32>, i32 -> vector<2x256xf32>
    %c240_i32_89 = arith.constant 240 : i32
    %494 = vector.broadcast %c240_i32_89 : i32 to vector<2x256xi32>
    %495 = arith.cmpi slt, %9, %494 : vector<2x256xi32>
    %c15_i32_90 = arith.constant 15 : i32
    %496 = vector.broadcast %c15_i32_90 : i32 to vector<2x256xi32>
    %497 = arith.cmpi slt, %14, %496 : vector<2x256xi32>
    %498 = arith.andi %495, %497 : vector<2x256xi1>
    %c32 = arith.constant 32 : index
    %499 = memref.load %arg2[%c32] : memref<98xf32, #tpu.memory_space<smem>>
    %c81 = arith.constant 81 : index
    %500 = memref.load %arg2[%c81] : memref<98xf32, #tpu.memory_space<smem>>
    %501 = vector.broadcast %499 : f32 to vector<2x1xf32>
    %502 = vector.broadcast %500 : f32 to vector<2x1xf32>
    %503 = arith.select %17, %501, %502 : vector<2x1xi1>, vector<2x1xf32>
    %504 = vector.broadcast %503 : vector<2x1xf32> to vector<2x256xf32>
    %505 = arith.mulf %493, %504 : vector<2x256xf32>
    %cst_91 = arith.constant 0.000000e+00 : f32
    %506 = vector.broadcast %cst_91 : f32 to vector<2x256xf32>
    %507 = arith.select %498, %505, %506 : vector<2x256xi1>, vector<2x256xf32>
    %508 = arith.addf %492, %507 : vector<2x256xf32>
    %c238_i32 = arith.constant 238 : i32
    %509 = tpu.dynamic_rotate %8 by %c238_i32 dim 1 : vector<2x256xf32>, i32 -> vector<2x256xf32>
    %c240_i32_92 = arith.constant 240 : i32
    %510 = vector.broadcast %c240_i32_92 : i32 to vector<2x256xi32>
    %511 = arith.cmpi slt, %9, %510 : vector<2x256xi32>
    %c14_i32_93 = arith.constant 14 : i32
    %512 = vector.broadcast %c14_i32_93 : i32 to vector<2x256xi32>
    %513 = arith.cmpi slt, %14, %512 : vector<2x256xi32>
    %514 = arith.andi %511, %513 : vector<2x256xi1>
    %c33 = arith.constant 33 : index
    %515 = memref.load %arg2[%c33] : memref<98xf32, #tpu.memory_space<smem>>
    %c82 = arith.constant 82 : index
    %516 = memref.load %arg2[%c82] : memref<98xf32, #tpu.memory_space<smem>>
    %517 = vector.broadcast %515 : f32 to vector<2x1xf32>
    %518 = vector.broadcast %516 : f32 to vector<2x1xf32>
    %519 = arith.select %17, %517, %518 : vector<2x1xi1>, vector<2x1xf32>
    %520 = vector.broadcast %519 : vector<2x1xf32> to vector<2x256xf32>
    %521 = arith.mulf %509, %520 : vector<2x256xf32>
    %cst_94 = arith.constant 0.000000e+00 : f32
    %522 = vector.broadcast %cst_94 : f32 to vector<2x256xf32>
    %523 = arith.select %514, %521, %522 : vector<2x256xi1>, vector<2x256xf32>
    %524 = arith.addf %508, %523 : vector<2x256xf32>
    %c237_i32 = arith.constant 237 : i32
    %525 = tpu.dynamic_rotate %8 by %c237_i32 dim 1 : vector<2x256xf32>, i32 -> vector<2x256xf32>
    %c240_i32_95 = arith.constant 240 : i32
    %526 = vector.broadcast %c240_i32_95 : i32 to vector<2x256xi32>
    %527 = arith.cmpi slt, %9, %526 : vector<2x256xi32>
    %c13_i32_96 = arith.constant 13 : i32
    %528 = vector.broadcast %c13_i32_96 : i32 to vector<2x256xi32>
    %529 = arith.cmpi slt, %14, %528 : vector<2x256xi32>
    %530 = arith.andi %527, %529 : vector<2x256xi1>
    %c34 = arith.constant 34 : index
    %531 = memref.load %arg2[%c34] : memref<98xf32, #tpu.memory_space<smem>>
    %c83 = arith.constant 83 : index
    %532 = memref.load %arg2[%c83] : memref<98xf32, #tpu.memory_space<smem>>
    %533 = vector.broadcast %531 : f32 to vector<2x1xf32>
    %534 = vector.broadcast %532 : f32 to vector<2x1xf32>
    %535 = arith.select %17, %533, %534 : vector<2x1xi1>, vector<2x1xf32>
    %536 = vector.broadcast %535 : vector<2x1xf32> to vector<2x256xf32>
    %537 = arith.mulf %525, %536 : vector<2x256xf32>
    %cst_97 = arith.constant 0.000000e+00 : f32
    %538 = vector.broadcast %cst_97 : f32 to vector<2x256xf32>
    %539 = arith.select %530, %537, %538 : vector<2x256xi1>, vector<2x256xf32>
    %540 = arith.addf %524, %539 : vector<2x256xf32>
    %c227_i32 = arith.constant 227 : i32
    %541 = tpu.dynamic_rotate %8 by %c227_i32 dim 1 : vector<2x256xf32>, i32 -> vector<2x256xf32>
    %c224_i32 = arith.constant 224 : i32
    %542 = vector.broadcast %c224_i32 : i32 to vector<2x256xi32>
    %543 = arith.cmpi slt, %9, %542 : vector<2x256xi32>
    %c3_i32_98 = arith.constant 3 : i32
    %544 = vector.broadcast %c3_i32_98 : i32 to vector<2x256xi32>
    %545 = arith.cmpi sge, %14, %544 : vector<2x256xi32>
    %546 = arith.andi %543, %545 : vector<2x256xi1>
    %c35 = arith.constant 35 : index
    %547 = memref.load %arg2[%c35] : memref<98xf32, #tpu.memory_space<smem>>
    %c84 = arith.constant 84 : index
    %548 = memref.load %arg2[%c84] : memref<98xf32, #tpu.memory_space<smem>>
    %549 = vector.broadcast %547 : f32 to vector<2x1xf32>
    %550 = vector.broadcast %548 : f32 to vector<2x1xf32>
    %551 = arith.select %17, %549, %550 : vector<2x1xi1>, vector<2x1xf32>
    %552 = vector.broadcast %551 : vector<2x1xf32> to vector<2x256xf32>
    %553 = arith.mulf %541, %552 : vector<2x256xf32>
    %cst_99 = arith.constant 0.000000e+00 : f32
    %554 = vector.broadcast %cst_99 : f32 to vector<2x256xf32>
    %555 = arith.select %546, %553, %554 : vector<2x256xi1>, vector<2x256xf32>
    %556 = arith.addf %540, %555 : vector<2x256xf32>
    %c226_i32 = arith.constant 226 : i32
    %557 = tpu.dynamic_rotate %8 by %c226_i32 dim 1 : vector<2x256xf32>, i32 -> vector<2x256xf32>
    %c224_i32_100 = arith.constant 224 : i32
    %558 = vector.broadcast %c224_i32_100 : i32 to vector<2x256xi32>
    %559 = arith.cmpi slt, %9, %558 : vector<2x256xi32>
    %c2_i32_101 = arith.constant 2 : i32
    %560 = vector.broadcast %c2_i32_101 : i32 to vector<2x256xi32>
    %561 = arith.cmpi sge, %14, %560 : vector<2x256xi32>
    %562 = arith.andi %559, %561 : vector<2x256xi1>
    %c36 = arith.constant 36 : index
    %563 = memref.load %arg2[%c36] : memref<98xf32, #tpu.memory_space<smem>>
    %c85 = arith.constant 85 : index
    %564 = memref.load %arg2[%c85] : memref<98xf32, #tpu.memory_space<smem>>
    %565 = vector.broadcast %563 : f32 to vector<2x1xf32>
    %566 = vector.broadcast %564 : f32 to vector<2x1xf32>
    %567 = arith.select %17, %565, %566 : vector<2x1xi1>, vector<2x1xf32>
    %568 = vector.broadcast %567 : vector<2x1xf32> to vector<2x256xf32>
    %569 = arith.mulf %557, %568 : vector<2x256xf32>
    %cst_102 = arith.constant 0.000000e+00 : f32
    %570 = vector.broadcast %cst_102 : f32 to vector<2x256xf32>
    %571 = arith.select %562, %569, %570 : vector<2x256xi1>, vector<2x256xf32>
    %572 = arith.addf %556, %571 : vector<2x256xf32>
    %c225_i32 = arith.constant 225 : i32
    %573 = tpu.dynamic_rotate %8 by %c225_i32 dim 1 : vector<2x256xf32>, i32 -> vector<2x256xf32>
    %c224_i32_103 = arith.constant 224 : i32
    %574 = vector.broadcast %c224_i32_103 : i32 to vector<2x256xi32>
    %575 = arith.cmpi slt, %9, %574 : vector<2x256xi32>
    %c1_i32_104 = arith.constant 1 : i32
    %576 = vector.broadcast %c1_i32_104 : i32 to vector<2x256xi32>
    %577 = arith.cmpi sge, %14, %576 : vector<2x256xi32>
    %578 = arith.andi %575, %577 : vector<2x256xi1>
    %c37 = arith.constant 37 : index
    %579 = memref.load %arg2[%c37] : memref<98xf32, #tpu.memory_space<smem>>
    %c86 = arith.constant 86 : index
    %580 = memref.load %arg2[%c86] : memref<98xf32, #tpu.memory_space<smem>>
    %581 = vector.broadcast %579 : f32 to vector<2x1xf32>
    %582 = vector.broadcast %580 : f32 to vector<2x1xf32>
    %583 = arith.select %17, %581, %582 : vector<2x1xi1>, vector<2x1xf32>
    %584 = vector.broadcast %583 : vector<2x1xf32> to vector<2x256xf32>
    %585 = arith.mulf %573, %584 : vector<2x256xf32>
    %cst_105 = arith.constant 0.000000e+00 : f32
    %586 = vector.broadcast %cst_105 : f32 to vector<2x256xf32>
    %587 = arith.select %578, %585, %586 : vector<2x256xi1>, vector<2x256xf32>
    %588 = arith.addf %572, %587 : vector<2x256xf32>
    %c224_i32_106 = arith.constant 224 : i32
    %589 = tpu.dynamic_rotate %8 by %c224_i32_106 dim 1 : vector<2x256xf32>, i32 -> vector<2x256xf32>
    %c224_i32_107 = arith.constant 224 : i32
    %590 = vector.broadcast %c224_i32_107 : i32 to vector<2x256xi32>
    %591 = arith.cmpi slt, %9, %590 : vector<2x256xi32>
    %c38 = arith.constant 38 : index
    %592 = memref.load %arg2[%c38] : memref<98xf32, #tpu.memory_space<smem>>
    %c87 = arith.constant 87 : index
    %593 = memref.load %arg2[%c87] : memref<98xf32, #tpu.memory_space<smem>>
    %594 = vector.broadcast %592 : f32 to vector<2x1xf32>
    %595 = vector.broadcast %593 : f32 to vector<2x1xf32>
    %596 = arith.select %17, %594, %595 : vector<2x1xi1>, vector<2x1xf32>
    %597 = vector.broadcast %596 : vector<2x1xf32> to vector<2x256xf32>
    %598 = arith.mulf %589, %597 : vector<2x256xf32>
    %cst_108 = arith.constant 0.000000e+00 : f32
    %599 = vector.broadcast %cst_108 : f32 to vector<2x256xf32>
    %600 = arith.select %591, %598, %599 : vector<2x256xi1>, vector<2x256xf32>
    %601 = arith.addf %588, %600 : vector<2x256xf32>
    %c223_i32 = arith.constant 223 : i32
    %602 = tpu.dynamic_rotate %8 by %c223_i32 dim 1 : vector<2x256xf32>, i32 -> vector<2x256xf32>
    %c224_i32_109 = arith.constant 224 : i32
    %603 = vector.broadcast %c224_i32_109 : i32 to vector<2x256xi32>
    %604 = arith.cmpi slt, %9, %603 : vector<2x256xi32>
    %c15_i32_110 = arith.constant 15 : i32
    %605 = vector.broadcast %c15_i32_110 : i32 to vector<2x256xi32>
    %606 = arith.cmpi slt, %14, %605 : vector<2x256xi32>
    %607 = arith.andi %604, %606 : vector<2x256xi1>
    %c39 = arith.constant 39 : index
    %608 = memref.load %arg2[%c39] : memref<98xf32, #tpu.memory_space<smem>>
    %c88 = arith.constant 88 : index
    %609 = memref.load %arg2[%c88] : memref<98xf32, #tpu.memory_space<smem>>
    %610 = vector.broadcast %608 : f32 to vector<2x1xf32>
    %611 = vector.broadcast %609 : f32 to vector<2x1xf32>
    %612 = arith.select %17, %610, %611 : vector<2x1xi1>, vector<2x1xf32>
    %613 = vector.broadcast %612 : vector<2x1xf32> to vector<2x256xf32>
    %614 = arith.mulf %602, %613 : vector<2x256xf32>
    %cst_111 = arith.constant 0.000000e+00 : f32
    %615 = vector.broadcast %cst_111 : f32 to vector<2x256xf32>
    %616 = arith.select %607, %614, %615 : vector<2x256xi1>, vector<2x256xf32>
    %617 = arith.addf %601, %616 : vector<2x256xf32>
    %c222_i32 = arith.constant 222 : i32
    %618 = tpu.dynamic_rotate %8 by %c222_i32 dim 1 : vector<2x256xf32>, i32 -> vector<2x256xf32>
    %c224_i32_112 = arith.constant 224 : i32
    %619 = vector.broadcast %c224_i32_112 : i32 to vector<2x256xi32>
    %620 = arith.cmpi slt, %9, %619 : vector<2x256xi32>
    %c14_i32_113 = arith.constant 14 : i32
    %621 = vector.broadcast %c14_i32_113 : i32 to vector<2x256xi32>
    %622 = arith.cmpi slt, %14, %621 : vector<2x256xi32>
    %623 = arith.andi %620, %622 : vector<2x256xi1>
    %c40 = arith.constant 40 : index
    %624 = memref.load %arg2[%c40] : memref<98xf32, #tpu.memory_space<smem>>
    %c89 = arith.constant 89 : index
    %625 = memref.load %arg2[%c89] : memref<98xf32, #tpu.memory_space<smem>>
    %626 = vector.broadcast %624 : f32 to vector<2x1xf32>
    %627 = vector.broadcast %625 : f32 to vector<2x1xf32>
    %628 = arith.select %17, %626, %627 : vector<2x1xi1>, vector<2x1xf32>
    %629 = vector.broadcast %628 : vector<2x1xf32> to vector<2x256xf32>
    %630 = arith.mulf %618, %629 : vector<2x256xf32>
    %cst_114 = arith.constant 0.000000e+00 : f32
    %631 = vector.broadcast %cst_114 : f32 to vector<2x256xf32>
    %632 = arith.select %623, %630, %631 : vector<2x256xi1>, vector<2x256xf32>
    %633 = arith.addf %617, %632 : vector<2x256xf32>
    %c221_i32 = arith.constant 221 : i32
    %634 = tpu.dynamic_rotate %8 by %c221_i32 dim 1 : vector<2x256xf32>, i32 -> vector<2x256xf32>
    %c224_i32_115 = arith.constant 224 : i32
    %635 = vector.broadcast %c224_i32_115 : i32 to vector<2x256xi32>
    %636 = arith.cmpi slt, %9, %635 : vector<2x256xi32>
    %c13_i32_116 = arith.constant 13 : i32
    %637 = vector.broadcast %c13_i32_116 : i32 to vector<2x256xi32>
    %638 = arith.cmpi slt, %14, %637 : vector<2x256xi32>
    %639 = arith.andi %636, %638 : vector<2x256xi1>
    %c41 = arith.constant 41 : index
    %640 = memref.load %arg2[%c41] : memref<98xf32, #tpu.memory_space<smem>>
    %c90 = arith.constant 90 : index
    %641 = memref.load %arg2[%c90] : memref<98xf32, #tpu.memory_space<smem>>
    %642 = vector.broadcast %640 : f32 to vector<2x1xf32>
    %643 = vector.broadcast %641 : f32 to vector<2x1xf32>
    %644 = arith.select %17, %642, %643 : vector<2x1xi1>, vector<2x1xf32>
    %645 = vector.broadcast %644 : vector<2x1xf32> to vector<2x256xf32>
    %646 = arith.mulf %634, %645 : vector<2x256xf32>
    %cst_117 = arith.constant 0.000000e+00 : f32
    %647 = vector.broadcast %cst_117 : f32 to vector<2x256xf32>
    %648 = arith.select %639, %646, %647 : vector<2x256xi1>, vector<2x256xf32>
    %649 = arith.addf %633, %648 : vector<2x256xf32>
    %c211_i32 = arith.constant 211 : i32
    %650 = tpu.dynamic_rotate %8 by %c211_i32 dim 1 : vector<2x256xf32>, i32 -> vector<2x256xf32>
    %c208_i32 = arith.constant 208 : i32
    %651 = vector.broadcast %c208_i32 : i32 to vector<2x256xi32>
    %652 = arith.cmpi slt, %9, %651 : vector<2x256xi32>
    %c3_i32_118 = arith.constant 3 : i32
    %653 = vector.broadcast %c3_i32_118 : i32 to vector<2x256xi32>
    %654 = arith.cmpi sge, %14, %653 : vector<2x256xi32>
    %655 = arith.andi %652, %654 : vector<2x256xi1>
    %c42 = arith.constant 42 : index
    %656 = memref.load %arg2[%c42] : memref<98xf32, #tpu.memory_space<smem>>
    %c91 = arith.constant 91 : index
    %657 = memref.load %arg2[%c91] : memref<98xf32, #tpu.memory_space<smem>>
    %658 = vector.broadcast %656 : f32 to vector<2x1xf32>
    %659 = vector.broadcast %657 : f32 to vector<2x1xf32>
    %660 = arith.select %17, %658, %659 : vector<2x1xi1>, vector<2x1xf32>
    %661 = vector.broadcast %660 : vector<2x1xf32> to vector<2x256xf32>
    %662 = arith.mulf %650, %661 : vector<2x256xf32>
    %cst_119 = arith.constant 0.000000e+00 : f32
    %663 = vector.broadcast %cst_119 : f32 to vector<2x256xf32>
    %664 = arith.select %655, %662, %663 : vector<2x256xi1>, vector<2x256xf32>
    %665 = arith.addf %649, %664 : vector<2x256xf32>
    %c210_i32 = arith.constant 210 : i32
    %666 = tpu.dynamic_rotate %8 by %c210_i32 dim 1 : vector<2x256xf32>, i32 -> vector<2x256xf32>
    %c208_i32_120 = arith.constant 208 : i32
    %667 = vector.broadcast %c208_i32_120 : i32 to vector<2x256xi32>
    %668 = arith.cmpi slt, %9, %667 : vector<2x256xi32>
    %c2_i32_121 = arith.constant 2 : i32
    %669 = vector.broadcast %c2_i32_121 : i32 to vector<2x256xi32>
    %670 = arith.cmpi sge, %14, %669 : vector<2x256xi32>
    %671 = arith.andi %668, %670 : vector<2x256xi1>
    %c43 = arith.constant 43 : index
    %672 = memref.load %arg2[%c43] : memref<98xf32, #tpu.memory_space<smem>>
    %c92 = arith.constant 92 : index
    %673 = memref.load %arg2[%c92] : memref<98xf32, #tpu.memory_space<smem>>
    %674 = vector.broadcast %672 : f32 to vector<2x1xf32>
    %675 = vector.broadcast %673 : f32 to vector<2x1xf32>
    %676 = arith.select %17, %674, %675 : vector<2x1xi1>, vector<2x1xf32>
    %677 = vector.broadcast %676 : vector<2x1xf32> to vector<2x256xf32>
    %678 = arith.mulf %666, %677 : vector<2x256xf32>
    %cst_122 = arith.constant 0.000000e+00 : f32
    %679 = vector.broadcast %cst_122 : f32 to vector<2x256xf32>
    %680 = arith.select %671, %678, %679 : vector<2x256xi1>, vector<2x256xf32>
    %681 = arith.addf %665, %680 : vector<2x256xf32>
    %c209_i32 = arith.constant 209 : i32
    %682 = tpu.dynamic_rotate %8 by %c209_i32 dim 1 : vector<2x256xf32>, i32 -> vector<2x256xf32>
    %c208_i32_123 = arith.constant 208 : i32
    %683 = vector.broadcast %c208_i32_123 : i32 to vector<2x256xi32>
    %684 = arith.cmpi slt, %9, %683 : vector<2x256xi32>
    %c1_i32_124 = arith.constant 1 : i32
    %685 = vector.broadcast %c1_i32_124 : i32 to vector<2x256xi32>
    %686 = arith.cmpi sge, %14, %685 : vector<2x256xi32>
    %687 = arith.andi %684, %686 : vector<2x256xi1>
    %c44 = arith.constant 44 : index
    %688 = memref.load %arg2[%c44] : memref<98xf32, #tpu.memory_space<smem>>
    %c93 = arith.constant 93 : index
    %689 = memref.load %arg2[%c93] : memref<98xf32, #tpu.memory_space<smem>>
    %690 = vector.broadcast %688 : f32 to vector<2x1xf32>
    %691 = vector.broadcast %689 : f32 to vector<2x1xf32>
    %692 = arith.select %17, %690, %691 : vector<2x1xi1>, vector<2x1xf32>
    %693 = vector.broadcast %692 : vector<2x1xf32> to vector<2x256xf32>
    %694 = arith.mulf %682, %693 : vector<2x256xf32>
    %cst_125 = arith.constant 0.000000e+00 : f32
    %695 = vector.broadcast %cst_125 : f32 to vector<2x256xf32>
    %696 = arith.select %687, %694, %695 : vector<2x256xi1>, vector<2x256xf32>
    %697 = arith.addf %681, %696 : vector<2x256xf32>
    %c208_i32_126 = arith.constant 208 : i32
    %698 = tpu.dynamic_rotate %8 by %c208_i32_126 dim 1 : vector<2x256xf32>, i32 -> vector<2x256xf32>
    %c208_i32_127 = arith.constant 208 : i32
    %699 = vector.broadcast %c208_i32_127 : i32 to vector<2x256xi32>
    %700 = arith.cmpi slt, %9, %699 : vector<2x256xi32>
    %c45 = arith.constant 45 : index
    %701 = memref.load %arg2[%c45] : memref<98xf32, #tpu.memory_space<smem>>
    %c94 = arith.constant 94 : index
    %702 = memref.load %arg2[%c94] : memref<98xf32, #tpu.memory_space<smem>>
    %703 = vector.broadcast %701 : f32 to vector<2x1xf32>
    %704 = vector.broadcast %702 : f32 to vector<2x1xf32>
    %705 = arith.select %17, %703, %704 : vector<2x1xi1>, vector<2x1xf32>
    %706 = vector.broadcast %705 : vector<2x1xf32> to vector<2x256xf32>
    %707 = arith.mulf %698, %706 : vector<2x256xf32>
    %cst_128 = arith.constant 0.000000e+00 : f32
    %708 = vector.broadcast %cst_128 : f32 to vector<2x256xf32>
    %709 = arith.select %700, %707, %708 : vector<2x256xi1>, vector<2x256xf32>
    %710 = arith.addf %697, %709 : vector<2x256xf32>
    %c207_i32 = arith.constant 207 : i32
    %711 = tpu.dynamic_rotate %8 by %c207_i32 dim 1 : vector<2x256xf32>, i32 -> vector<2x256xf32>
    %c208_i32_129 = arith.constant 208 : i32
    %712 = vector.broadcast %c208_i32_129 : i32 to vector<2x256xi32>
    %713 = arith.cmpi slt, %9, %712 : vector<2x256xi32>
    %c15_i32_130 = arith.constant 15 : i32
    %714 = vector.broadcast %c15_i32_130 : i32 to vector<2x256xi32>
    %715 = arith.cmpi slt, %14, %714 : vector<2x256xi32>
    %716 = arith.andi %713, %715 : vector<2x256xi1>
    %c46 = arith.constant 46 : index
    %717 = memref.load %arg2[%c46] : memref<98xf32, #tpu.memory_space<smem>>
    %c95 = arith.constant 95 : index
    %718 = memref.load %arg2[%c95] : memref<98xf32, #tpu.memory_space<smem>>
    %719 = vector.broadcast %717 : f32 to vector<2x1xf32>
    %720 = vector.broadcast %718 : f32 to vector<2x1xf32>
    %721 = arith.select %17, %719, %720 : vector<2x1xi1>, vector<2x1xf32>
    %722 = vector.broadcast %721 : vector<2x1xf32> to vector<2x256xf32>
    %723 = arith.mulf %711, %722 : vector<2x256xf32>
    %cst_131 = arith.constant 0.000000e+00 : f32
    %724 = vector.broadcast %cst_131 : f32 to vector<2x256xf32>
    %725 = arith.select %716, %723, %724 : vector<2x256xi1>, vector<2x256xf32>
    %726 = arith.addf %710, %725 : vector<2x256xf32>
    %c206_i32 = arith.constant 206 : i32
    %727 = tpu.dynamic_rotate %8 by %c206_i32 dim 1 : vector<2x256xf32>, i32 -> vector<2x256xf32>
    %c208_i32_132 = arith.constant 208 : i32
    %728 = vector.broadcast %c208_i32_132 : i32 to vector<2x256xi32>
    %729 = arith.cmpi slt, %9, %728 : vector<2x256xi32>
    %c14_i32_133 = arith.constant 14 : i32
    %730 = vector.broadcast %c14_i32_133 : i32 to vector<2x256xi32>
    %731 = arith.cmpi slt, %14, %730 : vector<2x256xi32>
    %732 = arith.andi %729, %731 : vector<2x256xi1>
    %c47 = arith.constant 47 : index
    %733 = memref.load %arg2[%c47] : memref<98xf32, #tpu.memory_space<smem>>
    %c96 = arith.constant 96 : index
    %734 = memref.load %arg2[%c96] : memref<98xf32, #tpu.memory_space<smem>>
    %735 = vector.broadcast %733 : f32 to vector<2x1xf32>
    %736 = vector.broadcast %734 : f32 to vector<2x1xf32>
    %737 = arith.select %17, %735, %736 : vector<2x1xi1>, vector<2x1xf32>
    %738 = vector.broadcast %737 : vector<2x1xf32> to vector<2x256xf32>
    %739 = arith.mulf %727, %738 : vector<2x256xf32>
    %cst_134 = arith.constant 0.000000e+00 : f32
    %740 = vector.broadcast %cst_134 : f32 to vector<2x256xf32>
    %741 = arith.select %732, %739, %740 : vector<2x256xi1>, vector<2x256xf32>
    %742 = arith.addf %726, %741 : vector<2x256xf32>
    %c205_i32 = arith.constant 205 : i32
    %743 = tpu.dynamic_rotate %8 by %c205_i32 dim 1 : vector<2x256xf32>, i32 -> vector<2x256xf32>
    %c208_i32_135 = arith.constant 208 : i32
    %744 = vector.broadcast %c208_i32_135 : i32 to vector<2x256xi32>
    %745 = arith.cmpi slt, %9, %744 : vector<2x256xi32>
    %c13_i32_136 = arith.constant 13 : i32
    %746 = vector.broadcast %c13_i32_136 : i32 to vector<2x256xi32>
    %747 = arith.cmpi slt, %14, %746 : vector<2x256xi32>
    %748 = arith.andi %745, %747 : vector<2x256xi1>
    %c48 = arith.constant 48 : index
    %749 = memref.load %arg2[%c48] : memref<98xf32, #tpu.memory_space<smem>>
    %c97 = arith.constant 97 : index
    %750 = memref.load %arg2[%c97] : memref<98xf32, #tpu.memory_space<smem>>
    %751 = vector.broadcast %749 : f32 to vector<2x1xf32>
    %752 = vector.broadcast %750 : f32 to vector<2x1xf32>
    %753 = arith.select %17, %751, %752 : vector<2x1xi1>, vector<2x1xf32>
    %754 = vector.broadcast %753 : vector<2x1xf32> to vector<2x256xf32>
    %755 = arith.mulf %743, %754 : vector<2x256xf32>
    %cst_137 = arith.constant 0.000000e+00 : f32
    %756 = vector.broadcast %cst_137 : f32 to vector<2x256xf32>
    %757 = arith.select %748, %755, %756 : vector<2x256xi1>, vector<2x256xf32>
    %758 = arith.addf %742, %757 : vector<2x256xf32>
    %cst_138 = arith.constant dense<0.000000e+00> : vector<256xf32>
    %759 = vector.multi_reduction <add>, %758, %cst_138 [0] : vector<2x256xf32> to vector<256xf32>
    %760 = vector.shape_cast %759 : vector<256xf32> to vector<1x256xf32>
    %c0_139 = arith.constant 0 : index
    %761 = memref.load %arg3[%c0_139] : memref<1xf32, #tpu.memory_space<smem>>
    %762 = vector.broadcast %761 : f32 to vector<1x256xf32>
    %763 = arith.addf %760, %762 : vector<1x256xf32>
    %764 = arith.negf %763 : vector<1x256xf32>
    %765 = math.exp %764 : vector<1x256xf32>
    %cst_140 = arith.constant 1.000000e+00 : f32
    %766 = vector.broadcast %cst_140 : f32 to vector<1x256xf32>
    %767 = arith.addf %766, %765 : vector<1x256xf32>
    %768 = arith.divf %766, %767 : vector<1x256xf32>
    %769 = vector.shape_cast %768 : vector<1x256xf32> to vector<1x256xf32>
    %770 = vector.broadcast %769 : vector<1x256xf32> to vector<4x256xf32>
    %c0_141 = arith.constant 0 : index
    %c0_142 = arith.constant 0 : index
    %c0_143 = arith.constant 0 : index
    %771 = vector.load %arg1[%c0_141, %c0_142, %c0_143] : memref<1x4x256xf32, #tpu.memory_space<vmem>>, vector<1x4x256xf32>
    %772 = vector.shape_cast %771 : vector<1x4x256xf32> to vector<4x256xf32>
    %773 = arith.mulf %772, %770 : vector<4x256xf32>
    %c0_144 = arith.constant 0 : index
    %c0_145 = arith.constant 0 : index
    %c0_146 = arith.constant 0 : index
    %774 = vector.load %arg4[%c0_144, %c0_145, %c0_146] : memref<1x4x256xf32, #tpu.memory_space<vmem>>, vector<1x4x256xf32>
    %775 = vector.shape_cast %774 : vector<1x4x256xf32> to vector<4x256xf32>
    %776 = vector.shape_cast %773 : vector<4x256xf32> to vector<1x4x256xf32>
    tpu.vector_store %arg4[%c0_144, %c0_145, %c0_146], %776 {strides = array<i32>} : memref<1x4x256xf32, #tpu.memory_space<vmem>>, vector<1x4x256xf32>,
    return
  }
  func.func @transform_0(%arg0: i32) -> (i32, i32, i32) {
    %c0_i32 = arith.constant 0 : i32
    %c0_i32_0 = arith.constant 0 : i32
    %c0_i32_1 = arith.constant 0 : i32
    return %arg0, %c0_i32, %c0_i32_0 : i32, i32, i32
  }
  func.func @transform_1(%arg0: i32) -> i32 {
    %c0_i32 = arith.constant 0 : i32
    %c0_i32_0 = arith.constant 0 : i32
    return %c0_i32 : i32
  }
  func.func @transform_2(%arg0: i32) -> i32 {
    %c0_i32 = arith.constant 0 : i32
    %c0_i32_0 = arith.constant 0 : i32
    return %c0_i32 : i32
  }
  func.func @transform_3(%arg0: i32) -> (i32, i32, i32) {
    %c0_i32 = arith.constant 0 : i32
    %c0_i32_0 = arith.constant 0 : i32
    %c0_i32_1 = arith.constant 0 : i32
    return %arg0, %c0_i32, %c0_i32_0 : i32, i32, i32
  }
}

</mosaic_0001>

<bundles_post_ra>
// kernel: tpu_custom_call.1
= control target key start
LH: loop header
LB: loop body
LE: loop exit
PB: predicated region body
PF: predicated region fallthrough
CT: control target
= control target key end

     0   :  { %s3768_s0 = inlined_call_operand.hbm [shape: f32[2,4,256], index: 0, kind: input, shape index: {}]   ;;  %s3769_s1 = inlined_call_operand.vmem [shape: f32[98], index: 1, kind: input, shape index: {}]   ;;  %s3770_s2 = inlined_call_operand.<no memory space> [shape: f32[1], index: 2, kind: input, shape index: {}]   ;;  %s3771_s3 = inlined_call_operand.hbm [shape: f32[2,4,256], index: 3, kind: output, shape index: {}]  }
   0x1   :  { %3811 = sst [smem:[#allocation42_spill]] %s3768_s0 }
   0x2   :  { %3812 = sst [smem:[#allocation43_spill]] %s3769_s1 }
   0x3   :  { %8 = sst [smem:[#allocation2]] %s3770_s2 }
   0x4   :  { %9 = vsyncpa [#allocation4], 0 }
   0x5   :  { %11 = vsyncpa [#allocation4 + $0x1], 0 }
   0x6   :  { %12 = vsyncpa [#allocation6], 0 }
   0x7   :  { %13 = vsyncpa [#allocation5], 0 }
   0x8   :  { %15 = vsyncpa [#allocation5 + $0x1], 0  ;;  %s1780_s14 = smov 0   ;;  %s1782_s15 = smov 0  }
   0x9   :  { %s1784_s16 = smov 0   ;;  %s1786_s17 = smov 0  }
   0xa LB: > { %3813 = sst [smem:[#allocation12_spill]] %s1695_s15  ;;  %s1801_s2 = sadd.s32 4294967295, %s1703_s17   ;;  %s1703_s17 = sphi %s1786_s17, %s3936_s17   ;;  %s1699_s16 = sphi %s1784_s16, %s3939_s16   ;;  %s1695_s15 = sphi %s1782_s15, %s3938_s15   ;;  %s1691_s14 = sphi %s1780_s14, %s3937_s14  }
   0xb   : > { %3814 = sst [smem:[#allocation13_spill]] %s1699_s16  ;;  %s1355_s18 = sadd.s32 4294967294, %s1703_s17  }
   0xc   : > { %3815 = sst [smem:[#allocation14_spill]] %s1703_s17  ;;  %p41_p0 = scmp.ne.s32.totalorder %s1695_s15, %s1691_s14 }
   0xd   : > { %p3772_p1 = scmp.eq.s32.totalorder %s1801_s2, 0  ;;  %p113_p3 = scmp.eq.s32.totalorder %s1355_s18, 1 }
   0xe   : > { %p1356_p5 = scmp.ge.s32.totalorder %s1703_s17, 1  ;;  %p120_p7 = scmp.lt.s32.totalorder %s1703_s17, 3 }
   0xf   : > { %p1810_p4 = por %p3772_p1, %p41_p0  ;;  %p1815_p6 = por %p113_p3, %p41_p0 }
  0x10   : > { %s3818_s1 = sld [smem:[#allocation43_spill]]  ;;  %p1823_p8 = pnand %p1356_p5, %p120_p7 }
  0x11   : > { %s3816_s19 = scalar_select %p1810_p4, 1, 0 }
  0x12   : > { %s3817_s20 = scalar_select %p1815_p6, 1, 0 }
  0x13   : > { %p1480_p10 = pneg %p1823_p8  ;;  %s1831_s25 = sadd.s32 1, %s1703_s17  }
  0x14   : > { %3820 = sst [smem:[#allocation15_spill]] %s1831_s25  ;;  %s25_s27 = ssub.s32 %s1703_s17, %s1831_s25 }
  0x15   : > { %p1835_p11 = pnand %p1480_p10, %p3772_p1  ;;  %p1841_p12 = scmp.eq.s32.totalorder %s25_s27, 0 }
  0x16   : > { %s133_s23 = sshll.u32 %s3818_s1, 4  ;;  %s28_s29 = sadd.s32 1, %s1699_s16  ;;  %s134_s23 = int_to_ptr.vmem [resolvable:$true] %s133_s23 }
  0x17   : > { %p35_p13 = scmp.ne.s32.totalorder %s1699_s16, %s1695_s15  ;;  %s1588_s30 = scalar_lea.vmem %s134_s23, 16 }
  0x18   : > { %p1589_p0 = scmp.ne.s32.totalorder %s134_s23, %s1588_s30  ;;  %p1590_p3 = pneg %p1835_p11 }
  0x19   : > { %p1596_p9 = scmp.lt.s32.totalorder %s134_s23, %s134_s23  ;;  %p1597_p2 = scmp.lt.s32.totalorder %s1588_s30, %s1588_s30 }
  0x1a   : > { %p1591_p5 = pnand %p1590_p3, %p1589_p0 }
  0x1b   : > { %p1598_p10 = por %p1597_p2, %p1596_p9 }
  0x1c   : > { %p1592_p7 = pneg %p1591_p5 }
  0x1e   : > { %p1599_p1 = pnand %p1598_p10, %p1592_p7 }
  0x20   : > { %1602 = shalt.err (!%p1599_p1)
}
  0x21   : > { %s1705_s4 = smov [#allocation7]   ;;  %p36_p2 = scmp.eq.s32.totalorder %s1703_s17, 0 }
  0x22   : > { %1483 = dma.vmem_to_smem (!%p1835_p11), %s134_s23, 16, %s1705_s4, [#allocation6]  }
  0x23   : > { %s1855_s5 = scalar_select %p1841_p12, %s1699_s16, %s28_s29  }
  0x24   : > { %p3824_p1 = scmp.eq.s32.totalorder %s1801_s2, 1  ;;  %p1493_p0 = scmp.lt.s32.totalorder %s1703_s17, 2 }
  0x25   : > { %3823 = sst [smem:[#allocation16_spill]] %s1855_s5  ;;  %s147_s7 = sand.u32 1, %s1699_s16  }
  0x26   : > { %p1863_p9 = por %p3824_p1, %p35_p13  ;;  %p37_p3 = por %p36_p2, %p35_p13 }
  0x27   : > { %s1359_s8 = sshll.u32 %s147_s7, 3  ;;  %s1470_s9 = sshll.u32 %s1703_s17, 7 }
  0x28   : > { %s3825_s6 = scalar_select %p1863_p9, 1, 0 }
  0x29   : > { %s3826_s0 = sld [smem:[#allocation42_spill]]  ;;  %s151_s13 = scalar_lea.vmem [#allocation3], %s1359_s8 }
  0x2a   : > { %s159_s18 = sshll.u32 %s151_s13, 4  ;;  %p1878_p11 = pnand %p1493_p0, %p37_p3  ;;  %s1882_s18 = int_to_ptr.vmem [resolvable:$true] %s159_s18 }
  0x2b   : > { %s148_s22 = scalar_lea.sflag [#allocation4], %s147_s7 }
  0x2c   : > { %p1605_p13 = pneg %p1878_p11 }
  0x2f   : > { %s1876_s12 = scalar_lea.hbm %s3826_s0, %s1470_s9  ;;  %s1608_s28 = scalar_lea.hbm %s3826_s0, 256 }
  0x30   : > { %s1603_s23 = scalar_lea.hbm %s1876_s12, 128  ;;  %p1609_p10 = scmp.lt.u32.totalorder %s1876_s12, %s3826_s0 }
  0x31   : > { %p1604_p12 = scmp.ne.s32.totalorder %s1876_s12, %s1603_s23  ;;  %p1610_p2 = scmp.lt.u32.totalorder %s1608_s28, %s1603_s23 }
  0x32   : > { %p1612_p0 = scmp.lt.u32.totalorder %s1603_s23, %s1876_s12 }
  0x33   : > { %p1606_p5 = pnand %p1605_p13, %p1604_p12  ;;  %p1611_p1 = por %p1610_p2, %p1609_p10 }
  0x35   : > { %p1607_p7 = pneg %p1606_p5  ;;  %p1613_p3 = por %p1612_p0, %p1611_p1 }
  0x37   : > { %p1614_p6 = pnand %p1613_p3, %p1607_p7 }
  0x39   : > { %1617 = shalt.err (!%p1614_p6)
}
  0x3a   : > { %s1618_s4 = scalar_lea.vmem %s1882_s18, 128  ;;  %s1706_s7 = smov [#allocation3]  }
  0x3b   : > { %p1619_p12 = scmp.ne.s32.totalorder %s1882_s18, %s1618_s4  ;;  %s1623_s8 = sshll.u32 %s1706_s7, 4  ;;  %s1624_s8 = int_to_ptr.vmem [resolvable:$false] %s1623_s8 }
  0x3c   : > { %s1625_s9 = scalar_lea.vmem %s1624_s8, 256  ;;  %p1626_p4 = scmp.lt.s32.totalorder %s1882_s18, %s1624_s8 }
  0x3d   : > { %p1621_p5 = pnand %p1619_p12, %p1605_p13  ;;  %p1627_p10 = scmp.lt.s32.totalorder %s1625_s9, %s1618_s4 }
  0x3f   : > { %p1622_p9 = pneg %p1621_p5  ;;  %p1628_p2 = por %p1627_p10, %p1626_p4 }
  0x41   : > { %p1629_p1 = pnand %p1628_p2, %p1622_p9 }
  0x43   : > { %1632 = shalt.err (!%p1629_p1)
}
  0x44   : > { %1487 = dma.hbm_to_vmem [thread:$0]  (!%p1878_p11), %s1876_s12, 128, %s1882_s18, %s148_s22  }
  0x45   : > { %168 = sbr.rel (%p1823_p8) target bundleno = 605 (0x25d), region = 32 }
  0x4c   : > { %s1912_s10 = sand.u32 1, %s1695_s15   ;;  %p3828_p4 = scmp.ne.s32.totalorder %s3816_s19, 0 }
  0x4d   : > { %s3775_s11 = sshll.u32 %s1912_s10, 3  ;;  %s171_s13 = scalar_lea.sflag [#allocation4], %s1912_s10 }
  0x4e   : > { %s1918_s23 = scalar_lea.vmem [#allocation3], %s3775_s11 }
  0x4f   : > { %1678 = dma.done.wait (%p3828_p4), %s171_s13, 128  }
  0x50   : > { %1680 = vsyncadd (%p3828_p4), %s171_s13, 4294967168  ;;  %p3829_p6 = scmp.eq.s32.totalorder %s1801_s2, 0 }
  0x52   : > { %1682 = dma.done.wait (%p3829_p6), [#allocation6], 16   ;;  %p3830_p8 = pmov %p3829_p6 }
  0x54   : > { %1684 = vsyncadd (%p3830_p8), [#allocation6], 4294967280 }
  0x55   : > { %183 = sfence }
  0x56   : > { %v240_v0 = vlaneseq  ;;  %v202_v1 = vld [vmem:[%s1918_s23] sm:$0xff]  ;;  %vm206_vm0 = vcmask 1043456   ;;  %s1707_s19 = smov 16   ;;  %vm237_vm1 = vcmask 1040384   ;;  %s1708_s24 = smov 51   ;;  %vm245_vm2 = vcmask 130048  }
  0x57   : > { %v207_v2 = vsel %vm206_vm0, %v202_v1, 0.0  ;;  %v221_v3 = vsel %vm206_vm0, %v202_v1, -inf  ;;  %v204_v4 = vcombine.high %v202_v1, %v202_v1  ;;  %s1709_s12 = smov 50   ;;  %s1710_s18 = smov 49   ;;  %vm249_vm11 = vcmask 261120  }
  0x58   : > { %v1930_v5 = vand.u32 127, %v240_v0  ;;  %v208_v6 = vrot.slane %v207_v2, 4  ;;  %v222_v7 = vrot.slane %v221_v3, 4  ;;  %s1711_s21 = smov 48   ;;  %s1712_s22 = smov 47  }
  0x59   : > { %v214_v8 = vsel %vm206_vm0, %v204_v4, 0.0  ;;  %v228_v9 = vsel %vm206_vm0, %v204_v4, -inf  ;;  %s1713_s26 = smov 46   ;;  %s1714_s27 = smov 45  }
  0x5a   : > { %243 = vrot.lane.b32.xlu0 %v1930_v5, %s1707_s19  ;;  %v209_v10 = vadd.f32 %v208_v6, %v207_v2  ;;  %v223_v11 = vmax.f32 %v221_v3, %v222_v7  ;;  %v215_v12 = vrot.slane %v214_v8, 4  ;;  %v229_v13 = vrot.slane %v228_v9, 4  ;;  %s1715_s28 = smov 35   ;;  %s1716_s29 = smov 34  }
  0x5b   : > { %s1717_s30 = smov 33   ;;  %s1718_s4 = smov 32   ;;  %vm262_vm3 = vcmp.lt.s32.totalorder %v1930_v5, 51  ;;  %vm285_vm4 = vcmp.lt.s32.totalorder %v1930_v5, 50  ;;  %vm306_vm5 = vcmp.lt.s32.totalorder %v1930_v5, 49  ;;  %vm327_vm6 = vcmp.lt.s32.totalorder %v1930_v5, 48 }
  0x5c   : > { %v210_v14 = vrot.slane %v209_v10, 2  ;;  %v224_v15 = vrot.slane %v223_v11, 2  ;;  %v216_v16 = vadd.f32 %v215_v12, %v214_v8  ;;  %v230_v17 = vmax.f32 %v228_v9, %v229_v13  ;;  %s1719_s7 = smov 31   ;;  %s1720_s8 = smov 30  }
  0x5d   : > { %s1721_s9 = smov 29   ;;  %s1722_s13 = smov 19   ;;  %vm345_vm7 = vcmp.lt.s32.totalorder %v1930_v5, 47  ;;  %vm366_vm8 = vcmp.lt.s32.totalorder %v1930_v5, 46  ;;  %vm387_vm9 = vcmp.lt.s32.totalorder %v1930_v5, 45  ;;  %vm408_vm10 = vcmp.lt.s32.totalorder %v1930_v5, 35 }
  0x5e   : > { %v211_v18 = vadd.f32 %v210_v14, %v209_v10  ;;  %v225_v19 = vmax.f32 %v223_v11, %v224_v15  ;;  %v217_v20 = vrot.slane %v216_v16, 2  ;;  %v231_v21 = vrot.slane %v230_v17, 2  ;;  %s1747_s11 = smov 94   ;;  %s2240_s0 = sld [smem:[#allocation7 + $0x8]] }
  0x5f   : > { %s2242_s1 = sld [smem:[#allocation7 + $0x39]]  ;;  %s3840_s5 = smov 81   ;;  %vm265_vm13 = vcmp.ge.s32.totalorder %v1930_v5, 48  ;;  %vm430_vm14 = vcmp.lt.s32.totalorder %v1930_v5, 34  ;;  %vm450_vm15 = vcmp.lt.s32.totalorder %v1930_v5, 33  ;;  %vm470_vm0 = vcmp.lt.s32.totalorder %v1930_v5, 32 }
  0x60   : > { %v212_v22 = vrot.slane %v211_v18, 1  ;;  %v226_v23 = vrot.slane %v225_v19, 1  ;;  %v218_v24 = vadd.f32 %v217_v20, %v216_v16  ;;  %v232_v25 = vmax.f32 %v230_v17, %v231_v21  ;;  %s2399_s16 = sld [smem:[#allocation7 + $0x44]]  ;;  %s2420_s25 = sld [smem:[#allocation7 + $0x15]] }
  0x61   : > { %s2411_s15 = sld [smem:[#allocation7 + $0x14]]  ;;  %s2422_s17 = sld [smem:[#allocation7 + $0x46]] }
  0x62   : > { %v213_v26 = vadd.f32 %v212_v22, %v211_v18  ;;  %v227_v27 = vmax.f32 %v225_v19, %v226_v23  ;;  %v219_v28 = vrot.slane %v218_v24, 1  ;;  %v233_v29 = vrot.slane %v232_v25, 1  ;;  %p3932_p11 = scmp.ne.s32.totalorder %s3825_s6, 0 }
  0x64   : > { %v235_v30 = vmul.f32 0.25, %v213_v26  ;;  %v220_v31 = vadd.f32 %v219_v28, %v218_v24  ;;  %v234_v32 = vmax.f32 %v232_v25, %v233_v29 }
  0x66   : > { %v1934_v33 = vsel %vm237_vm1, %v235_v30, %v227_v27  ;;  %v236_v34 = vmul.f32 0.25, %v220_v31 }
  0x67   : > { %3831 = vst [vmem:[#allocation17_spill] sm:$0xff] %v1934_v33  ;;  %258 = vrot.lane.b32.xlu1 %v1934_v33, %s1708_s24 }
  0x68   : > { %v1937_v35 = vsel %vm237_vm1, %v236_v34, %v234_v32  ;;  %vm488_vm1 = vcmp.lt.s32.totalorder %v1930_v5, 31 }
  0x69   : > { %3832 = vst [vmem:[#allocation18_spill] sm:$0xff] %v1937_v35  ;;  %260 = vrot.lane.b32.xlu0 %v1937_v35, %s1708_s24  ;;  %s1723_s24 = smov 18  }
  0x6b   : > { %281 = vrot.lane.b32.xlu1 %v1934_v33, %s1709_s12 }
  0x6d   : > { %283 = vrot.lane.b32.xlu0 %v1937_v35, %s1709_s12  ;;  %s1724_s12 = smov 17  }
  0x6f   : > { %302 = vrot.lane.b32.xlu1 %v1934_v33, %s1710_s18 }
  0x71   : > { %304 = vrot.lane.b32.xlu0 %v1937_v35, %s1710_s18  ;;  %s1725_s18 = smov 15  }
  0x73   : > { %323 = vrot.lane.b32.xlu1 %v1934_v33, %s1711_s21 }
  0x75   : > { %325 = vrot.lane.b32.xlu0 %v1937_v35, %s1711_s21  ;;  %s1726_s21 = smov 14  }
  0x77   : > { %341 = vrot.lane.b32.xlu1 %v1934_v33, %s1712_s22 }
  0x79   : > { %343 = vrot.lane.b32.xlu0 %v1937_v35, %s1712_s22  ;;  %s1727_s22 = smov 13  }
  0x7b   : > { %362 = vrot.lane.b32.xlu1 %v1934_v33, %s1713_s26 }
  0x7d   : > { %364 = vrot.lane.b32.xlu0 %v1937_v35, %s1713_s26  ;;  %s1728_s26 = smov 3  }
  0x7f   : > { %383 = vrot.lane.b32.xlu1 %v1934_v33, %s1714_s27 }
  0x81   : > { %385 = vrot.lane.b32.xlu0 %v1937_v35, %s1714_s27  ;;  %s1729_s27 = smov 2  }
  0x83   : > { %404 = vrot.lane.b32.xlu1 %v1934_v33, %s1715_s28 }
  0x85   : > { %406 = vrot.lane.b32.xlu0 %v1937_v35, %s1715_s28  ;;  %s1730_s28 = smov 1  }
  0x87   : > { %426 = vrot.lane.b32.xlu1 %v1934_v33, %s1716_s29 }
  0x89   : > { %428 = vrot.lane.b32.xlu0 %v1937_v35, %s1716_s29  ;;  %s1732_s29 = smov 126  }
  0x8b   : > { %446 = vrot.lane.b32.xlu1 %v1934_v33, %s1717_s30 }
  0x8f   : > { %466 = vrot.lane.b32.xlu1 %v1934_v33, %s1718_s4 }
  0x93   : > { %484 = vrot.lane.b32.xlu1 %v1934_v33, %s1719_s7 }
  0x97   : > { %504 = vrot.lane.b32.xlu1 %v1934_v33, %s1720_s8 }
  0x9b   : > { %524 = vrot.lane.b32.xlu1 %v1934_v33, %s1721_s9 }
  0x9f   : > { %544 = vrot.lane.b32.xlu1 %v1934_v33, %s1722_s13 }
  0xa3   : > { %566 = vrot.lane.b32.xlu1 %v1934_v33, %s1723_s24 }
  0xa7   : > { %586 = vrot.lane.b32.xlu1 %v1934_v33, %s1724_s12 }
  0xab   : > { %606 = vrot.lane.b32.xlu1 %v1934_v33, %s1707_s19 }
  0xaf   : > { %624 = vrot.lane.b32.xlu1 %v1934_v33, %s1725_s18 }
  0xb3   : > { %644 = vrot.lane.b32.xlu1 %v1934_v33, %s1726_s21 }
  0xb7   : > { %664 = vrot.lane.b32.xlu1 %v1934_v33, %s1727_s22 }
  0xbb   : > { %684 = vrot.lane.b32.xlu1 %v1934_v33, %s1728_s26 }
  0xbf   : > { %702 = vrot.lane.b32.xlu1 %v1934_v33, %s1729_s27 }
  0xc3   : > { %720 = vrot.lane.b32.xlu1 %v1934_v33, %s1730_s28 }
  0xcc   : > { %v244_v36 = vpop.permute.xlu0 %243 }
  0xcd   : > { %v1987_v37 = vsel %vm245_vm2, %v1930_v5, %v244_v36  ;;  %vm411_vm2 = vcmp.ge.s32.totalorder %v1930_v5, 32 }
  0xce   : > { %247 = vrot.lane.b32.xlu0 %v1987_v37, %s1718_s4 }
  0xd2   : > { %448 = vrot.lane.b32.xlu0 %v1937_v35, %s1717_s30  ;;  %s1733_s30 = smov 125  }
  0xd6   : > { %468 = vrot.lane.b32.xlu0 %v1937_v35, %s1718_s4  ;;  %s1734_s4 = smov 115  }
  0xd9   : > { %v259_v38 = vpop.permute.xlu1 %258 }
  0xda   : > { %486 = vrot.lane.b32.xlu0 %v1937_v35, %s1719_s7  ;;  %s1735_s7 = smov 114  }
  0xdb   : > { %v261_v39 = vpop.permute.xlu0 %260 }
  0xdc   : > { %v1998_v40 = vsel %vm262_vm3, %v259_v38, %v261_v39  ;;  %v2000_v41 = vsel %vm262_vm3, %v261_v39, %v259_v38  ;;  %v2230_v39 = vshrl.u32 %v240_v0, 7  ;;  %vm508_vm3 = vcmp.lt.s32.totalorder %v1930_v5, 30 }
  0xdd   : > { %v282_v42 = vpop.permute.xlu1 %281 }
  0xde   : > { %506 = vrot.lane.b32.xlu0 %v1937_v35, %s1720_s8  ;;  %s1736_s8 = smov 113   ;;  %vm3809_vm12 = vcmp.eq.s32.totalorder %v2230_v39, 0 }
  0xdf   : > { %v284_v43 = vpop.permute.xlu0 %283 }
  0xe0   : > { %v2005_v44 = vsel %vm285_vm4, %v282_v42, %v284_v43  ;;  %v2007_v45 = vsel %vm285_vm4, %v284_v43, %v282_v42  ;;  %vm528_vm4 = vcmp.lt.s32.totalorder %v1930_v5, 29 }
  0xe1   : > { %v303_v46 = vpop.permute.xlu1 %302 }
  0xe2   : > { %526 = vrot.lane.b32.xlu0 %v1937_v35, %s1721_s9  ;;  %s1737_s9 = smov 112  }
  0xe3   : > { %v305_v47 = vpop.permute.xlu0 %304 }
  0xe4   : > { %v2012_v48 = vsel %vm306_vm5, %v303_v46, %v305_v47  ;;  %v2014_v49 = vsel %vm306_vm5, %v305_v47, %v303_v46  ;;  %vm548_vm5 = vcmp.lt.s32.totalorder %v1930_v5, 19 }
  0xe5   : > { %v324_v50 = vpop.permute.xlu1 %323 }
  0xe6   : > { %546 = vrot.lane.b32.xlu0 %v1937_v35, %s1722_s13  ;;  %s1738_s13 = smov 111  }
  0xe7   : > { %v326_v51 = vpop.permute.xlu0 %325 }
  0xe8   : > { %v2019_v52 = vsel %vm327_vm6, %v324_v50, %v326_v51  ;;  %v2021_v53 = vsel %vm327_vm6, %v326_v51, %v324_v50  ;;  %vm570_vm6 = vcmp.lt.s32.totalorder %v1930_v5, 18 }
  0xe9   : > { %v342_v54 = vpop.permute.xlu1 %341 }
  0xea   : > { %568 = vrot.lane.b32.xlu0 %v1937_v35, %s1723_s24  ;;  %s1739_s24 = smov 110  }
  0xeb   : > { %v344_v55 = vpop.permute.xlu0 %343 }
  0xec   : > { %v2026_v56 = vsel %vm345_vm7, %v342_v54, %v344_v55  ;;  %v2028_v57 = vsel %vm345_vm7, %v344_v55, %v342_v54  ;;  %vm253_vm7 = vcmask 523264  }
  0xed   : > { %v363_v58 = vpop.permute.xlu1 %362 }
  0xee   : > { %588 = vrot.lane.b32.xlu0 %v1937_v35, %s1724_s12  ;;  %s1740_s12 = smov 109  }
  0xef   : > { %v365_v59 = vpop.permute.xlu0 %364 }
  0xf0   : > { %v2033_v60 = vsel %vm366_vm8, %v363_v58, %v365_v59  ;;  %v2035_v61 = vsel %vm366_vm8, %v365_v59, %v363_v58  ;;  %vm590_vm8 = vcmp.lt.s32.totalorder %v1930_v5, 17 }
  0xf1   : > { %v384_v62 = vpop.permute.xlu1 %383 }
  0xf2   : > { %608 = vrot.lane.b32.xlu0 %v1937_v35, %s1707_s19  ;;  %s1731_s19 = smov 127  }
  0xf3   : > { %v386_v63 = vpop.permute.xlu0 %385 }
  0xf4   : > { %v2040_v1 = vsel %vm387_vm9, %v384_v62, %v386_v63  ;;  %v2042_v2 = vsel %vm387_vm9, %v386_v63, %v384_v62  ;;  %vm610_vm9 = vcmp.lt.s32.totalorder %v1930_v5, 16 }
  0xf5   : > { %v405_v3 = vpop.permute.xlu1 %404 }
  0xf6   : > { %626 = vrot.lane.b32.xlu0 %v1937_v35, %s1725_s18  ;;  %s1741_s18 = smov 99  }
  0xf7   : > { %v407_v4 = vpop.permute.xlu0 %406 }
  0xf8   : > { %v2047_v6 = vsel %vm408_vm10, %v405_v3, %v407_v4  ;;  %v2049_v7 = vsel %vm408_vm10, %v407_v4, %v405_v3  ;;  %vm628_vm10 = vcmp.lt.s32.totalorder %v1930_v5, 15 }
  0xf9   : > { %v2121_v16 = vpop.permute.xlu1 %426 }
  0xfa   : > { %646 = vrot.lane.b32.xlu0 %v1937_v35, %s1726_s21  ;;  %s1742_s21 = smov 98  }
  0xfb   : > { %v2083_v8 = vpop.permute.xlu0 %428 }
  0xfd   : > { %v2131_v18 = vpop.permute.xlu1 %446 }
  0xfe   : > { %666 = vrot.lane.b32.xlu0 %v1937_v35, %s1727_s22  ;;  %s1743_s22 = smov 97  }
 0x101   : > { %v2141_v20 = vpop.permute.xlu1 %466 }
 0x102   : > { %686 = vrot.lane.b32.xlu0 %v1937_v35, %s1728_s26  ;;  %s1744_s26 = smov 64  }
 0x105   : > { %v2153_v23 = vpop.permute.xlu1 %484 }
 0x106   : > { %704 = vrot.lane.b32.xlu0 %v1937_v35, %s1729_s27  ;;  %s1745_s27 = smov 96  }
 0x109   : > { %v2163_v25 = vpop.permute.xlu1 %504 }
 0x10a   : > { %722 = vrot.lane.b32.xlu0 %v1937_v35, %s1730_s28  ;;  %s1746_s28 = smov 95  }
 0x10d   : > { %v2171_v27 = vpop.permute.xlu1 %524 }
 0x10e   : > { %749 = vrot.lane.b32.xlu0 %v1937_v35, %s1731_s19 }
 0x111   : > { %v2177_v29 = vpop.permute.xlu1 %544 }
 0x112   : > { %767 = vrot.lane.b32.xlu0 %v1937_v35, %s1732_s29 }
 0x115   : > { %v2185_v31 = vpop.permute.xlu1 %566 }
 0x116   : > { %785 = vrot.lane.b32.xlu0 %v1937_v35, %s1733_s30 }
 0x119   : > { %v2191_v34 = vpop.permute.xlu1 %586 }
 0x11a   : > { %803 = vrot.lane.b32.xlu0 %v1937_v35, %s1734_s4 }
 0x11d   : > { %v2215_v38 = vpop.permute.xlu1 %606 }
 0x11e   : > { %825 = vrot.lane.b32.xlu0 %v1937_v35, %s1735_s7 }
 0x121   : > { %v2244_v43 = vpop.permute.xlu1 %624 }
 0x122   : > { %845 = vrot.lane.b32.xlu0 %v1937_v35, %s1736_s8 }
 0x126   : > { %865 = vrot.lane.b32.xlu0 %v1937_v35, %s1737_s9 }
 0x12a   : > { %883 = vrot.lane.b32.xlu0 %v1937_v35, %s1738_s13 }
 0x12e   : > { %903 = vrot.lane.b32.xlu0 %v1937_v35, %s1739_s24 }
 0x132   : > { %923 = vrot.lane.b32.xlu0 %v1937_v35, %s1740_s12 }
 0x136   : > { %943 = vrot.lane.b32.xlu0 %v1937_v35, %s1741_s18 }
 0x13a   : > { %965 = vrot.lane.b32.xlu0 %v1937_v35, %s1742_s21 }
 0x13e   : > { %985 = vrot.lane.b32.xlu0 %v1937_v35, %s1743_s22 }
 0x140   : > { %v248_v9 = vpop.permute.xlu0 %247 }
 0x141   : > { %v2090_v10 = vsel %vm249_vm11, %v1987_v37, %v248_v9 }
 0x142   : > { %251 = vrot.lane.b32.xlu1 %v2090_v10, %s1744_s26  ;;  %1005 = vrot.lane.b32.xlu0 %v1937_v35, %s1745_s27  ;;  %s1748_s26 = smov 93  }
 0x144   : > { %v2095_v11 = vpop.permute.xlu0 %448 }
 0x146   : > { %747 = vrot.lane.b32.xlu1 %v1934_v33, %s1731_s19  ;;  %1023 = vrot.lane.b32.xlu0 %v1937_v35, %s1746_s28  ;;  %s1749_s19 = smov 83  }
 0x148   : > { %v2101_v12 = vpop.permute.xlu0 %468 }
 0x14a   : > { %765 = vrot.lane.b32.xlu1 %v1934_v33, %s1732_s29  ;;  %1043 = vrot.lane.b32.xlu0 %v1937_v35, %s1747_s11  ;;  %s1750_s29 = smov 82  }
 0x14c   : > { %v2107_v13 = vpop.permute.xlu0 %486 }
 0x14e   : > { %783 = vrot.lane.b32.xlu1 %v1934_v33, %s1733_s30  ;;  %1063 = vrot.lane.b32.xlu0 %v1937_v35, %s1748_s26  ;;  %s3780_s30 = smov 81  }
 0x150   : > { %v2113_v14 = vpop.permute.xlu0 %506 }
 0x152   : > { %801 = vrot.lane.b32.xlu1 %v1934_v33, %s1734_s4  ;;  %1083 = vrot.lane.b32.xlu0 %v1937_v35, %s1749_s19  ;;  %s3779_s4 = smov 80  }
 0x154   : > { %v2119_v15 = vpop.permute.xlu0 %526 }
 0x156   : > { %823 = vrot.lane.b32.xlu1 %v1934_v33, %s1735_s7  ;;  %1105 = vrot.lane.b32.xlu0 %v1937_v35, %s1750_s29  ;;  %s3778_s7 = smov 79  }
 0x158   : > { %v2127_v17 = vpop.permute.xlu0 %546 }
 0x15a   : > { %843 = vrot.lane.b32.xlu1 %v1934_v33, %s1736_s8  ;;  %1125 = vrot.lane.b32.xlu0 %v1937_v35, %s3780_s30  ;;  %s3777_s8 = smov 78   ;;  %s2234_s30 = sld [smem:[#allocation7 + $0x38]] }
 0x15c   : > { %v2135_v19 = vpop.permute.xlu0 %568 }
 0x15e   : > { %863 = vrot.lane.b32.xlu1 %v1934_v33, %s1737_s9  ;;  %1145 = vrot.lane.b32.xlu0 %v1937_v35, %s3779_s4  ;;  %s3776_s9 = smov 77   ;;  %s2227_s4 = sld [smem:[#allocation7 + $0x37]] }
 0x160   : > { %v2143_v21 = vpop.permute.xlu0 %588 }
 0x162   : > { %881 = vrot.lane.b32.xlu1 %v1934_v33, %s1738_s13  ;;  %1163 = vrot.lane.b32.xlu0 %v1937_v35, %s3778_s7  ;;  %s2197_s13 = sld [smem:[#allocation7]]  ;;  %s2225_s7 = sld [smem:[#allocation7 + $0x6]] }
 0x164   : > { %v2149_v22 = vpop.permute.xlu0 %608 }
 0x166   : > { %901 = vrot.lane.b32.xlu1 %v1934_v33, %s1739_s24  ;;  %1183 = vrot.lane.b32.xlu0 %v1937_v35, %s3777_s8  ;;  %s2199_s24 = sld [smem:[#allocation7 + $0x31]]  ;;  %s2223_s8 = sld [smem:[#allocation7 + $0x36]] }
 0x168   : > { %v2157_v24 = vpop.permute.xlu0 %626  ;;  %v272_v47 = vstv %s2197_s13  ;;  %s2271_s13 = sld [smem:[#allocation7 + $0x3b]] }
 0x16a   : > { %921 = vrot.lane.b32.xlu1 %v1934_v33, %s1740_s12  ;;  %1203 = vrot.lane.b32.xlu0 %v1937_v35, %s3776_s9  ;;  %s2201_s12 = sld [smem:[#allocation7 + $0x1]]  ;;  %s2221_s9 = sld [smem:[#allocation7 + $0x5]]  ;;  %v438_v35 = vstv %s2242_s1 }
 0x16b   : > { %s2313_s1 = sld [smem:[#allocation7 + $0x3f]] }
 0x16c   : > { %v2165_v26 = vpop.permute.xlu0 %646  ;;  %v273_v50 = vstv %s2199_s24  ;;  %v375_v9 = vstv %s2223_s8  ;;  %s2276_s24 = sld [smem:[#allocation7 + $0xb]]  ;;  %s2302_s8 = sld [smem:[#allocation7 + $0x3e]] }
 0x16d   : > { %3833 = vst [vmem:[#allocation19_spill] sm:$0xff] %v2165_v26 }
 0x16e   : > { %941 = vrot.lane.b32.xlu1 %v1934_v33, %s1741_s18  ;;  %s2203_s18 = sld [smem:[#allocation7 + $0x32]] }
 0x170   : > { %v2173_v28 = vpop.permute.xlu0 %666  ;;  %v293_v51 = vstv %s2201_s12  ;;  %v374_v4 = vstv %s2221_s9  ;;  %s2278_s12 = sld [smem:[#allocation7 + $0x3c]]  ;;  %s2326_s9 = sld [smem:[#allocation7 + $0xf]] }
 0x171   : > { %3834 = vst [vmem:[#allocation20_spill] sm:$0xff] %v2173_v28 }
 0x172   : > { %963 = vrot.lane.b32.xlu1 %v1934_v33, %s1742_s21  ;;  %s2207_s21 = sld [smem:[#allocation7 + $0x3]] }
 0x174   : > { %v2179_v30 = vpop.permute.xlu0 %686  ;;  %v294_v54 = vstv %s2203_s18  ;;  %s3842_s18 = smov 80  }
 0x175   : > { %3835 = vst [vmem:[#allocation21_spill] sm:$0xff] %v2179_v30  ;;  %v437_v30 = vstv %s2240_s0  ;;  %s2311_s0 = sld [smem:[#allocation7 + $0xe]] }
 0x176   : > { %983 = vrot.lane.b32.xlu1 %v1934_v33, %s1743_s22  ;;  %s2209_s22 = sld [smem:[#allocation7 + $0x2]] }
 0x178   : > { %v2187_v32 = vpop.permute.xlu0 %704  ;;  %v332_v0 = vstv %s2207_s21  ;;  %s2261_s21 = sld [smem:[#allocation7 + $0x3a]] }
 0x179   : > { %3836 = vst [vmem:[#allocation22_spill] sm:$0xff] %v2187_v32  ;;  %v295_v32 = vsel %vm3809_vm12, %v293_v51, %v294_v54 }
 0x17a   : > { %1003 = vrot.lane.b32.xlu1 %v1934_v33, %s1745_s27  ;;  %s2211_s27 = sld [smem:[#allocation7 + $0x33]] }
 0x17c   : > { %v2193_v36 = vpop.permute.xlu0 %722  ;;  %v314_v55 = vstv %s2209_s22  ;;  %s3844_s22 = smov 79  }
 0x17d   : > { %3837 = vst [vmem:[#allocation23_spill] sm:$0xff] %v2193_v36 }
 0x17e   : > { %1021 = vrot.lane.b32.xlu1 %v1934_v33, %s1746_s28  ;;  %s2217_s28 = sld [smem:[#allocation7 + $0x4]] }
 0x180   : > { %v2205_v37 = vpop.permute.xlu0 %749  ;;  %v315_v58 = vstv %s2211_s27  ;;  %s2346_s27 = sld [smem:[#allocation7 + $0x10]] }
 0x181   : > { %3838 = vst [vmem:[#allocation24_spill] sm:$0xff] %v2205_v37  ;;  %v396_v37 = vstv %s2227_s4  ;;  %s2290_s4 = sld [smem:[#allocation7 + $0xc]]  ;;  %v316_v28 = vsel %vm3809_vm12, %v314_v55, %v315_v58  ;;  %v2322_v55 = vmul.f32 %v295_v32, %v2007_v45  ;;  %v496_v58 = vstv %s2278_s12  ;;  %s2446_s12 = sld [smem:[#allocation7 + $0x17]] }
 0x182   : > { %1041 = vrot.lane.b32.xlu1 %v1934_v33, %s1747_s11  ;;  %s1372_s11 = sld [smem:[#allocation7 + $0x34]]  ;;  %v2341_v45 = vmul.f32 %v316_v28, %v2012_v48 }
 0x184   : > { %v2238_v42 = vpop.permute.xlu0 %767  ;;  %v353_v62 = vstv %s2217_s28  ;;  %s2348_s28 = sld [smem:[#allocation7 + $0x41]] }
 0x185   : > { %3839 = vst [vmem:[#allocation25_spill] sm:$0xff] %v2238_v42  ;;  %v395_v42 = vstv %s2225_s7  ;;  %s2300_s7 = sld [smem:[#allocation7 + $0xd]] }
 0x186   : > { %1061 = vrot.lane.b32.xlu1 %v1934_v33, %s1748_s26  ;;  %s2219_s26 = sld [smem:[#allocation7 + $0x35]] }
 0x188   : > { %v333_v46 = vstv %s1372_s11  ;;  %v2263_v63 = vpop.permute.xlu0 %785  ;;  %s2328_s11 = sld [smem:[#allocation7 + $0x40]] }
 0x189   : > { %v334_v59 = vsel %vm3809_vm12, %v332_v0, %v333_v46  ;;  %3841 = vst [vmem:[#allocation26_spill] sm:$0xff] %v2263_v63  ;;  %v418_v0 = vstv %s2234_s30  ;;  %v2282_v46 = vpop.permute.xlu1 %644  ;;  %v274_v63 = vsel %vm3809_vm12, %v272_v47, %v273_v50  ;;  %s2292_s30 = sld [smem:[#allocation7 + $0x3d]]  ;;  %v376_v47 = vsel %vm3809_vm12, %v374_v4, %v375_v9 }
 0x18a   : > { %1081 = vrot.lane.b32.xlu1 %v1934_v33, %s1749_s19  ;;  %s2232_s19 = sld [smem:[#allocation7 + $0x7]]  ;;  %3843 = vst [vmem:[#allocation27_spill] sm:$0xff] %v2282_v46  ;;  %v335_v26 = vmul.f32 %v334_v59, %v2021_v53  ;;  %v397_v50 = vsel %vm3809_vm12, %v395_v42, %v396_v37  ;;  %v2316_v53 = vmul.f32 %v274_v63, %v2000_v41 }
 0x18b   : > { %v2319_v54 = vmul.f32 %v274_v63, %v1998_v40  ;;  %v2335_v37 = vmul.f32 %v295_v32, %v2005_v44  ;;  %v2338_v40 = vmul.f32 %v316_v28, %v2014_v49  ;;  %v458_v49 = vstv %s2261_s21  ;;  %s2380_s21 = sld [smem:[#allocation7 + $0x43]] }
 0x18c   : > { %v354_v3 = vstv %s2219_s26  ;;  %v2332_v41 = vpop.permute.xlu0 %803  ;;  %s2359_s26 = sld [smem:[#allocation7 + $0x11]]  ;;  %v2369_v28 = vmul.f32 %v376_v47, %v2035_v61  ;;  %v2386_v61 = vmul.f32 %v397_v50, %v2040_v1  ;;  %v431_v42 = vsel %vm430_vm14, %v2121_v16, %v2083_v8 }
 0x18d   : > { %v355_v46 = vsel %vm3809_vm12, %v353_v62, %v354_v3  ;;  %3845 = vst [vmem:[#allocation28_spill] sm:$0xff] %v2332_v41  ;;  %v2363_v48 = vpop.permute.xlu1 %664  ;;  %v515_v63 = vstv %s2290_s4  ;;  %v535_v4 = vstv %s2300_s7  ;;  %s2448_s4 = sld [smem:[#allocation7 + $0x48]]  ;;  %s2465_s7 = sld [smem:[#allocation7 + $0x4a]] }
 0x18e   : > { %1103 = vrot.lane.b32.xlu1 %v1934_v33, %s1750_s29  ;;  %s2259_s29 = sld [smem:[#allocation7 + $0x9]]  ;;  %v2355_v44 = vmul.f32 %v355_v46, %v2028_v57  ;;  %3846 = vst [vmem:[#allocation29_spill] sm:$0xff] %v2363_v48  ;;  %v432_v57 = vsel %vm430_vm14, %v2083_v8, %v2121_v16  ;;  %v476_v8 = vstv %s2271_s13  ;;  %s2433_s13 = sld [smem:[#allocation7 + $0x47]]  ;;  %v452_v48 = vsel %vm450_vm15, %v2095_v11, %v2131_v18 }
 0x18f   : > { %v516_v3 = vstv %s2292_s30  ;;  %s2463_s30 = sld [smem:[#allocation7 + $0x19]] }
 0x190   : > { %v417_v36 = vstv %s2232_s19  ;;  %s2361_s19 = sld [smem:[#allocation7 + $0x42]] }
 0x191   : > { %v419_v51 = vsel %vm3809_vm12, %v417_v36, %v418_v0  ;;  %v439_v36 = vsel %vm3809_vm12, %v437_v30, %v438_v35  ;;  %v2344_v35 = vmul.f32 %v334_v59, %v2019_v52  ;;  %v2352_v30 = vsel %vm265_vm13, %v335_v26, 0.0  ;;  %v2424_v59 = vpop.permute.xlu0 %825 }
 0x192   : > { %1123 = vrot.lane.b32.xlu1 %v1934_v33, %s3840_s5  ;;  %s2269_s5 = sld [smem:[#allocation7 + $0xa]]  ;;  %v2366_v52 = vmul.f32 %v355_v46, %v2026_v56  ;;  %v2372_v26 = vmul.f32 %v376_v47, %v2033_v60  ;;  %v2383_v56 = vmul.f32 %v397_v50, %v2042_v2  ;;  %v2389_v60 = vmul.f32 %v419_v51, %v2049_v7  ;;  %v2444_v50 = vpop.permute.xlu1 %684 }
 0x193   : > { %v2402_v1 = vmul.f32 %v419_v51, %v2047_v6  ;;  %v2415_v16 = vmul.f32 %v439_v36, %v432_v57  ;;  %v495_v6 = vstv %s2276_s24  ;;  %3849 = vst [vmem:[#allocation31_spill] sm:$0xff] %v2424_v59  ;;  %v2426_v62 = vmul.f32 %v439_v36, %v431_v42  ;;  %s3851_s24 = smov 77   ;;  %3852 = vst [vmem:[#allocation33_spill] sm:$0xff] %v2444_v50 }
 0x194   : > { %v457_v32 = vstv %s2259_s29  ;;  %s2378_s29 = sld [smem:[#allocation7 + $0x12]]  ;;  %v536_v0 = vstv %s2302_s8  ;;  %v557_v46 = vstv %s2311_s0  ;;  %v558_v47 = vstv %s2313_s1  ;;  %s2486_s0 = sld [smem:[#allocation7 + $0x4b]] }
 0x195   : > { %v2407_v2 = vsel %vm3809_vm12, %v457_v32, %v458_v49  ;;  %3848 = vst [vmem:[#allocation30_spill] sm:$0xff] %v2415_v16  ;;  %3850 = vst [vmem:[#allocation32_spill] sm:$0xff] %v2426_v62  ;;  %v2453_v51 = vsel %vm3809_vm12, %v495_v6, %v496_v58  ;;  %v577_v36 = vstv %s2326_s9  ;;  %v578_v32 = vstv %s2328_s11  ;;  %s2484_s8 = sld [smem:[#allocation7 + $0x1a]]  ;;  %s2515_s1 = sld [smem:[#allocation7 + $0x4c]] }
 0x196   : > { %1143 = vrot.lane.b32.xlu1 %v1934_v33, %s3842_s18  ;;  %s3847_s18 = smov 78   ;;  %v597_v49 = vstv %s2346_s27  ;;  %v598_v57 = vstv %s2348_s28  ;;  %v615_v42 = vstv %s2359_s26  ;;  %v2474_v6 = vsel %vm3809_vm12, %v535_v4, %v536_v0  ;;  %s2563_s9 = sld [smem:[#allocation7 + $0x4e]] }
 0x197   : > { %v2478_v58 = vsel %vm3809_vm12, %v557_v46, %v558_v47  ;;  %v636_v41 = vstv %s2380_s21  ;;  %v2497_v4 = vsel %vm3809_vm12, %v597_v49, %v598_v57  ;;  %v675_v46 = vstv %s2411_s15  ;;  %s2538_s15 = sld [smem:[#allocation7 + $0x1c]]  ;;  %s2619_s11 = sld [smem:[#allocation7 + $0x1e]] }
 0x198   : > { %v475_v7 = vstv %s2269_s5  ;;  %s2431_s5 = sld [smem:[#allocation7 + $0x16]]  ;;  %v472_v47 = vsel %vm470_vm0, %v2101_v12, %v2141_v20  ;;  %v693_v16 = vstv %s2420_s25  ;;  %v757_v62 = vstv %s2465_s7  ;;  %s2561_s25 = sld [smem:[#allocation7 + $0x1d]] }
 0x199   : > { %v2437_v9 = vsel %vm3809_vm12, %v475_v7, %v476_v8  ;;  %v616_v7 = vstv %s2361_s19  ;;  %v2469_v8 = vsel %vm3809_vm12, %v515_v63, %v516_v3  ;;  %v2488_v63 = vpop.permute.xlu0 %845  ;;  %v2493_v3 = vsel %vm3809_vm12, %v577_v36, %v578_v32  ;;  %v2511_v32 = vpop.permute.xlu1 %702  ;;  %s2621_s27 = sld [smem:[#allocation7 + $0x4f]]  ;;  %s2674_s26 = sld [smem:[#allocation7 + $0x50]] }
 0x19a   : > { %1161 = vrot.lane.b32.xlu1 %v1934_v33, %s3844_s22  ;;  %s2397_s22 = sld [smem:[#allocation7 + $0x13]]  ;;  %v635_v59 = vstv %s2378_s29  ;;  %3853 = vst [vmem:[#allocation34_spill] sm:$0xff] %v2488_v63  ;;  %v2501_v0 = vsel %vm3809_vm12, %v615_v42, %v616_v7  ;;  %v694_v36 = vstv %s2422_s17  ;;  %3854 = vst [vmem:[#allocation35_spill] sm:$0xff] %v2511_v32  ;;  %v712_v7 = vstv %s2433_s13  ;;  %s2540_s17 = sld [smem:[#allocation7 + $0x4d]] }
 0x19b   : > { %v2520_v49 = vsel %vm3809_vm12, %v635_v59, %v636_v41  ;;  %v451_v32 = vsel %vm450_vm15, %v2131_v18, %v2095_v11  ;;  %v729_v41 = vstv %s2446_s12  ;;  %v730_v59 = vstv %s2448_s4  ;;  %s2672_s28 = sld [smem:[#allocation7 + $0x1f]]  ;;  %s2730_s19 = sld [smem:[#allocation7 + $0x20]] }
 0x19c   : > { %v471_v11 = vsel %vm470_vm0, %v2141_v20, %v2101_v12  ;;  %v2575_v12 = vsel %vm3809_vm12, %v729_v41, %v730_v59  ;;  %v2578_v20 = vadd.s32 128, %v1930_v5  ;;  %v509_v59 = vsel %vm508_vm3, %v2163_v25, %v2113_v14  ;;  %s2746_s29 = sld [smem:[#allocation7 + $0x51]]  ;;  %s2763_s21 = sld [smem:[#allocation7 + $0x18]] }
 0x19d   : > { %vm551_vm0 = vcmp.ge.s32.totalorder %v1930_v5, 16  ;;  %s2879_s13 = sld [smem:[#allocation7 + $0x22]]  ;;  %s2916_s12 = sld [smem:[#allocation7 + $0x23]] }
 0x19e   : > { %1181 = vrot.lane.b32.xlu1 %v1934_v33, %s3847_s18  ;;  %s2413_s18 = sld [smem:[#allocation7 + $0x45]]  ;;  %v711_v42 = vstv %s2431_s5  ;;  %s2827_s5 = sld [smem:[#allocation7 + $0x52]] }
 0x19f   : > { %v2557_v18 = vsel %vm3809_vm12, %v711_v42, %v712_v7  ;;  %v775_v42 = vstv %s2486_s0  ;;  %v2593_v7 = vmul.f32 %v2437_v9, %v471_v11  ;;  %v793_v11 = vstv %s2515_s1  ;;  %s2918_s4 = sld [smem:[#allocation7 + $0x54]]  ;;  %s2992_s7 = sld [smem:[#allocation7 + $0x55]] }
 0x1a0   : > { %v655_v50 = vstv %s2397_s22  ;;  %s2765_s22 = sld [smem:[#allocation7 + $0x49]]  ;;  %s3015_s0 = sld [smem:[#allocation7 + $0x56]] }
 0x1a1   : > { %s3027_s1 = sld [smem:[#allocation7 + $0x57]] }
 0x1a2   : > { %1201 = vrot.lane.b32.xlu1 %v1934_v33, %s3851_s24  ;;  %v656_v33 = vstv %s2399_s16  ;;  %s2513_s16 = sld [smem:[#allocation7 + $0x1b]] }
 0x1a3   : > { %v2524_v57 = vsel %vm3809_vm12, %v655_v50, %v656_v33  ;;  %v478_v33 = vmul.f32 %v2437_v9, %v472_v47  ;;  %v756_v47 = vstv %s2463_s30  ;;  %v530_v9 = vsel %vm528_vm4, %v2119_v15, %v2171_v27  ;;  %s2881_s24 = sld [smem:[#allocation7 + $0x53]]  ;;  %s2990_s30 = sld [smem:[#allocation7 + $0x24]] }
 0x1a4   : > { %v676_v63 = vstv %s2413_s18  ;;  %3855 = vst [vmem:[#allocation36_spill] sm:$0xff] %v2524_v57  ;;  %v2549_v57 = vsel %vm3809_vm12, %v693_v16, %v694_v36  ;;  %v2565_v16 = vpop.permute.xlu0 %865  ;;  %v489_v36 = vsel %vm488_vm1, %v2153_v23, %v2107_v13  ;;  %s2809_s18 = sld [smem:[#allocation7 + $0x21]] }
 0x1a5   : > { %v2545_v50 = vsel %vm3809_vm12, %v675_v46, %v676_v63  ;;  %3856 = vst [vmem:[#allocation37_spill] sm:$0xff] %v2565_v16  ;;  %v2568_v63 = vmul.f32 %v2407_v2, %v452_v48  ;;  %v2571_v46 = vmul.f32 %v2407_v2, %v451_v32  ;;  %v490_v48 = vsel %vm488_vm1, %v2107_v13, %v2153_v23  ;;  %v2588_v2 = vpop.permute.xlu1 %720 }
 0x1a6   : > { %v774_v32 = vstv %s2484_s8  ;;  %v2597_v41 = vsel %vm411_vm2, %v478_v33, 0.0  ;;  %v2606_v13 = vsel %vm3809_vm12, %v756_v47, %v757_v62  ;;  %v510_v23 = vsel %vm508_vm3, %v2113_v14, %v2163_v25  ;;  %s3013_s8 = sld [smem:[#allocation7 + $0x25]] }
 0x1a7   : > { %3857 = vst [vmem:[#allocation38_spill] sm:$0xff] %v2606_v13  ;;  %v2624_v62 = vmul.f32 %v2453_v51, %v490_v48  ;;  %v2627_v47 = vmul.f32 %v2453_v51, %v489_v36  ;;  %v529_v14 = vsel %vm528_vm4, %v2171_v27, %v2119_v15  ;;  %v2635_v25 = vsel %vm3809_vm12, %v774_v32, %v775_v42 }
 0x1a8   : > { %v792_v33 = vstv %s2513_s16  ;;  %3858 = vst [vmem:[#allocation39_spill] sm:$0xff] %v2635_v25  ;;  %v549_v48 = vsel %vm548_vm5, %v2177_v29, %v2127_v17  ;;  %v550_v51 = vsel %vm548_vm5, %v2127_v17, %v2177_v29  ;;  %v814_v36 = vstv %s2538_s15  ;;  %v2647_v13 = vpop.permute.xlu0 %883  ;;  %s3025_s16 = sld [smem:[#allocation7 + $0x26]]  ;;  %s3045_s15 = sld [smem:[#allocation7 + $0x27]] }
 0x1a9   : > { %v815_v16 = vstv %s2540_s17  ;;  %v2650_v15 = vmul.f32 %v2469_v8, %v510_v23  ;;  %v2653_v27 = vmul.f32 %v2469_v8, %v509_v59  ;;  %v2656_v32 = vmul.f32 %v2474_v6, %v530_v9  ;;  %s3047_s17 = sld [smem:[#allocation7 + $0x58]] }
 0x1aa   : > { %v2660_v42 = vsel %vm3809_vm12, %v792_v33, %v793_v11  ;;  %v2663_v25 = vmul.f32 %v2474_v6, %v529_v14  ;;  %v572_v17 = vsel %vm570_vm6, %v2135_v19, %v2185_v31  ;;  %v834_v8 = vstv %s2561_s25  ;;  %s3093_s25 = sld [smem:[#allocation7 + $0x28]] }
 0x1ab   : > { %v835_v59 = vstv %s2563_s9  ;;  %v2677_v23 = vmul.f32 %v2478_v58, %v550_v51  ;;  %v2680_v6 = vmul.f32 %v2478_v58, %v549_v48  ;;  %v2688_v33 = vsel %vm3809_vm12, %v814_v36, %v815_v16  ;;  %s3095_s9 = sld [smem:[#allocation7 + $0x59]] }
 0x1ac   : > { %v571_v11 = vsel %vm570_vm6, %v2185_v31, %v2135_v19  ;;  %v2717_v16 = vsel %vm3809_vm12, %v834_v8, %v835_v59  ;;  %v854_v51 = vstv %s2619_s11  ;;  %v855_v36 = vstv %s2621_s27  ;;  %s3113_s11 = sld [smem:[#allocation7 + $0x29]]  ;;  %s3115_s27 = sld [smem:[#allocation7 + $0x5a]] }
 0x1ad   : > { %vm648_vm6 = vcmp.lt.s32.totalorder %v1930_v5, 14 }
 0x1b4   : > { %v252_v29 = vpop.permute.xlu1 %251 }
 0x1b5   : > { %v2684_v9 = vsel %vm253_vm7, %v2090_v10, %v252_v29  ;;  %v2698_v10 = vmul.f32 %v2493_v3, %v572_v17  ;;  %v2735_v17 = vmul.f32 %v2493_v3, %v571_v11  ;;  %v591_v3 = vsel %vm590_vm8, %v2191_v34, %v2143_v21 }
 0x1b6   : > { %vm267_vm11 = vcmp.ge.s32.totalorder %v2684_v9, 3  ;;  %vm288_vm14 = vcmp.ge.s32.totalorder %v2684_v9, 2  ;;  %vm309_vm15 = vcmp.ge.s32.totalorder %v2684_v9, 1  ;;  %vm348_vm4 = vcmp.lt.s32.totalorder %v2684_v9, 15 }
 0x1b7   : > { %vm2705_vm1 = vmand %vm265_vm13, %vm267_vm11  ;;  %v278_v19 = vsel %vm267_vm11, %v2319_v54, 0.0  ;;  %v299_v31 = vsel %vm288_vm14, %v2335_v37, 0.0  ;;  %v2732_v37 = vpop.permute.xlu0 %903  ;;  %vm369_vm7 = vcmp.lt.s32.totalorder %v2684_v9, 14 }
 0x1b8   : > { %v2719_v14 = vpop.permute.xlu1 %747  ;;  %v277_v48 = vsel %vm2705_vm1, %v2316_v53, 0.0  ;;  %vm289_vm3 = vmand %vm265_vm13, %vm288_vm14  ;;  %v301_v54 = vadd.f32 %v299_v31, %v278_v19  ;;  %v320_v53 = vsel %vm309_vm15, %v2341_v45, 0.0  ;;  %v612_v45 = vsel %vm610_vm9, %v2149_v22, %v2215_v38 }
 0x1b9   : > { %v298_v29 = vsel %vm289_vm3, %v2322_v55, 0.0  ;;  %vm310_vm5 = vmand %vm265_vm13, %vm309_vm15  ;;  %v592_v55 = vsel %vm590_vm8, %v2143_v21, %v2191_v34  ;;  %v2769_v21 = vsel %vm3809_vm12, %v854_v51, %v855_v36  ;;  %vm668_vm8 = vcmp.lt.s32.totalorder %v1930_v5, 13 }
 0x1ba   : > { %v300_v8 = vadd.f32 %v298_v29, %v277_v48  ;;  %v322_v59 = vadd.f32 %v320_v53, %v301_v54  ;;  %v319_v11 = vsel %vm310_vm5, %v2338_v40, 0.0  ;;  %vm2777_vm1 = vmand %vm265_vm13, %vm348_vm4  ;;  %v872_v31 = vstv %s2672_s28  ;;  %s3125_s28 = sld [smem:[#allocation7 + $0x2a]] }
 0x1bb   : > { %v873_v48 = vstv %s2674_s26  ;;  %v2786_v54 = vmul.f32 %v2497_v4, %v592_v55  ;;  %vm3810_vm3 = vcmp.lt.s32.totalorder %v2684_v9, 13  ;;  %v359_v51 = vsel %vm348_vm4, %v2366_v52, 0.0  ;;  %vm2805_vm5 = vmand %vm265_vm13, %vm369_vm7  ;;  %s3127_s26 = sld [smem:[#allocation7 + $0x5b]] }
 0x1bc   : > { %v321_v34 = vadd.f32 %v319_v11, %v300_v8  ;;  %v340_v58 = vadd.f32 %v2344_v35, %v322_v59  ;;  %v2781_v40 = vpop.permute.xlu1 %765  ;;  %v611_v35 = vsel %vm610_vm9, %v2215_v38, %v2149_v22  ;;  %v2797_v36 = vmul.f32 %v2497_v4, %v591_v3  ;;  %v2811_v38 = vpop.permute.xlu0 %923  ;;  %vm2840_vm9 = vmand %vm265_vm13, %vm3810_vm3 }
 0x1bd   : > { %v618_v29 = vmul.f32 %v2501_v0, %v612_v45  ;;  %3865 = vst [vmem:[#allocation40_spill] sm:$0xff] %v2811_v38  ;;  %v358_v52 = vsel %vm2777_vm1, %v2355_v44, 0.0  ;;  %v380_v4 = vsel %vm369_vm7, %v2372_v26, 0.0  ;;  %v2825_v3 = vsel %vm3809_vm12, %v872_v31, %v873_v48  ;;  %vm2866_vm13 = vmand %vm411_vm2, %vm267_vm11  ;;  %v3875_v26 = vld [vmem:[#allocation32_spill] sm:$0xff] }
 0x1be   : > { %v339_v53 = vadd.f32 %v2352_v30, %v321_v34  ;;  %v361_v55 = vadd.f32 %v359_v51, %v340_v58  ;;  %v630_v30 = vsel %vm628_vm10, %v2157_v24, %v2244_v43  ;;  %v2830_v8 = vmul.f32 %v2501_v0, %v611_v35 }
 0x1bf   : > { %v629_v59 = vsel %vm628_vm10, %v2244_v43, %v2157_v24  ;;  %vm688_vm1 = vcmp.lt.s32.totalorder %v1930_v5, 3  ;;  %v379_v24 = vsel %vm2805_vm5, %v2369_v28, 0.0  ;;  %v401_v43 = vsel %vm3810_vm3, %v2386_v61, 0.0  ;;  %vm2890_vm5 = vmand %vm411_vm2, %vm288_vm14  ;;  %v3879_v28 = vld [vmem:[#allocation20_spill] sm:$0xff] }
 0x1c0   : > { %v360_v45 = vadd.f32 %v358_v52, %v339_v53  ;;  %v382_v44 = vadd.f32 %v380_v4, %v361_v55  ;;  %v2844_v11 = vpop.permute.xlu1 %783  ;;  %v892_v0 = vstv %s2730_s19  ;;  %v893_v34 = vstv %s2746_s29  ;;  %v2900_v52 = vpop.permute.xlu0 %943  ;;  %v3874_v4 = vld [vmem:[#allocation27_spill] sm:$0xff]  ;;  %s3141_s19 = sld [smem:[#allocation7 + $0x2b]]  ;;  %s3143_s29 = sld [smem:[#allocation7 + $0x5c]] }
 0x1c1   : > { %v2857_v58 = vsel %vm551_vm0, %v618_v29, 0.0  ;;  %v2860_v19 = vmul.f32 %v2520_v49, %v630_v30  ;;  %vm706_vm10 = vcmp.lt.s32.totalorder %v1930_v5, 2  ;;  %v400_v61 = vsel %vm2840_vm9, %v2383_v56, 0.0  ;;  %3872 = vst [vmem:[#allocation41_spill] sm:$0xff] %v2900_v52  ;;  %vm2924_vm9 = vmand %vm411_vm2, %vm309_vm15  ;;  %v3883_v52 = vld [vmem:[#allocation18_spill] sm:$0xff] }
 0x1c2   : > { %v381_v31 = vadd.f32 %v379_v24, %v360_v45  ;;  %v403_v48 = vadd.f32 %v401_v43, %v382_v44  ;;  %v423_v35 = vsel %vm267_vm11, %v2402_v1, 0.0  ;;  %v740_v51 = vstv %s2763_s21  ;;  %s3154_s21 = sld [smem:[#allocation7 + $0x2c]] }
 0x1c3   : > { %v741_v29 = vstv %s2765_s22  ;;  %v2884_v53 = vmul.f32 %v2520_v49, %v629_v59  ;;  %v2898_v30 = vsel %vm3809_vm12, %v892_v0, %v893_v34  ;;  %v3873_v49 = vld [vmem:[#allocation19_spill] sm:$0xff]  ;;  %v422_v44 = vsel %vm2866_vm13, %v2389_v60, 0.0  ;;  %vm3007_vm13 = vmand %vm411_vm2, %vm369_vm7  ;;  %s3156_s22 = sld [smem:[#allocation7 + $0x5d]] }
 0x1c4   : > { %v402_v55 = vadd.f32 %v400_v61, %v381_v31  ;;  %v425_v22 = vadd.f32 %v423_v35, %v403_v48  ;;  %v2894_v1 = vpop.permute.xlu1 %801  ;;  %v649_v59 = vsel %vm648_vm6, %v3874_v4, %v3873_v49  ;;  %v650_v45 = vsel %vm648_vm6, %v3873_v49, %v3874_v4  ;;  %v3878_v48 = vld [vmem:[#allocation29_spill] sm:$0xff]  ;;  %v3880_v35 = vld [vmem:[#allocation30_spill] sm:$0xff]  ;;  %v3881_v4 = vld [vmem:[#allocation36_spill] sm:$0xff] }
 0x1c5   : > { %v443_v24 = vsel %vm288_vm14, %v3875_v26, 0.0  ;;  %v742_v60 = vsel %vm3809_vm12, %v740_v51, %v741_v29  ;;  %v912_v31 = vstv %s2809_s18  ;;  %v670_v61 = vsel %vm668_vm8, %v3879_v28, %v3878_v48  ;;  %s3205_s18 = sld [smem:[#allocation7 + $0x2d]] }
 0x1c6   : > { %v424_v43 = vadd.f32 %v422_v44, %v402_v55  ;;  %v445_v0 = vadd.f32 %v443_v24, %v425_v22  ;;  %vm724_vm6 = vcmp.lt.s32.totalorder %v1930_v5, 1  ;;  %v442_v55 = vsel %vm2890_vm5, %v3880_v35, 0.0  ;;  %vm3133_vm5 = vmand %vm551_vm0, %vm309_vm15 }
 0x1c7   : > { %v463_v22 = vsel %vm309_vm15, %v2571_v46, 0.0  ;;  %v913_v49 = vstv %s2827_s5  ;;  %v2944_v44 = vmul.f32 %v3881_v4, %v650_v45  ;;  %v669_v51 = vsel %vm668_vm8, %v3878_v48, %v3879_v28  ;;  %v3882_v45 = vld [vmem:[#allocation17_spill] sm:$0xff]  ;;  %vm2972_vm8 = vmand %vm411_vm2, %vm348_vm4  ;;  %s3207_s5 = sld [smem:[#allocation7 + $0x5e]] }
 0x1c8   : > { %v444_v29 = vadd.f32 %v442_v55, %v424_v43  ;;  %v465_v26 = vadd.f32 %v463_v22, %v445_v0  ;;  %v2950_v24 = vpop.permute.xlu1 %823  ;;  %v2953_v56 = vmul.f32 %v3881_v4, %v649_v59  ;;  %v462_v46 = vsel %vm2924_vm9, %v2568_v63, 0.0 }
 0x1c9   : > { %v2959_v35 = vmul.f32 %v742_v60, %v3882_v45  ;;  %v2962_v38 = vmul.f32 %v742_v60, %v3883_v52  ;;  %v2965_v48 = vmul.f32 %v2545_v50, %v670_v61  ;;  %v2978_v63 = vsel %vm3809_vm12, %v912_v31, %v913_v49  ;;  %v2980_v52 = vpop.permute.xlu0 %965  ;;  %v3886_v61 = vld [vmem:[#allocation21_spill] sm:$0xff]  ;;  %v3891_v45 = vld [vmem:[#allocation35_spill] sm:$0xff] }
 0x1ca   : > { %v464_v43 = vadd.f32 %v462_v46, %v444_v29  ;;  %v483_v0 = vadd.f32 %v2593_v7, %v465_v26  ;;  %v2983_v34 = vmul.f32 %v2545_v50, %v669_v51  ;;  %v501_v7 = vsel %vm348_vm4, %v2627_v47, 0.0  ;;  %v3887_v31 = vld [vmem:[#allocation33_spill] sm:$0xff]  ;;  %v3890_v46 = vld [vmem:[#allocation22_spill] sm:$0xff] }
 0x1cb   : > { %v932_v60 = vstv %s2879_s13  ;;  %v933_v28 = vstv %s2881_s24  ;;  %v689_v55 = vsel %vm688_vm1, %v3887_v31, %v3886_v61  ;;  %v690_v50 = vsel %vm688_vm1, %v3886_v61, %v3887_v31  ;;  %vm3041_vm1 = vmand %vm411_vm2, %vm3810_vm3  ;;  %s3260_s13 = sld [smem:[#allocation7 + $0x2e]]  ;;  %s3344_s24 = sld [smem:[#allocation7 + $0x5f]] }
 0x1cc   : > { %v482_v22 = vadd.f32 %v2597_v41, %v464_v43  ;;  %v503_v47 = vadd.f32 %v501_v7, %v483_v0  ;;  %v3011_v4 = vpop.permute.xlu1 %843  ;;  %v500_v51 = vsel %vm2972_vm8, %v2624_v62, 0.0  ;;  %v521_v41 = vsel %vm369_vm7, %v2653_v27, 0.0  ;;  %vm3069_vm2 = vmand %vm551_vm0, %vm267_vm11 }
 0x1cd   : > { %v954_v29 = vstv %s2916_s12  ;;  %v955_v26 = vstv %s2918_s4  ;;  %v707_v43 = vsel %vm706_vm10, %v3891_v45, %v3890_v46  ;;  %v708_v62 = vsel %vm706_vm10, %v3890_v46, %v3891_v45  ;;  %vm3109_vm10 = vmand %vm551_vm0, %vm288_vm14  ;;  %s3407_s12 = sld [smem:[#allocation7 + $0x2f]]  ;;  %s3566_s4 = sld [smem:[#allocation7 + $0x60]] }
 0x1ce   : > { %v502_v0 = vadd.f32 %v500_v51, %v482_v22  ;;  %v523_v59 = vadd.f32 %v521_v41, %v503_v47  ;;  %v3050_v7 = vmul.f32 %v2549_v57, %v690_v50  ;;  %v520_v61 = vsel %vm3007_vm13, %v2650_v15, 0.0  ;;  %vm3181_vm8 = vmand %vm551_vm0, %vm348_vm4 }
 0x1cf   : > { %v541_v31 = vsel %vm3810_vm3, %v2663_v25, 0.0  ;;  %v3060_v22 = vsel %vm3809_vm12, %v932_v60, %v933_v28  ;;  %v3063_v47 = vmul.f32 %v2549_v57, %v689_v55  ;;  %v3077_v25 = vsel %vm3809_vm12, %v954_v29, %v955_v26  ;;  %v3079_v60 = vpop.permute.xlu0 %985  ;;  %v3896_v29 = vld [vmem:[#allocation23_spill] sm:$0xff] }
 0x1d0   : > { %v522_v51 = vadd.f32 %v520_v61, %v502_v0  ;;  %v543_v41 = vadd.f32 %v541_v31, %v523_v59  ;;  %v3073_v15 = vpop.permute.xlu1 %863  ;;  %v3082_v57 = vmul.f32 %v2557_v18, %v708_v62  ;;  %v3085_v28 = vmul.f32 %v2557_v18, %v707_v43 }
 0x1d1   : > { %v540_v55 = vsel %vm3041_vm1, %v2656_v32, 0.0  ;;  %v563_v49 = vsel %vm267_vm11, %v2680_v6, 0.0  ;;  %v725_v26 = vsel %vm724_vm6, %v2588_v2, %v3896_v29  ;;  %v726_v18 = vsel %vm724_vm6, %v3896_v29, %v2588_v2  ;;  %vm3214_vm1 = vmand %vm551_vm0, %vm369_vm7 }
 0x1d2   : > { %v542_v32 = vadd.f32 %v540_v55, %v522_v51  ;;  %v565_v46 = vadd.f32 %v563_v49, %v543_v41  ;;  %v562_v2 = vsel %vm3069_vm2, %v2677_v23, 0.0  ;;  %v583_v45 = vsel %vm288_vm14, %v2735_v17, 0.0 }
 0x1d3   : > { %v974_v43 = vstv %s2990_s30  ;;  %v975_v62 = vstv %s2992_s7  ;;  %v994_v27 = vstv %s3013_s8  ;;  %v995_v61 = vstv %s3015_s0  ;;  %v3158_v29 = vpop.permute.xlu0 %1005  ;;  %s3625_s30 = sld [smem:[#allocation7 + $0x30]]  ;;  %s3631_s7 = sld [smem:[#allocation7 + $0x61]] }
 0x1d4   : > { %v564_v0 = vadd.f32 %v562_v2, %v542_v32  ;;  %v585_v59 = vadd.f32 %v583_v45, %v565_v46  ;;  %v3137_v17 = vpop.permute.xlu1 %881  ;;  %v582_v31 = vsel %vm3109_vm10, %v2698_v10, 0.0  ;;  %v603_v51 = vsel %vm309_vm15, %v2797_v36, 0.0  ;;  %vm3233_vm10 = vmand %vm551_vm0, %vm3810_vm3  ;;  %s1236_s8 = sld [smem:[#allocation2]]  ;;  %s1471_s0 = sshll.u32 %s1801_s2, 7 }
 0x1d5   : > { %vm751_vm9 = vcmp.lt.s32.totalorder %v1930_v5, 127  ;;  %v1012_v41 = vstv %s3025_s16  ;;  %v1013_v50 = vstv %s3027_s1  ;;  %v1032_v32 = vstv %s3045_s15  ;;  %s3931_s16 = sshll.u32 %s1912_s10, 3  ;;  %s1756_s2 = smov [#allocation8]  }
 0x1d6   : > { %v584_v55 = vadd.f32 %v582_v31, %v564_v0  ;;  %v605_v49 = vadd.f32 %v603_v51, %v585_v59  ;;  %v1033_v46 = vstv %s3047_s17  ;;  %v3163_v10 = vmul.f32 %v2575_v12, %v726_v18  ;;  %s201_s1 = scalar_lea.vmem [#allocation8], %s3931_s16 }
 0x1d7   : > { %v3166_v36 = vmul.f32 %v2575_v12, %v725_v26  ;;  %v602_v6 = vsel %vm3133_vm5, %v2786_v54, 0.0  ;;  %vm769_vm6 = vcmp.lt.s32.totalorder %v1930_v5, 126  ;;  %v3174_v2 = vsel %vm3809_vm12, %v974_v43, %v975_v62  ;;  %s1273_s15 = sshll.u32 %s201_s1, 4  ;;  %s3726_s15 = int_to_ptr.vmem [resolvable:$true] %s1273_s15 }
 0x1d8   : > { %v604_v45 = vadd.f32 %v602_v6, %v584_v55  ;;  %v623_v0 = vadd.f32 %v2830_v8, %v605_v49  ;;  %v3185_v54 = vpop.permute.xlu1 %901  ;;  %v3189_v26 = vsel %vm3809_vm12, %v994_v27, %v995_v61  ;;  %v3193_v18 = vsel %vm3809_vm12, %v1012_v41, %v1013_v50 }
 0x1d9   : > { %v641_v8 = vsel %vm348_vm4, %v2884_v53, 0.0  ;;  %vm787_vm13 = vcmp.lt.s32.totalorder %v1930_v5, 125  ;;  %v3201_v43 = vsel %vm3809_vm12, %v1032_v32, %v1033_v46  ;;  %v1052_v62 = vstv %s3093_s25  ;;  %v3239_v46 = vpop.permute.xlu0 %1023 }
 0x1da   : > { %v1053_v59 = vstv %s3095_s9  ;;  %v622_v23 = vadd.f32 %v2857_v58, %v604_v45  ;;  %v643_v27 = vadd.f32 %v641_v8, %v623_v0  ;;  %v1072_v61 = vstv %s3113_s11  ;;  %s3724_s9 = scalar_lea.hbm %s3771_s3, %s1471_s0  ;;  %s1259_s11 = scalar_lea.sflag [#allocation5], %s1912_s10 }
 0x1db   : > { %v1073_v31 = vstv %s3115_s27  ;;  %v640_v51 = vsel %vm3181_vm8, %v2860_v19, 0.0  ;;  %v661_v58 = vsel %vm369_vm7, %v2953_v56, 0.0  ;;  %vm805_vm2 = vcmp.lt.s32.totalorder %v1930_v5, 115  ;;  %s1633_s27 = scalar_lea.vmem %s3726_s15, 128 }
 0x1dc   : > { %v1094_v41 = vstv %s3125_s28  ;;  %v1095_v50 = vstv %s3127_s26  ;;  %v642_v55 = vadd.f32 %v640_v51, %v622_v23  ;;  %v663_v49 = vadd.f32 %v661_v58, %v643_v27  ;;  %v3237_v19 = vpop.permute.xlu1 %921  ;;  %p1634_p9 = scmp.ne.s32.totalorder %s3726_s15, %s1633_s27 }
 0x1dd   : > { %v1114_v6 = vstv %s3141_s19  ;;  %v1115_v56 = vstv %s3143_s29  ;;  %v660_v45 = vsel %vm3214_vm1, %v2944_v44, 0.0  ;;  %v681_v0 = vsel %vm3810_vm3, %v2983_v34, 0.0 }
 0x1de   : > { %vm827_vm5 = vcmp.lt.s32.totalorder %v1930_v5, 114  ;;  %v1134_v12 = vstv %s3154_s21  ;;  %v1135_v8 = vstv %s3156_s22  ;;  %v662_v23 = vadd.f32 %v660_v45, %v642_v55  ;;  %p1635_p13 = pnand %p1634_p9, %p3932_p11 }
 0x1df   : > { %v683_v27 = vadd.f32 %v681_v0, %v663_v49  ;;  %v3254_v51 = vsel %vm3809_vm12, %v1052_v62, %v1053_v59  ;;  %v3258_v58 = vsel %vm3809_vm12, %v1072_v61, %v1073_v31  ;;  %v680_v44 = vsel %vm3233_vm10, %v2965_v48, 0.0  ;;  %v3907_v31 = vld [vmem:[#allocation24_spill] sm:$0xff]  ;;  %v3908_v0 = vld [vmem:[#allocation25_spill] sm:$0xff] }
 0x1e0   : > { %v699_v34 = vsel %vm267_vm11, %v3063_v47, 0.0  ;;  %vm847_vm0 = vcmp.lt.s32.totalorder %v1930_v5, 113  ;;  %v3271_v62 = vsel %vm3809_vm12, %v1094_v41, %v1095_v50  ;;  %v3275_v59 = vsel %vm3809_vm12, %v1114_v6, %v1115_v56  ;;  %v3281_v55 = vpop.permute.xlu1 %941  ;;  %p1636_p7 = pneg %p1635_p13 }
 0x1e1   : > { %v682_v53 = vadd.f32 %v680_v44, %v662_v23  ;;  %v701_v61 = vadd.f32 %v699_v34, %v683_v27  ;;  %v753_v48 = vsel %vm751_vm9, %v3907_v31, %v2719_v14  ;;  %v3285_v47 = vsel %vm3809_vm12, %v1134_v12, %v1135_v8  ;;  %v3305_v12 = vpop.permute.xlu0 %1043  ;;  %v3909_v23 = vld [vmem:[#allocation38_spill] sm:$0xff] }
 0x1e2   : > { %v698_v41 = vsel %vm267_vm11, %v3050_v7, 0.0  ;;  %v717_v50 = vsel %vm288_vm14, %v3085_v28, 0.0  ;;  %vm809_vm8 = vcmp.lt.s32.totalorder %v2578_v20, 240  ;;  %vm867_vm1 = vcmp.lt.s32.totalorder %v1930_v5, 112 }
 0x1e3   : > { %v1152_v49 = vstv %s3205_s18  ;;  %v1153_v32 = vstv %s3207_s5  ;;  %v700_v6 = vadd.f32 %v698_v41, %v682_v53  ;;  %v719_v56 = vadd.f32 %v717_v50, %v701_v61  ;;  %v3910_v53 = vld [vmem:[#allocation26_spill] sm:$0xff] }
 0x1e4   : > { %v752_v45 = vsel %vm751_vm9, %v2719_v14, %v3907_v31  ;;  %v771_v7 = vsel %vm769_vm6, %v3908_v0, %v2781_v40  ;;  %v716_v28 = vsel %vm288_vm14, %v3082_v57, 0.0  ;;  %v735_v8 = vsel %vm309_vm15, %v3166_v36, 0.0  ;;  %v3327_v61 = vpop.permute.xlu1 %963 }
 0x1e5   : > { %v760_v27 = vmul.f32 %v3909_v23, %v753_v48  ;;  %v770_v14 = vsel %vm769_vm6, %v2781_v40, %v3908_v0  ;;  %vm885_vm9 = vcmp.lt.s32.totalorder %v1930_v5, 111  ;;  %v718_v44 = vadd.f32 %v716_v28, %v700_v6  ;;  %v3911_v48 = vld [vmem:[#allocation39_spill] sm:$0xff] }
 0x1e6   : > { %v737_v34 = vadd.f32 %v735_v8, %v719_v56  ;;  %v788_v57 = vsel %vm787_vm13, %v2844_v11, %v3910_v53  ;;  %v789_v36 = vsel %vm787_vm13, %v3910_v53, %v2844_v11  ;;  %v734_v40 = vsel %vm309_vm15, %v3163_v10, 0.0  ;;  %v3912_v11 = vld [vmem:[#allocation28_spill] sm:$0xff] }
 0x1e7   : > { %v759_v31 = vmul.f32 %v3909_v23, %v752_v45  ;;  %v778_v41 = vmul.f32 %v3911_v48, %v771_v7  ;;  %vm905_vm6 = vcmp.lt.s32.totalorder %v1930_v5, 110  ;;  %v3337_v50 = vsel %vm3809_vm12, %v1152_v49, %v1153_v32  ;;  %v3913_v23 = vld [vmem:[#allocation31_spill] sm:$0xff]  ;;  %vm831_vm12 = vmand %vm809_vm8, %vm288_vm14 }
 0x1e8   : > { %v736_v6 = vadd.f32 %v734_v40, %v718_v44  ;;  %v746_v56 = vadd.f32 %v2962_v38, %v737_v34  ;;  %v807_v0 = vsel %vm805_vm2, %v3912_v11, %v2894_v1  ;;  %v1172_v10 = vstv %s3260_s13  ;;  %v3364_v44 = vpop.permute.xlu0 %1063 }
 0x1e9   : > { %v762_v45 = vsel %vm348_vm4, %v760_v27, 0.0  ;;  %v777_v7 = vmul.f32 %v3911_v48, %v770_v14  ;;  %v795_v28 = vmul.f32 %v2660_v42, %v788_v57  ;;  %v796_v49 = vmul.f32 %v2660_v42, %v789_v36  ;;  %v3362_v14 = vpop.permute.xlu1 %983  ;;  %v3914_v36 = vld [vmem:[#allocation34_spill] sm:$0xff] }
 0x1ea   : > { %vm925_vm13 = vcmp.lt.s32.totalorder %v1930_v5, 109  ;;  %v745_v38 = vadd.f32 %v2959_v35, %v736_v6  ;;  %v764_v32 = vadd.f32 %v762_v45, %v746_v56  ;;  %v806_v8 = vsel %vm805_vm2, %v2894_v1, %v3912_v11 }
 0x1eb   : > { %v829_v27 = vsel %vm827_vm5, %v3913_v23, %v2950_v24  ;;  %v761_v42 = vsel %vm348_vm4, %v759_v31, 0.0  ;;  %v780_v35 = vsel %vm369_vm7, %v778_v41, 0.0  ;;  %v818_v34 = vmul.f32 %v2688_v33, %v807_v0 }
 0x1ec   : > { %v828_v1 = vsel %vm827_vm5, %v2950_v24, %v3913_v23  ;;  %vm945_vm2 = vcmp.lt.s32.totalorder %v1930_v5, 99  ;;  %v763_v53 = vadd.f32 %v761_v42, %v745_v38  ;;  %v782_v57 = vadd.f32 %v780_v35, %v764_v32  ;;  %vm811_vm5 = vmand %vm809_vm8, %vm267_vm11  ;;  %v3417_v23 = vpop.permute.xlu0 %1083 }
 0x1ed   : > { %v848_v40 = vsel %vm847_vm0, %v3011_v4, %v3914_v36  ;;  %v849_v31 = vsel %vm847_vm0, %v3914_v36, %v3011_v4  ;;  %v779_v48 = vsel %vm369_vm7, %v777_v7, 0.0  ;;  %v798_v24 = vsel %vm3810_vm3, %v796_v49, 0.0  ;;  %v3915_v4 = vld [vmem:[#allocation37_spill] sm:$0xff]  ;;  %v3401_v45 = vpop.permute.xlu1 %1003 }
 0x1ee   : > { %v817_v41 = vmul.f32 %v2688_v33, %v806_v8  ;;  %v838_v6 = vmul.f32 %v2717_v16, %v829_v27  ;;  %vm967_vm10 = vcmp.lt.s32.totalorder %v1930_v5, 98  ;;  %v781_v56 = vadd.f32 %v779_v48, %v763_v53 }
 0x1ef   : > { %v797_v11 = vsel %vm3810_vm3, %v795_v28, 0.0  ;;  %v800_v0 = vadd.f32 %v798_v24, %v782_v57  ;;  %v869_v33 = vsel %vm867_vm1, %v3915_v4, %v3073_v15  ;;  %v820_v7 = vsel %vm811_vm5, %v818_v34, 0.0  ;;  %vm851_vm3 = vmand %vm809_vm8, %vm309_vm15 }
 0x1f0   : > { %v837_v49 = vmul.f32 %v2717_v16, %v828_v1  ;;  %v857_v38 = vmul.f32 %v2769_v21, %v848_v40  ;;  %v858_v28 = vmul.f32 %v2769_v21, %v849_v31  ;;  %v799_v32 = vadd.f32 %v797_v11, %v781_v56 }
 0x1f1   : > { %v822_v8 = vadd.f32 %v820_v7, %v800_v0  ;;  %v887_v16 = vsel %vm885_vm9, %v2647_v13, %v3137_v17  ;;  %v1173_v27 = vstv %s3344_s24  ;;  %v819_v21 = vsel %vm267_vm11, %v817_v41, 0.0  ;;  %v3441_v36 = vpop.permute.xlu1 %1021 }
 0x1f2   : > { %v840_v42 = vsel %vm831_vm12, %v838_v6, 0.0  ;;  %v868_v35 = vsel %vm867_vm1, %v3073_v15, %v3915_v4  ;;  %v876_v34 = vmul.f32 %v2825_v3, %v869_v33  ;;  %vm949_vm5 = vcmp.lt.s32.totalorder %v2578_v20, 224  ;;  %v3916_v6 = vld [vmem:[#allocation40_spill] sm:$0xff]  ;;  %vm889_vm1 = vmand %vm809_vm8, %vm348_vm4 }
 0x1f3   : > { %vm1007_vm0 = vcmp.lt.s32.totalorder %v1930_v5, 96  ;;  %v821_v1 = vadd.f32 %v819_v21, %v799_v32  ;;  %v842_v53 = vadd.f32 %v840_v42, %v822_v8  ;;  %v886_v57 = vsel %vm885_vm9, %v3137_v17, %v2647_v13 }
 0x1f4   : > { %v907_v15 = vsel %vm905_vm6, %v2732_v37, %v3185_v54  ;;  %v839_v40 = vsel %vm288_vm14, %v837_v49, 0.0  ;;  %v859_v31 = vsel %vm309_vm15, %v857_v38, 0.0  ;;  %v860_v48 = vsel %vm851_vm3, %v858_v28, 0.0  ;;  %v3477_v38 = vpop.permute.xlu0 %1105 }
 0x1f5   : > { %v896_v24 = vmul.f32 %v2898_v30, %v887_v16  ;;  %vm1025_vm12 = vcmp.lt.s32.totalorder %v1930_v5, 95  ;;  %v841_v41 = vadd.f32 %v839_v40, %v821_v1  ;;  %v862_v13 = vadd.f32 %v860_v48, %v842_v53 }
 0x1f6   : > { %v906_v17 = vsel %vm905_vm6, %v3185_v54, %v2732_v37  ;;  %v927_v56 = vsel %vm925_vm13, %v3916_v6, %v3237_v19  ;;  %v875_v11 = vmul.f32 %v2825_v3, %v868_v35  ;;  %v878_v0 = vsel %vm809_vm8, %v876_v34, 0.0  ;;  %v3917_v3 = vld [vmem:[#allocation41_spill] sm:$0xff]  ;;  %v3475_v54 = vpop.permute.xlu1 %1041  ;;  %vm909_vm6 = vmand %vm809_vm8, %vm369_vm7 }
 0x1f7   : > { %v895_v4 = vmul.f32 %v2898_v30, %v886_v57  ;;  %v916_v33 = vmul.f32 %v2978_v63, %v907_v15  ;;  %vm1045_vm3 = vcmp.lt.s32.totalorder %v1930_v5, 94  ;;  %v861_v7 = vadd.f32 %v859_v31, %v841_v41 }
 0x1f8   : > { %v880_v49 = vadd.f32 %v878_v0, %v862_v13  ;;  %v926_v37 = vsel %vm925_vm13, %v3237_v19, %v3916_v6  ;;  %v947_v30 = vsel %vm945_vm2, %v3917_v3, %v3281_v55  ;;  %v898_v28 = vsel %vm889_vm1, %v896_v24, 0.0 }
 0x1f9   : > { %v915_v32 = vmul.f32 %v2978_v63, %v906_v17  ;;  %v936_v8 = vmul.f32 %v3060_v22, %v927_v56  ;;  %vm1065_vm9 = vcmp.lt.s32.totalorder %v1930_v5, 93  ;;  %v1192_v16 = vstv %s3407_s12 }
 0x1fa   : > { %v879_v21 = vadd.f32 %v875_v11, %v861_v7  ;;  %v900_v42 = vadd.f32 %v898_v28, %v880_v49  ;;  %v946_v19 = vsel %vm945_vm2, %v3281_v55, %v3917_v3  ;;  %v969_v63 = vsel %vm967_vm10, %v2980_v52, %v3327_v61  ;;  %v1062_v40 = vpop.permute.xlu1 %1061 }
 0x1fb   : > { %v897_v35 = vsel %vm348_vm4, %v895_v4, 0.0  ;;  %v918_v34 = vsel %vm909_vm6, %v916_v33, 0.0  ;;  %v935_v1 = vmul.f32 %v3060_v22, %v926_v37  ;;  %v958_v53 = vmul.f32 %v3077_v25, %v947_v30 }
 0x1fc   : > { %vm1085_vm13 = vcmp.lt.s32.totalorder %v1930_v5, 83  ;;  %v899_v57 = vadd.f32 %v897_v35, %v879_v21  ;;  %v920_v15 = vadd.f32 %v918_v34, %v900_v42  ;;  %vm3918_vm1 = vcmp.lt.s32.totalorder %v2684_v9, 13 }
 0x1fd   : > { %vm929_vm2 = vmand %vm809_vm8, %vm3918_vm1  ;;  %v968_v55 = vsel %vm967_vm10, %v3327_v61, %v2980_v52  ;;  %vm3919_vm6 = vcmp.lt.s32.totalorder %v1930_v5, 97  ;;  %v917_v31 = vsel %vm369_vm7, %v915_v32, 0.0  ;;  %v957_v24 = vmul.f32 %v3077_v25, %v946_v19  ;;  %v3529_v61 = vpop.permute.xlu0 %1125 }
 0x1fe   : > { %v989_v22 = vsel %vm3919_vm6, %v3079_v60, %v3362_v14  ;;  %v938_v48 = vsel %vm929_vm2, %v936_v8, 0.0  ;;  %v978_v41 = vmul.f32 %v3174_v2, %v969_v63  ;;  %vm1107_vm8 = vcmp.lt.s32.totalorder %v1930_v5, 82  ;;  %vm951_vm10 = vmand %vm949_vm5, %vm267_vm11 }
 0x1ff   : > { %v919_v13 = vadd.f32 %v917_v31, %v899_v57  ;;  %v940_v17 = vadd.f32 %v938_v48, %v920_v15  ;;  %vm3920_vm1 = vmmov %vm3919_vm6  ;;  %v1009_v25 = vsel %vm1007_vm0, %v3158_v29, %v3401_v45  ;;  %vm3921_vm2 = vcmp.lt.s32.totalorder %v2684_v9, 13 }
 0x200   : > { %v988_v52 = vsel %vm3920_vm1, %v3362_v14, %v3079_v60  ;;  %v937_v6 = vsel %vm3921_vm2, %v935_v1, 0.0  ;;  %v960_v56 = vsel %vm951_vm10, %v958_v53, 0.0  ;;  %v977_v11 = vmul.f32 %v3174_v2, %v968_v55  ;;  %vm971_vm1 = vmand %vm949_vm5, %vm288_vm14  ;;  %v1082_v14 = vpop.permute.xlu1 %1081 }
 0x201   : > { %v998_v0 = vmul.f32 %v3189_v26, %v989_v22  ;;  %vm1127_vm6 = vcmp.lt.s32.totalorder %v1930_v5, 81  ;;  %v939_v4 = vadd.f32 %v937_v6, %v919_v13  ;;  %v962_v33 = vadd.f32 %v960_v56, %v940_v17  ;;  %vm991_vm2 = vmand %vm949_vm5, %vm309_vm15  ;;  %v3579_v35 = vpop.permute.xlu0 %1145 }
 0x202   : > { %v1026_v60 = vsel %vm1025_vm12, %v3441_v36, %v3239_v46  ;;  %v1027_v2 = vsel %vm1025_vm12, %v3239_v46, %v3441_v36  ;;  %v959_v7 = vsel %vm267_vm11, %v957_v24, 0.0  ;;  %v980_v49 = vsel %vm971_vm1, %v978_v41, 0.0 }
 0x203   : > { %v997_v37 = vmul.f32 %v3189_v26, %v988_v52  ;;  %v1016_v3 = vmul.f32 %v3193_v18, %v1009_v25  ;;  %vm1089_vm10 = vcmp.lt.s32.totalorder %v2578_v20, 208  ;;  %v961_v30 = vadd.f32 %v959_v7, %v939_v4 }
 0x204   : > { %v982_v28 = vadd.f32 %v980_v49, %v962_v33  ;;  %v1008_v46 = vsel %vm1007_vm0, %v3401_v45, %v3158_v29  ;;  %v1047_v26 = vsel %vm1045_vm3, %v3305_v12, %v3475_v54  ;;  %vm1147_vm12 = vcmp.lt.s32.totalorder %v1930_v5, 80  ;;  %v1104_v63 = vpop.permute.xlu1 %1103  ;;  %vm1029_vm0 = vmand %vm949_vm5, %vm348_vm4 }
 0x205   : > { %v979_v36 = vsel %vm288_vm14, %v977_v11, 0.0  ;;  %v1000_v32 = vsel %vm991_vm2, %v998_v0, 0.0  ;;  %v1035_v8 = vmul.f32 %v3201_v43, %v1026_v60  ;;  %v1036_v21 = vmul.f32 %v3201_v43, %v1027_v2  ;;  %v1164_v56 = vpop.permute.xlu0 %1163  ;;  %vm1111_vm2 = vmand %vm1089_vm10, %vm288_vm14 }
 0x206   : > { %v981_v42 = vadd.f32 %v979_v36, %v961_v30  ;;  %v1002_v19 = vadd.f32 %v1000_v32, %v982_v28  ;;  %v1046_v29 = vsel %vm1045_vm3, %v3475_v54, %v3305_v12  ;;  %v1067_v45 = vsel %vm1065_vm9, %v3364_v44, %v1062_v40 }
 0x207   : > { %v999_v34 = vsel %vm309_vm15, %v997_v37, 0.0  ;;  %v1015_v1 = vmul.f32 %v3193_v18, %v1008_v46  ;;  %v1018_v43 = vsel %vm949_vm5, %v1016_v3, 0.0  ;;  %v1056_v53 = vmul.f32 %v3254_v51, %v1047_v26 }
 0x208   : > { %v1001_v57 = vadd.f32 %v999_v34, %v981_v42  ;;  %v1020_v15 = vadd.f32 %v1018_v43, %v1002_v19  ;;  %v1066_v12 = vsel %vm1065_vm9, %v1062_v40, %v3364_v44  ;;  %v1087_v18 = vsel %vm1085_vm13, %v3417_v23, %v1082_v14  ;;  %vm1049_vm9 = vmand %vm949_vm5, %vm369_vm7  ;;  %v1124_v41 = vpop.permute.xlu1 %1123 }
 0x209   : > { %vm1165_vm3 = vcmp.lt.s32.totalorder %v1930_v5, 79  ;;  %v1037_v54 = vsel %vm348_vm4, %v1035_v8, 0.0  ;;  %v1038_v55 = vsel %vm1029_vm0, %v1036_v21, 0.0  ;;  %v1055_v22 = vmul.f32 %v3254_v51, %v1046_v29 }
 0x20a   : > { %v1076_v31 = vmul.f32 %v3258_v58, %v1067_v45  ;;  %v1019_v48 = vadd.f32 %v1015_v1, %v1001_v57  ;;  %v1040_v24 = vadd.f32 %v1038_v55, %v1020_v15  ;;  %v1086_v44 = vsel %vm1085_vm13, %v1082_v14, %v3417_v23 }
 0x20b   : > { %v1109_v40 = vsel %vm1107_vm8, %v3477_v38, %v1104_v63  ;;  %v1058_v51 = vsel %vm1049_vm9, %v1056_v53, 0.0  ;;  %v1075_v13 = vmul.f32 %v3258_v58, %v1066_v12  ;;  %v1098_v17 = vmul.f32 %v3271_v62, %v1087_v18  ;;  %vm1131_vm9 = vmand %vm1089_vm10, %vm309_vm15 }
 0x20c   : > { %v1108_v52 = vsel %vm1107_vm8, %v1104_v63, %v3477_v38  ;;  %v1039_v25 = vadd.f32 %v1037_v54, %v1019_v48  ;;  %v1060_v6 = vadd.f32 %v1058_v51, %v1040_v24  ;;  %vm3922_vm1 = vcmp.lt.s32.totalorder %v2684_v9, 13 }
 0x20d   : > { %vm1069_vm13 = vmand %vm949_vm5, %vm3922_vm1  ;;  %v1129_v23 = vsel %vm1127_vm6, %v3529_v61, %v1124_v41  ;;  %v1193_v11 = vstv %s3566_s4  ;;  %v1057_v58 = vsel %vm369_vm7, %v1055_v22, 0.0  ;;  %v1097_v38 = vmul.f32 %v3271_v62, %v1086_v44  ;;  %v1144_v62 = vpop.permute.xlu1 %1143 }
 0x20e   : > { %v1078_v0 = vsel %vm1069_vm13, %v1076_v31, 0.0  ;;  %v1118_v4 = vmul.f32 %v3275_v59, %v1109_v40  ;;  %v1059_v33 = vadd.f32 %v1057_v58, %v1039_v25  ;;  %vm1091_vm5 = vmand %vm1089_vm10, %vm267_vm11  ;;  %v1117_v2 = vmul.f32 %v3275_v59, %v1108_v52 }
 0x20f   : > { %v1080_v60 = vadd.f32 %v1078_v0, %v1060_v6  ;;  %v1128_v14 = vsel %vm1127_vm6, %v1124_v41, %v3529_v61  ;;  %vm3923_vm8 = vmmov %vm3922_vm1  ;;  %v1100_v49 = vsel %vm1091_vm5, %v1098_v17, 0.0  ;;  %v1138_v37 = vmul.f32 %v3285_v47, %v1129_v23 }
 0x210   : > { %v1077_v7 = vsel %vm3923_vm8, %v1075_v13, 0.0  ;;  %v1149_v3 = vsel %vm1147_vm12, %v3579_v35, %v1144_v62  ;;  %vm3924_vm6 = vcmp.eq.s32.totalorder %v2230_v39, 0  ;;  %vm1185_vm0 = vcmp.lt.s32.totalorder %v1930_v5, 78 }
 0x211   : > { %v1079_v30 = vadd.f32 %v1077_v7, %v1059_v33  ;;  %v1102_v28 = vadd.f32 %v1100_v49, %v1080_v60  ;;  %v1174_v59 = vsel %vm3924_vm6, %v1172_v10, %v1173_v27  ;;  %v1099_v61 = vsel %vm267_vm11, %v1097_v38, 0.0  ;;  %v1162_v10 = vpop.permute.xlu1 %1161  ;;  %vm3925_vm11 = vmmov %vm3924_vm6 }
 0x212   : > { %v1120_v46 = vsel %vm1111_vm2, %v1118_v4, 0.0  ;;  %v1137_v26 = vmul.f32 %v3285_v47, %v1128_v14  ;;  %v1156_v36 = vmul.f32 %v3337_v50, %v1149_v3  ;;  %v1119_v8 = vsel %vm288_vm14, %v1117_v2, 0.0  ;;  %v1184_v47 = vpop.permute.xlu0 %1183  ;;  %vm3688_vm14 = vmand %vm1089_vm10, %vm348_vm4 }
 0x213   : > { %v1101_v32 = vadd.f32 %v1099_v61, %v1079_v30  ;;  %v1122_v21 = vadd.f32 %v1120_v46, %v1102_v28  ;;  %v1194_v27 = vsel %vm3925_vm11, %v1192_v16, %v1193_v11  ;;  %v1140_v42 = vsel %vm1131_vm9, %v1138_v37, 0.0 }
 0x214   : > { %v1148_v19 = vsel %vm1147_vm12, %v1144_v62, %v3579_v35  ;;  %v1166_v29 = vsel %vm1165_vm3, %v1162_v10, %v1164_v56  ;;  %v1167_v45 = vsel %vm1165_vm3, %v1164_v56, %v1162_v10  ;;  %v1212_v43 = vstv %s3625_s30  ;;  %vm1189_vm12 = vmand %vm1089_vm10, %vm369_vm7 }
 0x215   : > { %v1121_v63 = vadd.f32 %v1119_v8, %v1101_v32  ;;  %v1142_v34 = vadd.f32 %v1140_v42, %v1122_v21  ;;  %v1176_v1 = vmul.f32 %v1174_v59, %v1167_v45  ;;  %v1139_v53 = vsel %vm309_vm15, %v1137_v26, 0.0  ;;  %v1182_v22 = vpop.permute.xlu1 %1181  ;;  %vm3928_vm3 = vmmov %vm3924_vm6  ;;  %v1587_v45 = vld [vmem:[%s1918_s23] sm:$0xff]  ;;  %s1637_s23 = sshll.u32 %s1756_s2, 4  ;;  %s1638_s23 = int_to_ptr.vmem [resolvable:$false] %s1637_s23 }
 0x216   : > { %v1158_v16 = vsel %vm1089_vm10, %v1156_v36, 0.0  ;;  %v1175_v57 = vmul.f32 %v1174_v59, %v1166_v29  ;;  %v1213_v15 = vstv %s3631_s7  ;;  %v1155_v18 = vmul.f32 %v3337_v50, %v1148_v19  ;;  %v1204_v41 = vpop.permute.xlu0 %1203  ;;  %s1639_s28 = scalar_lea.vmem %s1638_s23, 256  ;;  %p1640_p0 = scmp.lt.s32.totalorder %s3726_s15, %s1638_s23 }
 0x217   : > { %v1141_v12 = vadd.f32 %v1139_v53, %v1121_v63  ;;  %v1160_v54 = vadd.f32 %v1158_v16, %v1142_v34  ;;  %v1178_v55 = vsel %vm3688_vm14, %v1176_v1, 0.0  ;;  %v1186_v31 = vsel %vm1185_vm0, %v1182_v22, %v1184_v47  ;;  %p1641_p3 = scmp.lt.s32.totalorder %s1639_s28, %s1633_s27 }
 0x218   : > { %v1187_v48 = vsel %vm1185_vm0, %v1184_v47, %v1182_v22  ;;  %v1195_v44 = vmul.f32 %v1194_v27, %v1186_v31  ;;  %vm1205_vm15 = vcmp.lt.s32.totalorder %v1930_v5, 77  ;;  %v1177_v50 = vsel %vm348_vm4, %v1175_v57, 0.0  ;;  %vm3929_vm4 = vmmov %vm3922_vm1 }
 0x219   : > { %v1159_v24 = vadd.f32 %v1155_v18, %v1141_v12  ;;  %v1196_v40 = vmul.f32 %v1194_v27, %v1187_v48  ;;  %v1180_v51 = vadd.f32 %v1178_v55, %v1160_v54  ;;  %v1214_v13 = vsel %vm3928_vm3, %v1212_v43, %v1213_v15  ;;  %v1202_v6 = vpop.permute.xlu1 %1201  ;;  %vm1209_vm1 = vmand %vm1089_vm10, %vm3929_vm4  ;;  %p1642_p12 = por %p1641_p3, %p1640_p0 }
 0x21a   : > { %v1197_v52 = vsel %vm369_vm7, %v1195_v44, 0.0  ;;  %v1206_v5 = vsel %vm1205_vm15, %v1202_v6, %v1204_v41  ;;  %v1207_v23 = vsel %vm1205_vm15, %v1204_v41, %v1202_v6  ;;  %vm1221_vm13 = vcmask 1041408   ;;  %vm3930_vm5 = vmmov %vm3929_vm4 }
 0x21b   : > { %v1179_v17 = vadd.f32 %v1177_v50, %v1159_v24  ;;  %v1198_v25 = vsel %vm1189_vm12, %v1196_v40, 0.0  ;;  %v1215_v56 = vmul.f32 %v1214_v13, %v1206_v5  ;;  %v1216_v11 = vmul.f32 %v1214_v13, %v1207_v23  ;;  %p1643_p5 = pnand %p1642_p12, %p1636_p7 }
 0x21c   : > { %v1200_v0 = vadd.f32 %v1198_v25, %v1180_v51  ;;  %v1237_v61 = vstv %s1236_s8 }
 0x21d   : > { %v1199_v58 = vadd.f32 %v1197_v52, %v1179_v17  ;;  %v1217_v39 = vsel %vm3930_vm5, %v1215_v56, 0.0  ;;  %v1218_v38 = vsel %vm1209_vm1, %v1216_v11, 0.0 }
 0x21e   : > { %v1220_v33 = vadd.f32 %v1218_v38, %v1200_v0 }
 0x21f   : > { %v1219_v4 = vadd.f32 %v1217_v39, %v1199_v58 }
 0x220   : > { %v1229_v2 = vsel %vm1221_vm13, %v1220_v33, 0.0 }
 0x221   : > { %v1222_v60 = vsel %vm1221_vm13, %v1219_v4, 0.0  ;;  %v1230_v62 = vrot.slane %v1229_v2, 4 }
 0x222   : > { %v1223_v14 = vrot.slane %v1222_v60, 4 }
 0x223   : > { %v1231_v49 = vadd.f32 %v1230_v62, %v1229_v2 }
 0x224   : > { %v1224_v7 = vadd.f32 %v1223_v14, %v1222_v60 }
 0x225   : > { %v1232_v3 = vrot.slane %v1231_v49, 2 }
 0x226   : > { %v1225_v37 = vrot.slane %v1224_v7, 2 }
 0x227   : > { %v1233_v28 = vadd.f32 %v1232_v3, %v1231_v49 }
 0x228   : > { %v1226_v30 = vadd.f32 %v1225_v37, %v1224_v7 }
 0x229   : > { %v1234_v59 = vrot.slane %v1233_v28, 1 }
 0x22a   : > { %v1227_v20 = vrot.slane %v1226_v30, 1 }
 0x22b   : > { %v1235_v9 = vadd.f32 %v1234_v59, %v1233_v28 }
 0x22c   : > { %v1228_v46 = vadd.f32 %v1227_v20, %v1226_v30 }
 0x22d   : > { %v1239_v36 = vadd.f32 %v1237_v61, %v1235_v9 }
 0x22e   : > { %v1238_v26 = vadd.f32 %v1237_v61, %v1228_v46 }
 0x22f   : > { %v1464_v8 = vmul.f32 -1.442695, %v1239_v36 }
 0x230   : > { %v1463_v32 = vmul.f32 -1.442695, %v1238_v26 }
 0x232   : > { %1579 = vpow2.f32 %v1463_v32 }
 0x233   : > { %1581 = vpow2.f32 %v1464_v8 }
 0x23c   : > { %v1580_v21 = vpop.eup %1579 }
 0x23d   : > { %v1582_v10 = vpop.eup %1581  ;;  %v1246_v27 = vadd.f32 1.0, %v1580_v21 }
 0x23e   : > { %v1247_v47 = vadd.f32 1.0, %v1582_v10 }
 0x23f   : > { %1583 = vrcp.f32 %v1246_v27 }
 0x240   : > { %1585 = vrcp.f32 %v1247_v47 }
 0x249   : > { %v1584_v42 = vpop.eup %1583 }
 0x24a   : > { %v1586_v19 = vpop.eup %1585 }
 0x24b   : > { %v1254_v29 = vcombine.low %v1584_v42, %v1586_v19 }
 0x24d   : > { %v1256_v63 = vmul.f32 %v1587_v45, %v1254_v29 }
 0x24f   : > { %1257 = vst [vmem:[%s201_s1] sm:$0xff] %v1256_v63 }
 0x250   : > { %1646 = shalt.err (!%p1643_p5)
}
 0x251   : > { %s1647_s10 = scalar_lea.hbm %s3724_s9, 128  ;;  %s1651_s29 = scalar_lea.hbm %s3771_s3, 256 }
 0x252   : > { %p1648_p10 = scmp.ne.s32.totalorder %s3724_s9, %s1647_s10  ;;  %p1652_p4 = scmp.lt.u32.totalorder %s3724_s9, %s3771_s3 }
 0x253   : > { %p1653_p6 = scmp.lt.u32.totalorder %s1651_s29, %s1647_s10  ;;  %p1655_p9 = scmp.lt.u32.totalorder %s1647_s10, %s3724_s9 }
 0x254   : > { %p1649_p2 = pnand %p1648_p10, %p3932_p11 }
 0x255   : > { %p1654_p8 = por %p1653_p6, %p1652_p4 }
 0x256   : > { %p1650_p1 = pneg %p1649_p2 }
 0x257   : > { %p1656_p13 = por %p1655_p9, %p1654_p8 }
 0x259   : > { %p1657_p7 = pnand %p1656_p13, %p1650_p1 }
 0x25b   : > { %1660 = shalt.err (!%p1657_p7)
}
 0x25c   : > { %1478 = dma.vmem_to_hbm [thread:$0]  (%p3932_p11), %s3726_s15, 128, %s3724_s9, %s1259_s11  }
 0x25d PF: > { %s3933_s18 = sld [smem:[#allocation14_spill]]  ;;  %s1285_s5 = sand.u32 1, %s1691_s14  }
 0x25e   : > { %p3934_p0 = scmp.ne.s32.totalorder %s3817_s20, 0  ;;  %s1286_s13 = scalar_lea.sflag [#allocation5], %s1285_s5 }
 0x263   : > { %p3935_p3 = scmp.ge.s32.totalorder %s3933_s18, 2 }
 0x265   : > { %p1489_p12 = pnand %p3935_p3, %p3934_p0 }
 0x267   : > { %1686 = dma.done.wait (!%p1489_p12), %s1286_s13, 128  }
 0x268   : > { %1688 = vsyncadd (!%p1489_p12), %s1286_s13, 4294967168  ;;  %s3936_s17 = sld [smem:[#allocation15_spill]]  ;;  %s3937_s14 = sld [smem:[#allocation12_spill]] }
 0x269   : > { %s3938_s15 = sld [smem:[#allocation13_spill]]  ;;  %s3939_s16 = sld [smem:[#allocation16_spill]] }
 0x26e   : > { %p18_p5 = scmp.ge.s32.totalorder %s3936_s17, 4  }
 0x270   :  { %20 = sbr.rel (!%p18_p5) target bundleno = 10 (0xa), region = 82 }
 0x277   :  { %1291 = vsyncpa [#allocation4], 1 }
 0x278   :  { %1293 = vsyncpa [#allocation4 + $0x1], 1 }
 0x279   :  { %1294 = vsyncpa [#allocation5], 1 }
 0x27a   :  { %1296 = vsyncpa [#allocation5 + $0x1], 1 }
 0x27b   :  { %1297 = vsyncpa [#allocation6], 1 }
 0x27c   :  { %1299 = vsyncpa [#allocation6 + $0x1], 1 }

</bundles_post_ra>
